<compile_context>
chip_gen: v7x
topology: tpu7x:2x2x1
jax: 0.10.0
libtpu: 0.0.40
codegen_flags: <defaults>
</compile_context>

<pallas_src>
import functools

import jax
import jax.numpy as jnp
from jax import lax
from jax.experimental import pallas as pl
from jax.experimental.pallas import tpu as pltpu


def _round_up(x, m):
    return (x + m - 1) // m * m


# ----------------------------- fused Pallas kernel -------------------------- #

def _make_fused_head_kernel(H, W, GM, GT, Ncomp):
    Hp, Wp = H + 2, W + 2
    C = 16
    # 3x3 tap offsets in the row-flattened padded image, (kh, kw) row-major to
    # match the (Cout, 3, 3, Cin) -> (Cout, 9*Cin) host-side weight packing.
    OFFS = [(kh - 1) * Wp + (kw - 1) for kh in range(3) for kw in range(3)]

    def conv3x3(src_ref, w_ref):
        # Unrolled 9-term accumulation: 9 small K=16 MXU matmuls (MXU has huge
        # slack at Cout<=16; the ld/st + VPU slots do not, so no tap concat).
        w = w_ref[...]
        acc = None
        for k, d in enumerate(OFFS):
            x = src_ref[:, GM + d:GM + d + Ncomp]
            t = jnp.dot(w[:, C * k:C * (k + 1)], x,
                        preferred_element_type=jnp.float32)
            acc = t if acc is None else acc + t
        return acc

    def kernel(gf_ref, senti_ref, mask_ref,
               wg1_ref, wg2_ref, wsp0_ref, ws1_ref, ws2_ref, wseg_ref,
               bias_ref, o_ref,
               a1_buf, a2_buf, b0_buf, b1_buf, fuse_buf):
        # Zero scratch margins once: tap / replicate-pad slices read up to Wp+1
        # lanes into them and multiply-masking must never see garbage/NaN.
        for buf in (a1_buf, a2_buf, b0_buf, b1_buf, fuse_buf):
            buf[:, 0:GM] = jnp.zeros((C, GM), buf.dtype)
            buf[:, GM + Ncomp:GM + Ncomp + GT] = jnp.zeros((C, GT), buf.dtype)

        valid = mask_ref[0:1, :]      # 1 inside each image, 0 on pad ring / gaps
        left = mask_ref[1:2, :]       # wp == 0
        right = mask_ref[2:3, :]      # wp == Wp-1
        top = mask_ref[3:4, :]        # hp == 0
        bottom = mask_ref[4:5, :]     # hp == Hp-1

        def bias_col(k):
            return bias_ref[:, k:k + 1]                          # (16, 1) f32

        def store(dst_ref, y):
            # Zero the pad ring / gaps so the next conv sees exact zero padding.
            dst_ref[:, GM:GM + Ncomp] = (y * valid).astype(dst_ref.dtype)

        # ---------------- GFpre = ResidualBlock(16, 16, 1) -------------------
        y = conv3x3(gf_ref, wg1_ref) + bias_col(0)
        store(a1_buf, jnp.maximum(y, 0.0))                        # ReLU(BN1(conv1))

        gf_res = gf_ref[:, GM:GM + Ncomp].astype(jnp.float32)
        y = conv3x3(a1_buf, wg2_ref) + bias_col(1) + gf_res
        store(a2_buf, jnp.maximum(y, 0.0))                        # gfpre

        # ------------ Sentipre = Conv1x1(32->16) + ResidualBlock -------------
        s_c = senti_ref[:, GM:GM + Ncomp]
        y = jnp.dot(wsp0_ref[...], s_c,
                    preferred_element_type=jnp.float32) + bias_col(2)
        store(b0_buf, y)                                          # no activation

        y = conv3x3(b0_buf, ws1_ref) + bias_col(3)
        store(b1_buf, jnp.maximum(y, 0.0))

        b0_res = b0_buf[:, GM:GM + Ncomp].astype(jnp.float32)
        spre = jnp.maximum(conv3x3(b1_buf, ws2_ref) + bias_col(4) + b0_res, 0.0)

        # ---------------------- fuse (+ CBAM identity) -----------------------
        gfpre = a2_buf[:, GM:GM + Ncomp].astype(jnp.float32)
        # TODO(synk): CBAMBlock definition not provided in the source; identity.
        fuse = (spre + gfpre) * valid
        fuse_buf[:, GM:GM + Ncomp] = fuse.astype(fuse_buf.dtype)

        # --------- replicate-pad `fuse` for the SegmentationHead conv --------
        lf = fuse_buf[:, GM + 1:GM + 1 + Ncomp].astype(jnp.float32)
        rf = fuse_buf[:, GM - 1:GM - 1 + Ncomp].astype(jnp.float32)
        f2 = fuse + left * lf + right * rf
        a1_buf[:, GM:GM + Ncomp] = f2.astype(a1_buf.dtype)        # reuse a1
        tf = a1_buf[:, GM + Wp:GM + Wp + Ncomp].astype(jnp.float32)
        bf = a1_buf[:, GM - Wp:GM - Wp + Ncomp].astype(jnp.float32)
        fr = f2 + top * tf + bottom * bf
        a1_buf[:, GM:GM + Ncomp] = fr.astype(a1_buf.dtype)

        # --------------- SegmentationHead 3x3 conv + sigmoid -----------------
        # wseg is zero-padded to 8 output rows; only row 0 is real (host crops),
        # so the epilogue and the output store are full-sublane and lane-dense.
        y = conv3x3(a1_buf, wseg_ref) + bias_ref[0:8, 5:6]
        o_ref[...] = jax.nn.sigmoid(y).astype(o_ref.dtype)

    return kernel


# ------------------------------ host-side glue ------------------------------ #

def _pack_inputs(x, Bg, n_groups, GM, GT, Ncomp):
    """(B, C, H, W) -> (C, n_groups*Lgrp) bf16: zero ring, row-flatten, lane-fold."""
    B, Cc, H, W = x.shape
    Hp, Wp = H + 2, W + 2
    Limg = Hp * Wp
    Lgrp = GM + Ncomp + GT
    Bpad = Bg * n_groups
    xp = jnp.pad(x, ((0, Bpad - B), (0, 0), (1, 1), (1, 1)))
    flat = xp.reshape(Bpad, Cc, Limg)
    flat = flat.reshape(n_groups, Bg, Cc, Limg).transpose(0, 2, 1, 3)
    flat = flat.reshape(n_groups, Cc, Bg * Limg)
    buf = jnp.pad(flat, ((0, 0), (0, 0), (GM, Lgrp - GM - Bg * Limg)))
    buf = buf.transpose(1, 0, 2).reshape(Cc, n_groups * Lgrp)
    return buf.astype(jnp.bfloat16)


def _make_masks(H, W, Bg, Ncomp):
    """(8, Ncomp) f32: rows = [valid, wp==0, wp==Wp-1, hp==0, hp==Hp-1, 0, 0, 0]."""
    Hp, Wp = H + 2, W + 2
    Limg = Hp * Wp
    q = jnp.arange(Ncomp, dtype=jnp.int32)
    inb = q < Bg * Limg
    qq = q % Limg
    hp = qq // Wp
    wp = qq % Wp

    def m(c):
        return (inb & c).astype(jnp.float32)

    zeros = jnp.zeros((Ncomp,), jnp.float32)
    rows = [m((hp >= 1) & (hp <= H) & (wp >= 1) & (wp <= W)),
            m(wp == 0), m(wp == Wp - 1), m(hp == 0), m(hp == Hp - 1),
            zeros, zeros, zeros]
    return jnp.stack(rows, axis=0)


def _pack_conv3x3(w, bn_scale=None):
    """(Cout, Cin, 3, 3) [* folded BN scale] -> (Cout, 9*Cin) bf16, tap-major."""
    if bn_scale is not None:
        w = w * bn_scale[:, None, None, None]
    cout, cin = w.shape[:2]
    return jnp.transpose(w, (0, 2, 3, 1)).reshape(cout, 9 * cin).astype(jnp.bfloat16)


@functools.partial(jax.jit, static_argnames=("n_groups",))
def ulstm_forward(gf2fea, lowsentifea, params, n_groups=1):
    """ULSTM forward from the backbone features onward (mode='test').

    gf2fea      : (B, 16, H, W)  -- stands in for GFNet(Sobel(Gf2))
    lowsentifea : (B, 32, h, w)  -- stands in for BConvLSTM(NewSenti)
    n_groups    : lane-fold groups (1 for v5e/v6e single TC, 2 for v7x).
    """
    B, _, H, W = gf2fea.shape
    Hp, Wp = H + 2, W + 2
    Limg = Hp * Wp
    Bg = -(-B // n_groups)                      # batches per group (ceil)
    GM = _round_up(Wp + 1, 128)                 # head margin >= max tap shift
    GT = _round_up(Wp + 1, 128)                 # tail margin
    Ncomp = _round_up(Bg * Limg, 128)           # lane-dense compute window
    Lgrp = GM + Ncomp + GT

    # sentifea = F.interpolate(lowsentifea, size=(h, w), mode='bilinear')
    sentifea = jax.image.resize(
        lowsentifea, (B, lowsentifea.shape[1], H, W), method="bilinear")

    gf_buf = _pack_inputs(gf2fea, Bg, n_groups, GM, GT, Ncomp)       # (16, n*Lgrp)
    senti_buf = _pack_inputs(sentifea, Bg, n_groups, GM, GT, Ncomp)  # (32, n*Lgrp)
    masks = _make_masks(H, W, Bg, Ncomp)                             # (8, Ncomp)

    # fold eval-mode BatchNorm scale into the conv weights (bias stays separate)
    gp, sp = params["gfpre"], params["sentipre_rb"]
    sg1, bg1 = gp["bn1"]
    sg2, bg2 = gp["bn2"]
    ss1, bs1 = sp["bn1"]
    ss2, bs2 = sp["bn2"]
    wg1 = _pack_conv3x3(gp["w1"], sg1)
    wg2 = _pack_conv3x3(gp["w2"], sg2)
    ws1 = _pack_conv3x3(sp["w1"], ss1)
    ws2 = _pack_conv3x3(sp["w2"], ss2)
    wseg = jnp.pad(_pack_conv3x3(params["w_seg"]), ((0, 7), (0, 0)))  # (8, 144)
    wsp0 = params["w_sp0"][:, :, 0, 0].astype(jnp.bfloat16)           # (16, 32)

    biases = jnp.stack(
        [bg1, bg2, params["b_sp0"], bs1, bs2,
         jnp.full((16,), params["b_seg"][0], jnp.float32)], axis=1)   # (16, 6)
    biases = jnp.pad(biases, ((0, 0), (0, 2)))                        # (16, 8)

    macs_per_px = 4 * 16 * 144 + 16 * 32 + 8 * 144
    n_px = n_groups * Ncomp
    cost = pl.CostEstimate(
        flops=2 * n_px * macs_per_px,
        transcendentals=2 * n_px,                      # exp + reciprocal (sigmoid)
        bytes_accessed=(gf_buf.size + senti_buf.size) * 2 + masks.size * 4
                       + 8 * n_px * 4
                       + (4 * 16 * 144 + 16 * 32 + 8 * 144) * 2 + 16 * 8 * 4)

    kernel = _make_fused_head_kernel(H, W, GM, GT, Ncomp)
    out = pl.pallas_call(
        kernel,
        out_shape=jax.ShapeDtypeStruct((8, n_groups * Ncomp), jnp.float32),
        grid=(n_groups,),
        in_specs=[
            pl.BlockSpec((16, Lgrp), lambda g: (0, g)),   # gf2fea   (group g)
            pl.BlockSpec((32, Lgrp), lambda g: (0, g)),   # sentifea (group g)
            pl.BlockSpec((8, Ncomp), lambda g: (0, 0)),   # masks (shared)
            pl.BlockSpec((16, 144), lambda g: (0, 0)),    # wg1
            pl.BlockSpec((16, 144), lambda g: (0, 0)),    # wg2
            pl.BlockSpec((16, 32), lambda g: (0, 0)),     # wsp0
            pl.BlockSpec((16, 144), lambda g: (0, 0)),    # ws1
            pl.BlockSpec((16, 144), lambda g: (0, 0)),    # ws2
            pl.BlockSpec((8, 144), lambda g: (0, 0)),     # wseg (padded rows)
            pl.BlockSpec((16, 8), lambda g: (0, 0)),      # biases
        ],
        out_specs=pl.BlockSpec((8, Ncomp), lambda g: (0, g)),
        scratch_shapes=[pltpu.VMEM((16, Lgrp), jnp.bfloat16) for _ in range(5)],
        compiler_params=pltpu.CompilerParams(dimension_semantics=("parallel",)),
        cost_estimate=cost,
    )(gf_buf, senti_buf, masks, wg1, wg2, wsp0, ws1, ws2, wseg, biases)

    # unpack: real row 0, drop lane padding + zero pad ring, first B batches
    seg = out[0].reshape(n_groups, Ncomp)[:, :Bg * Limg]
    seg = seg.reshape(n_groups * Bg, Hp, Wp)[:B, 1:H + 1, 1:W + 1]
    return seg[:, None, :, :]


# ------------------------- module parameters -------------------------------- #

def _bn_eval_fold(c):
    # PyTorch BatchNorm2d at init, eval mode: gamma=1, beta=0, mean=0, var=1.
    gamma = jnp.ones((c,), jnp.float32)
    beta = jnp.zeros((c,), jnp.float32)
    mean = jnp.zeros((c,), jnp.float32)
    var = jnp.ones((c,), jnp.float32)
    eps = 1e-5
    scale = gamma / jnp.sqrt(var + eps)
    bias = beta - mean * scale
    return scale, bias


def _residual_block_params(key, cin, cout):
    k1, k2 = jax.random.split(key)
    return {
        "w1": 0.05 * jax.random.normal(k1, (cout, cin, 3, 3), jnp.float32),
        "bn1": _bn_eval_fold(cout),
        "w2": 0.05 * jax.random.normal(k2, (cout, cout, 3, 3), jnp.float32),
        "bn2": _bn_eval_fold(cout),
    }


def make_params(key):
    k_gf, k_sp0, k_sprb, k_seg = jax.random.split(key, 4)
    return {
        "gfpre": _residual_block_params(k_gf, 16, 16),
        "w_sp0": 0.05 * jax.random.normal(k_sp0, (16, 32, 1, 1), jnp.float32),
        "b_sp0": jnp.zeros((16,), jnp.float32),
        "sentipre_rb": _residual_block_params(k_sprb, 16, 16),
        "w_seg": 0.05 * jax.random.normal(k_seg, (1, 16, 3, 3), jnp.float32),
        "b_seg": jnp.zeros((1,), jnp.float32),
    }


# ------------------------- pure-JAX reference -------------------------------- #

def _conv3x3_ref(x, w, b, pad_mode="zeros"):
    mode = "edge" if pad_mode == "replicate" else "constant"
    xp = jnp.pad(x, ((0, 0), (0, 0), (1, 1), (1, 1)), mode=mode)
    y = lax.conv_general_dilated(xp, w, (1, 1), "VALID",
                                 dimension_numbers=("NCHW", "OIHW", "NCHW"))
    return y + b.reshape(1, -1, 1, 1)


def _residual_block_ref(x, p):
    s1, b1 = p["bn1"]
    s2, b2 = p["bn2"]
    w1 = p["w1"] * s1[:, None, None, None]
    w2 = p["w2"] * s2[:, None, None, None]
    y = jax.nn.relu(_conv3x3_ref(x, w1, b1))
    return jax.nn.relu(_conv3x3_ref(y, w2, b2) + x)


@jax.jit
def ulstm_forward_reference(gf2fea, lowsentifea, params):
    B, _, H, W = gf2fea.shape
    sentifea = jax.image.resize(
        lowsentifea, (B, lowsentifea.shape[1], H, W), method="bilinear")
    gfpre = _residual_block_ref(gf2fea, params["gfpre"])
    s0 = jnp.einsum("oi,bihw->bohw", params["w_sp0"][:, :, 0, 0], sentifea)
    s0 = s0 + params["b_sp0"].reshape(1, -1, 1, 1)
    spre = _residual_block_ref(s0, params["sentipre_rb"])
    fuse = spre + gfpre                      # CBAM treated as identity
    seg = _conv3x3_ref(fuse, params["w_seg"], params["b_seg"], pad_mode="replicate")
    return jax.nn.sigmoid(seg)


# ---------------------------------- main ------------------------------------- #

if __name__ == "__main__":
    B, H, W = 2, 16, 16
    low_hw = 8  # spatial size of the BConvLSTM feature map before upsampling

    k_gf, k_senti = jax.random.split(jax.random.PRNGKey(0))
    # Stand-ins for the undefined backbone outputs (see TODO at top of file).
    gf2fea = jax.random.normal(k_gf, (B, 16, H, W), jnp.float32)
    lowsentifea = jax.random.normal(k_senti, (B, 32, low_hw, low_hw), jnp.float32)

    params = make_params(jax.random.PRNGKey(42))

    pcrop = jax.block_until_ready(ulstm_forward(gf2fea, lowsentifea, params))
    ref = jax.block_until_ready(ulstm_forward_reference(gf2fea, lowsentifea, params))

    assert pcrop.shape == (B, 1, H, W)
    assert bool(jnp.all(jnp.isfinite(pcrop)))
    assert bool(jnp.all((pcrop >= 0.0) & (pcrop <= 1.0)))

    # explicit corner check (replicate-pad corner handling, per review concern)
    rr = [0, 0, H - 1, H - 1]
    cc = [0, W - 1, 0, W - 1]
    corner_err = float(jnp.max(jnp.abs(pcrop[:, :, rr, cc] - ref[:, :, rr, cc])))
    assert corner_err < 2e-2, f"corner mismatch: {corner_err}"

    max_err = float(jnp.max(jnp.abs(pcrop - ref)))
    assert max_err < 2e-2, f"mismatch vs reference: max abs err {max_err}"
    print("KERNEL_OK")
</pallas_src>

<mosaic_0001>
module attributes {stable_mosaic.version = 11 : i64} {
  func.func @kernel(%arg0: i32, %arg1: memref<16x1024xbf16, #tpu.memory_space<vmem>>, %arg2: memref<32x1024xbf16, #tpu.memory_space<vmem>>, %arg3: memref<8x768xf32, #tpu.memory_space<vmem>>, %arg4: memref<16x144xbf16, #tpu.memory_space<vmem>>, %arg5: memref<16x144xbf16, #tpu.memory_space<vmem>>, %arg6: memref<16x32xbf16, #tpu.memory_space<vmem>>, %arg7: memref<16x144xbf16, #tpu.memory_space<vmem>>, %arg8: memref<16x144xbf16, #tpu.memory_space<vmem>>, %arg9: memref<8x144xbf16, #tpu.memory_space<vmem>>, %arg10: memref<16x8xf32, #tpu.memory_space<vmem>>, %arg11: memref<8x768xf32, #tpu.memory_space<vmem>>, %arg12: memref<16x1024xbf16, #tpu.memory_space<vmem>>, %arg13: memref<16x1024xbf16, #tpu.memory_space<vmem>>, %arg14: memref<16x1024xbf16, #tpu.memory_space<vmem>>, %arg15: memref<16x1024xbf16, #tpu.memory_space<vmem>>, %arg16: memref<16x1024xbf16, #tpu.memory_space<vmem>>) attributes {dimension_semantics = [#tpu.dimension_semantics<parallel>], iteration_bounds = array<i64: 1>, scalar_prefetch = 0 : i64, scratch_operands = 5 : i64, tpu.core_type = #tpu.core_type<tc>, window_params = [{transform_indices = @transform_0, window_bounds = array<i64: 16, 1024>}, {transform_indices = @transform_1, window_bounds = array<i64: 32, 1024>}, {pipeline_mode = #tpu.pipeline_mode<synchronous>, transform_indices = @transform_2, window_bounds = array<i64: 8, 768>}, {pipeline_mode = #tpu.pipeline_mode<synchronous>, transform_indices = @transform_3, window_bounds = array<i64: 16, 144>}, {pipeline_mode = #tpu.pipeline_mode<synchronous>, transform_indices = @transform_4, window_bounds = array<i64: 16, 144>}, {pipeline_mode = #tpu.pipeline_mode<synchronous>, transform_indices = @transform_5, window_bounds = array<i64: 16, 32>}, {pipeline_mode = #tpu.pipeline_mode<synchronous>, transform_indices = @transform_6, window_bounds = array<i64: 16, 144>}, {pipeline_mode = #tpu.pipeline_mode<synchronous>, transform_indices = @transform_7, window_bounds = array<i64: 16, 144>}, {pipeline_mode = #tpu.pipeline_mode<synchronous>, transform_indices = @transform_8, window_bounds = array<i64: 8, 144>}, {pipeline_mode = #tpu.pipeline_mode<synchronous>, transform_indices = @transform_9, window_bounds = array<i64: 16, 8>}, {transform_indices = @transform_10, window_bounds = array<i64: 8, 768>}]} {
    %cst = arith.constant 0.000000e+00 : bf16
    %0 = vector.broadcast %cst : bf16 to vector<16x128xbf16>
    %c0 = arith.constant 0 : index
    %c0_0 = arith.constant 0 : index
    %1 = vector.load %arg12[%c0, %c0_0] : memref<16x1024xbf16, #tpu.memory_space<vmem>>, vector<16x128xbf16>
    tpu.vector_store %arg12[%c0, %c0_0], %0 {strides = array<i32>} : memref<16x1024xbf16, #tpu.memory_space<vmem>>, vector<16x128xbf16>,
    %cst_1 = arith.constant 0.000000e+00 : bf16
    %2 = vector.broadcast %cst_1 : bf16 to vector<16x128xbf16>
    %c0_2 = arith.constant 0 : index
    %c896 = arith.constant 896 : index
    %3 = vector.load %arg12[%c0_2, %c896] : memref<16x1024xbf16, #tpu.memory_space<vmem>>, vector<16x128xbf16>
    tpu.vector_store %arg12[%c0_2, %c896], %2 {strides = array<i32>} : memref<16x1024xbf16, #tpu.memory_space<vmem>>, vector<16x128xbf16>,
    %cst_3 = arith.constant 0.000000e+00 : bf16
    %4 = vector.broadcast %cst_3 : bf16 to vector<16x128xbf16>
    %c0_4 = arith.constant 0 : index
    %c0_5 = arith.constant 0 : index
    %5 = vector.load %arg13[%c0_4, %c0_5] : memref<16x1024xbf16, #tpu.memory_space<vmem>>, vector<16x128xbf16>
    tpu.vector_store %arg13[%c0_4, %c0_5], %4 {strides = array<i32>} : memref<16x1024xbf16, #tpu.memory_space<vmem>>, vector<16x128xbf16>,
    %cst_6 = arith.constant 0.000000e+00 : bf16
    %6 = vector.broadcast %cst_6 : bf16 to vector<16x128xbf16>
    %c0_7 = arith.constant 0 : index
    %c896_8 = arith.constant 896 : index
    %7 = vector.load %arg13[%c0_7, %c896_8] : memref<16x1024xbf16, #tpu.memory_space<vmem>>, vector<16x128xbf16>
    tpu.vector_store %arg13[%c0_7, %c896_8], %6 {strides = array<i32>} : memref<16x1024xbf16, #tpu.memory_space<vmem>>, vector<16x128xbf16>,
    %cst_9 = arith.constant 0.000000e+00 : bf16
    %8 = vector.broadcast %cst_9 : bf16 to vector<16x128xbf16>
    %c0_10 = arith.constant 0 : index
    %c0_11 = arith.constant 0 : index
    %9 = vector.load %arg14[%c0_10, %c0_11] : memref<16x1024xbf16, #tpu.memory_space<vmem>>, vector<16x128xbf16>
    tpu.vector_store %arg14[%c0_10, %c0_11], %8 {strides = array<i32>} : memref<16x1024xbf16, #tpu.memory_space<vmem>>, vector<16x128xbf16>,
    %cst_12 = arith.constant 0.000000e+00 : bf16
    %10 = vector.broadcast %cst_12 : bf16 to vector<16x128xbf16>
    %c0_13 = arith.constant 0 : index
    %c896_14 = arith.constant 896 : index
    %11 = vector.load %arg14[%c0_13, %c896_14] : memref<16x1024xbf16, #tpu.memory_space<vmem>>, vector<16x128xbf16>
    tpu.vector_store %arg14[%c0_13, %c896_14], %10 {strides = array<i32>} : memref<16x1024xbf16, #tpu.memory_space<vmem>>, vector<16x128xbf16>,
    %cst_15 = arith.constant 0.000000e+00 : bf16
    %12 = vector.broadcast %cst_15 : bf16 to vector<16x128xbf16>
    %c0_16 = arith.constant 0 : index
    %c0_17 = arith.constant 0 : index
    %13 = vector.load %arg15[%c0_16, %c0_17] : memref<16x1024xbf16, #tpu.memory_space<vmem>>, vector<16x128xbf16>
    tpu.vector_store %arg15[%c0_16, %c0_17], %12 {strides = array<i32>} : memref<16x1024xbf16, #tpu.memory_space<vmem>>, vector<16x128xbf16>,
    %cst_18 = arith.constant 0.000000e+00 : bf16
    %14 = vector.broadcast %cst_18 : bf16 to vector<16x128xbf16>
    %c0_19 = arith.constant 0 : index
    %c896_20 = arith.constant 896 : index
    %15 = vector.load %arg15[%c0_19, %c896_20] : memref<16x1024xbf16, #tpu.memory_space<vmem>>, vector<16x128xbf16>
    tpu.vector_store %arg15[%c0_19, %c896_20], %14 {strides = array<i32>} : memref<16x1024xbf16, #tpu.memory_space<vmem>>, vector<16x128xbf16>,
    %cst_21 = arith.constant 0.000000e+00 : bf16
    %16 = vector.broadcast %cst_21 : bf16 to vector<16x128xbf16>
    %c0_22 = arith.constant 0 : index
    %c0_23 = arith.constant 0 : index
    %17 = vector.load %arg16[%c0_22, %c0_23] : memref<16x1024xbf16, #tpu.memory_space<vmem>>, vector<16x128xbf16>
    tpu.vector_store %arg16[%c0_22, %c0_23], %16 {strides = array<i32>} : memref<16x1024xbf16, #tpu.memory_space<vmem>>, vector<16x128xbf16>,
    %cst_24 = arith.constant 0.000000e+00 : bf16
    %18 = vector.broadcast %cst_24 : bf16 to vector<16x128xbf16>
    %c0_25 = arith.constant 0 : index
    %c896_26 = arith.constant 896 : index
    %19 = vector.load %arg16[%c0_25, %c896_26] : memref<16x1024xbf16, #tpu.memory_space<vmem>>, vector<16x128xbf16>
    tpu.vector_store %arg16[%c0_25, %c896_26], %18 {strides = array<i32>} : memref<16x1024xbf16, #tpu.memory_space<vmem>>, vector<16x128xbf16>,
    %c0_27 = arith.constant 0 : index
    %c0_28 = arith.constant 0 : index
    %20 = vector.load %arg3[%c0_27, %c0_28] : memref<8x768xf32, #tpu.memory_space<vmem>>, vector<1x768xf32>
    %c1 = arith.constant 1 : index
    %c0_29 = arith.constant 0 : index
    %21 = vector.load %arg3[%c1, %c0_29] : memref<8x768xf32, #tpu.memory_space<vmem>>, vector<1x768xf32>
    %c2 = arith.constant 2 : index
    %c0_30 = arith.constant 0 : index
    %22 = vector.load %arg3[%c2, %c0_30] : memref<8x768xf32, #tpu.memory_space<vmem>>, vector<1x768xf32>
    %c3 = arith.constant 3 : index
    %c0_31 = arith.constant 0 : index
    %23 = vector.load %arg3[%c3, %c0_31] : memref<8x768xf32, #tpu.memory_space<vmem>>, vector<1x768xf32>
    %c4 = arith.constant 4 : index
    %c0_32 = arith.constant 0 : index
    %24 = vector.load %arg3[%c4, %c0_32] : memref<8x768xf32, #tpu.memory_space<vmem>>, vector<1x768xf32>
    %c0_33 = arith.constant 0 : index
    %c0_34 = arith.constant 0 : index
    %25 = vector.load %arg4[%c0_33, %c0_34] : memref<16x144xbf16, #tpu.memory_space<vmem>>, vector<16x144xbf16>
    %c0_35 = arith.constant 0 : index
    %c109 = arith.constant 109 : index
    %26 = vector.load %arg1[%c0_35, %c109] : memref<16x1024xbf16, #tpu.memory_space<vmem>>, vector<16x768xbf16>
    %27 = vector.extract_strided_slice %25 {offsets = [0, 0], sizes = [16, 16], strides = [1, 1]} : vector<16x144xbf16> to vector<16x16xbf16>
    %cst_36 = arith.constant dense<0.000000e+00> : vector<16x768xf32>
    %28 = tpu.matmul %27, %26, %cst_36 {dimension_numbers = #tpu.dot_dimension_numbers<[1], [0], [0], [1], [0, 0, 1, 1], [], []>} : vector<16x16xbf16>, vector<16x768xbf16>, vector<16x768xf32> -> vector<16x768xf32>
    %c0_37 = arith.constant 0 : index
    %c110 = arith.constant 110 : index
    %29 = vector.load %arg1[%c0_37, %c110] : memref<16x1024xbf16, #tpu.memory_space<vmem>>, vector<16x768xbf16>
    %30 = vector.extract_strided_slice %25 {offsets = [0, 16], sizes = [16, 16], strides = [1, 1]} : vector<16x144xbf16> to vector<16x16xbf16>
    %cst_38 = arith.constant dense<0.000000e+00> : vector<16x768xf32>
    %31 = tpu.matmul %30, %29, %cst_38 {dimension_numbers = #tpu.dot_dimension_numbers<[1], [0], [0], [1], [0, 0, 1, 1], [], []>} : vector<16x16xbf16>, vector<16x768xbf16>, vector<16x768xf32> -> vector<16x768xf32>
    %32 = arith.addf %28, %31 : vector<16x768xf32>
    %c0_39 = arith.constant 0 : index
    %c111 = arith.constant 111 : index
    %33 = vector.load %arg1[%c0_39, %c111] : memref<16x1024xbf16, #tpu.memory_space<vmem>>, vector<16x768xbf16>
    %34 = vector.extract_strided_slice %25 {offsets = [0, 32], sizes = [16, 16], strides = [1, 1]} : vector<16x144xbf16> to vector<16x16xbf16>
    %cst_40 = arith.constant dense<0.000000e+00> : vector<16x768xf32>
    %35 = tpu.matmul %34, %33, %cst_40 {dimension_numbers = #tpu.dot_dimension_numbers<[1], [0], [0], [1], [0, 0, 1, 1], [], []>} : vector<16x16xbf16>, vector<16x768xbf16>, vector<16x768xf32> -> vector<16x768xf32>
    %36 = arith.addf %32, %35 : vector<16x768xf32>
    %c0_41 = arith.constant 0 : index
    %c127 = arith.constant 127 : index
    %37 = vector.load %arg1[%c0_41, %c127] : memref<16x1024xbf16, #tpu.memory_space<vmem>>, vector<16x768xbf16>
    %38 = vector.extract_strided_slice %25 {offsets = [0, 48], sizes = [16, 16], strides = [1, 1]} : vector<16x144xbf16> to vector<16x16xbf16>
    %cst_42 = arith.constant dense<0.000000e+00> : vector<16x768xf32>
    %39 = tpu.matmul %38, %37, %cst_42 {dimension_numbers = #tpu.dot_dimension_numbers<[1], [0], [0], [1], [0, 0, 1, 1], [], []>} : vector<16x16xbf16>, vector<16x768xbf16>, vector<16x768xf32> -> vector<16x768xf32>
    %40 = arith.addf %36, %39 : vector<16x768xf32>
    %c0_43 = arith.constant 0 : index
    %c128 = arith.constant 128 : index
    %41 = vector.load %arg1[%c0_43, %c128] : memref<16x1024xbf16, #tpu.memory_space<vmem>>, vector<16x768xbf16>
    %42 = vector.extract_strided_slice %25 {offsets = [0, 64], sizes = [16, 16], strides = [1, 1]} : vector<16x144xbf16> to vector<16x16xbf16>
    %cst_44 = arith.constant dense<0.000000e+00> : vector<16x768xf32>
    %43 = tpu.matmul %42, %41, %cst_44 {dimension_numbers = #tpu.dot_dimension_numbers<[1], [0], [0], [1], [0, 0, 1, 1], [], []>} : vector<16x16xbf16>, vector<16x768xbf16>, vector<16x768xf32> -> vector<16x768xf32>
    %44 = arith.addf %40, %43 : vector<16x768xf32>
    %c0_45 = arith.constant 0 : index
    %c129 = arith.constant 129 : index
    %45 = vector.load %arg1[%c0_45, %c129] : memref<16x1024xbf16, #tpu.memory_space<vmem>>, vector<16x768xbf16>
    %46 = vector.extract_strided_slice %25 {offsets = [0, 80], sizes = [16, 16], strides = [1, 1]} : vector<16x144xbf16> to vector<16x16xbf16>
    %cst_46 = arith.constant dense<0.000000e+00> : vector<16x768xf32>
    %47 = tpu.matmul %46, %45, %cst_46 {dimension_numbers = #tpu.dot_dimension_numbers<[1], [0], [0], [1], [0, 0, 1, 1], [], []>} : vector<16x16xbf16>, vector<16x768xbf16>, vector<16x768xf32> -> vector<16x768xf32>
    %48 = arith.addf %44, %47 : vector<16x768xf32>
    %c0_47 = arith.constant 0 : index
    %c145 = arith.constant 145 : index
    %49 = vector.load %arg1[%c0_47, %c145] : memref<16x1024xbf16, #tpu.memory_space<vmem>>, vector<16x768xbf16>
    %50 = vector.extract_strided_slice %25 {offsets = [0, 96], sizes = [16, 16], strides = [1, 1]} : vector<16x144xbf16> to vector<16x16xbf16>
    %cst_48 = arith.constant dense<0.000000e+00> : vector<16x768xf32>
    %51 = tpu.matmul %50, %49, %cst_48 {dimension_numbers = #tpu.dot_dimension_numbers<[1], [0], [0], [1], [0, 0, 1, 1], [], []>} : vector<16x16xbf16>, vector<16x768xbf16>, vector<16x768xf32> -> vector<16x768xf32>
    %52 = arith.addf %48, %51 : vector<16x768xf32>
    %c0_49 = arith.constant 0 : index
    %c146 = arith.constant 146 : index
    %53 = vector.load %arg1[%c0_49, %c146] : memref<16x1024xbf16, #tpu.memory_space<vmem>>, vector<16x768xbf16>
    %54 = vector.extract_strided_slice %25 {offsets = [0, 112], sizes = [16, 16], strides = [1, 1]} : vector<16x144xbf16> to vector<16x16xbf16>
    %cst_50 = arith.constant dense<0.000000e+00> : vector<16x768xf32>
    %55 = tpu.matmul %54, %53, %cst_50 {dimension_numbers = #tpu.dot_dimension_numbers<[1], [0], [0], [1], [0, 0, 1, 1], [], []>} : vector<16x16xbf16>, vector<16x768xbf16>, vector<16x768xf32> -> vector<16x768xf32>
    %56 = arith.addf %52, %55 : vector<16x768xf32>
    %c0_51 = arith.constant 0 : index
    %c147 = arith.constant 147 : index
    %57 = vector.load %arg1[%c0_51, %c147] : memref<16x1024xbf16, #tpu.memory_space<vmem>>, vector<16x768xbf16>
    %58 = vector.extract_strided_slice %25 {offsets = [0, 128], sizes = [16, 16], strides = [1, 1]} : vector<16x144xbf16> to vector<16x16xbf16>
    %cst_52 = arith.constant dense<0.000000e+00> : vector<16x768xf32>
    %59 = tpu.matmul %58, %57, %cst_52 {dimension_numbers = #tpu.dot_dimension_numbers<[1], [0], [0], [1], [0, 0, 1, 1], [], []>} : vector<16x16xbf16>, vector<16x768xbf16>, vector<16x768xf32> -> vector<16x768xf32>
    %60 = arith.addf %56, %59 : vector<16x768xf32>
    %c0_53 = arith.constant 0 : index
    %c0_54 = arith.constant 0 : index
    %61 = vector.load %arg10[%c0_53, %c0_54] : memref<16x8xf32, #tpu.memory_space<vmem>>, vector<16x1xf32>
    %62 = vector.broadcast %61 : vector<16x1xf32> to vector<16x768xf32>
    %63 = arith.addf %60, %62 : vector<16x768xf32>
    %cst_55 = arith.constant 0.000000e+00 : f32
    %64 = vector.broadcast %cst_55 : f32 to vector<16x768xf32>
    %65 = arith.maximumf %63, %64 : vector<16x768xf32>
    %66 = vector.broadcast %20 : vector<1x768xf32> to vector<16x768xf32>
    %67 = arith.mulf %65, %66 : vector<16x768xf32>
    %68 = arith.truncf %67 : vector<16x768xf32> to vector<16x768xbf16>
    %c0_56 = arith.constant 0 : index
    %c128_57 = arith.constant 128 : index
    %69 = vector.load %arg12[%c0_56, %c128_57] : memref<16x1024xbf16, #tpu.memory_space<vmem>>, vector<16x768xbf16>
    tpu.vector_store %arg12[%c0_56, %c128_57], %68 {strides = array<i32>} : memref<16x1024xbf16, #tpu.memory_space<vmem>>, vector<16x768xbf16>,
    %c0_58 = arith.constant 0 : index
    %c128_59 = arith.constant 128 : index
    %70 = vector.load %arg1[%c0_58, %c128_59] : memref<16x1024xbf16, #tpu.memory_space<vmem>>, vector<16x768xbf16>
    %71 = arith.extf %70 : vector<16x768xbf16> to vector<16x768xf32>
    %c0_60 = arith.constant 0 : index
    %c0_61 = arith.constant 0 : index
    %72 = vector.load %arg5[%c0_60, %c0_61] : memref<16x144xbf16, #tpu.memory_space<vmem>>, vector<16x144xbf16>
    %c0_62 = arith.constant 0 : index
    %c109_63 = arith.constant 109 : index
    %73 = vector.load %arg12[%c0_62, %c109_63] : memref<16x1024xbf16, #tpu.memory_space<vmem>>, vector<16x768xbf16>
    %74 = vector.extract_strided_slice %72 {offsets = [0, 0], sizes = [16, 16], strides = [1, 1]} : vector<16x144xbf16> to vector<16x16xbf16>
    %cst_64 = arith.constant dense<0.000000e+00> : vector<16x768xf32>
    %75 = tpu.matmul %74, %73, %cst_64 {dimension_numbers = #tpu.dot_dimension_numbers<[1], [0], [0], [1], [0, 0, 1, 1], [], []>} : vector<16x16xbf16>, vector<16x768xbf16>, vector<16x768xf32> -> vector<16x768xf32>
    %c0_65 = arith.constant 0 : index
    %c110_66 = arith.constant 110 : index
    %76 = vector.load %arg12[%c0_65, %c110_66] : memref<16x1024xbf16, #tpu.memory_space<vmem>>, vector<16x768xbf16>
    %77 = vector.extract_strided_slice %72 {offsets = [0, 16], sizes = [16, 16], strides = [1, 1]} : vector<16x144xbf16> to vector<16x16xbf16>
    %cst_67 = arith.constant dense<0.000000e+00> : vector<16x768xf32>
    %78 = tpu.matmul %77, %76, %cst_67 {dimension_numbers = #tpu.dot_dimension_numbers<[1], [0], [0], [1], [0, 0, 1, 1], [], []>} : vector<16x16xbf16>, vector<16x768xbf16>, vector<16x768xf32> -> vector<16x768xf32>
    %79 = arith.addf %75, %78 : vector<16x768xf32>
    %c0_68 = arith.constant 0 : index
    %c111_69 = arith.constant 111 : index
    %80 = vector.load %arg12[%c0_68, %c111_69] : memref<16x1024xbf16, #tpu.memory_space<vmem>>, vector<16x768xbf16>
    %81 = vector.extract_strided_slice %72 {offsets = [0, 32], sizes = [16, 16], strides = [1, 1]} : vector<16x144xbf16> to vector<16x16xbf16>
    %cst_70 = arith.constant dense<0.000000e+00> : vector<16x768xf32>
    %82 = tpu.matmul %81, %80, %cst_70 {dimension_numbers = #tpu.dot_dimension_numbers<[1], [0], [0], [1], [0, 0, 1, 1], [], []>} : vector<16x16xbf16>, vector<16x768xbf16>, vector<16x768xf32> -> vector<16x768xf32>
    %83 = arith.addf %79, %82 : vector<16x768xf32>
    %c0_71 = arith.constant 0 : index
    %c127_72 = arith.constant 127 : index
    %84 = vector.load %arg12[%c0_71, %c127_72] : memref<16x1024xbf16, #tpu.memory_space<vmem>>, vector<16x768xbf16>
    %85 = vector.extract_strided_slice %72 {offsets = [0, 48], sizes = [16, 16], strides = [1, 1]} : vector<16x144xbf16> to vector<16x16xbf16>
    %cst_73 = arith.constant dense<0.000000e+00> : vector<16x768xf32>
    %86 = tpu.matmul %85, %84, %cst_73 {dimension_numbers = #tpu.dot_dimension_numbers<[1], [0], [0], [1], [0, 0, 1, 1], [], []>} : vector<16x16xbf16>, vector<16x768xbf16>, vector<16x768xf32> -> vector<16x768xf32>
    %87 = arith.addf %83, %86 : vector<16x768xf32>
    %c0_74 = arith.constant 0 : index
    %c128_75 = arith.constant 128 : index
    %88 = vector.load %arg12[%c0_74, %c128_75] : memref<16x1024xbf16, #tpu.memory_space<vmem>>, vector<16x768xbf16>
    %89 = vector.extract_strided_slice %72 {offsets = [0, 64], sizes = [16, 16], strides = [1, 1]} : vector<16x144xbf16> to vector<16x16xbf16>
    %cst_76 = arith.constant dense<0.000000e+00> : vector<16x768xf32>
    %90 = tpu.matmul %89, %88, %cst_76 {dimension_numbers = #tpu.dot_dimension_numbers<[1], [0], [0], [1], [0, 0, 1, 1], [], []>} : vector<16x16xbf16>, vector<16x768xbf16>, vector<16x768xf32> -> vector<16x768xf32>
    %91 = arith.addf %87, %90 : vector<16x768xf32>
    %c0_77 = arith.constant 0 : index
    %c129_78 = arith.constant 129 : index
    %92 = vector.load %arg12[%c0_77, %c129_78] : memref<16x1024xbf16, #tpu.memory_space<vmem>>, vector<16x768xbf16>
    %93 = vector.extract_strided_slice %72 {offsets = [0, 80], sizes = [16, 16], strides = [1, 1]} : vector<16x144xbf16> to vector<16x16xbf16>
    %cst_79 = arith.constant dense<0.000000e+00> : vector<16x768xf32>
    %94 = tpu.matmul %93, %92, %cst_79 {dimension_numbers = #tpu.dot_dimension_numbers<[1], [0], [0], [1], [0, 0, 1, 1], [], []>} : vector<16x16xbf16>, vector<16x768xbf16>, vector<16x768xf32> -> vector<16x768xf32>
    %95 = arith.addf %91, %94 : vector<16x768xf32>
    %c0_80 = arith.constant 0 : index
    %c145_81 = arith.constant 145 : index
    %96 = vector.load %arg12[%c0_80, %c145_81] : memref<16x1024xbf16, #tpu.memory_space<vmem>>, vector<16x768xbf16>
    %97 = vector.extract_strided_slice %72 {offsets = [0, 96], sizes = [16, 16], strides = [1, 1]} : vector<16x144xbf16> to vector<16x16xbf16>
    %cst_82 = arith.constant dense<0.000000e+00> : vector<16x768xf32>
    %98 = tpu.matmul %97, %96, %cst_82 {dimension_numbers = #tpu.dot_dimension_numbers<[1], [0], [0], [1], [0, 0, 1, 1], [], []>} : vector<16x16xbf16>, vector<16x768xbf16>, vector<16x768xf32> -> vector<16x768xf32>
    %99 = arith.addf %95, %98 : vector<16x768xf32>
    %c0_83 = arith.constant 0 : index
    %c146_84 = arith.constant 146 : index
    %100 = vector.load %arg12[%c0_83, %c146_84] : memref<16x1024xbf16, #tpu.memory_space<vmem>>, vector<16x768xbf16>
    %101 = vector.extract_strided_slice %72 {offsets = [0, 112], sizes = [16, 16], strides = [1, 1]} : vector<16x144xbf16> to vector<16x16xbf16>
    %cst_85 = arith.constant dense<0.000000e+00> : vector<16x768xf32>
    %102 = tpu.matmul %101, %100, %cst_85 {dimension_numbers = #tpu.dot_dimension_numbers<[1], [0], [0], [1], [0, 0, 1, 1], [], []>} : vector<16x16xbf16>, vector<16x768xbf16>, vector<16x768xf32> -> vector<16x768xf32>
    %103 = arith.addf %99, %102 : vector<16x768xf32>
    %c0_86 = arith.constant 0 : index
    %c147_87 = arith.constant 147 : index
    %104 = vector.load %arg12[%c0_86, %c147_87] : memref<16x1024xbf16, #tpu.memory_space<vmem>>, vector<16x768xbf16>
    %105 = vector.extract_strided_slice %72 {offsets = [0, 128], sizes = [16, 16], strides = [1, 1]} : vector<16x144xbf16> to vector<16x16xbf16>
    %cst_88 = arith.constant dense<0.000000e+00> : vector<16x768xf32>
    %106 = tpu.matmul %105, %104, %cst_88 {dimension_numbers = #tpu.dot_dimension_numbers<[1], [0], [0], [1], [0, 0, 1, 1], [], []>} : vector<16x16xbf16>, vector<16x768xbf16>, vector<16x768xf32> -> vector<16x768xf32>
    %107 = arith.addf %103, %106 : vector<16x768xf32>
    %c0_89 = arith.constant 0 : index
    %c1_90 = arith.constant 1 : index
    %108 = vector.load %arg10[%c0_89, %c1_90] : memref<16x8xf32, #tpu.memory_space<vmem>>, vector<16x1xf32>
    %109 = vector.broadcast %108 : vector<16x1xf32> to vector<16x768xf32>
    %110 = arith.addf %107, %109 : vector<16x768xf32>
    %111 = arith.addf %110, %71 : vector<16x768xf32>
    %cst_91 = arith.constant 0.000000e+00 : f32
    %112 = vector.broadcast %cst_91 : f32 to vector<16x768xf32>
    %113 = arith.maximumf %111, %112 : vector<16x768xf32>
    %114 = vector.broadcast %20 : vector<1x768xf32> to vector<16x768xf32>
    %115 = arith.mulf %113, %114 : vector<16x768xf32>
    %116 = arith.truncf %115 : vector<16x768xf32> to vector<16x768xbf16>
    %c0_92 = arith.constant 0 : index
    %c128_93 = arith.constant 128 : index
    %117 = vector.load %arg13[%c0_92, %c128_93] : memref<16x1024xbf16, #tpu.memory_space<vmem>>, vector<16x768xbf16>
    tpu.vector_store %arg13[%c0_92, %c128_93], %116 {strides = array<i32>} : memref<16x1024xbf16, #tpu.memory_space<vmem>>, vector<16x768xbf16>,
    %c0_94 = arith.constant 0 : index
    %c128_95 = arith.constant 128 : index
    %118 = vector.load %arg2[%c0_94, %c128_95] : memref<32x1024xbf16, #tpu.memory_space<vmem>>, vector<32x768xbf16>
    %c0_96 = arith.constant 0 : index
    %c0_97 = arith.constant 0 : index
    %119 = vector.load %arg6[%c0_96, %c0_97] : memref<16x32xbf16, #tpu.memory_space<vmem>>, vector<16x32xbf16>
    %cst_98 = arith.constant dense<0.000000e+00> : vector<16x768xf32>
    %120 = tpu.matmul %119, %118, %cst_98 {dimension_numbers = #tpu.dot_dimension_numbers<[1], [0], [0], [1], [0, 0, 1, 1], [], []>} : vector<16x32xbf16>, vector<32x768xbf16>, vector<16x768xf32> -> vector<16x768xf32>
    %c0_99 = arith.constant 0 : index
    %c2_100 = arith.constant 2 : index
    %121 = vector.load %arg10[%c0_99, %c2_100] : memref<16x8xf32, #tpu.memory_space<vmem>>, vector<16x1xf32>
    %122 = vector.broadcast %121 : vector<16x1xf32> to vector<16x768xf32>
    %123 = arith.addf %120, %122 : vector<16x768xf32>
    %124 = vector.broadcast %20 : vector<1x768xf32> to vector<16x768xf32>
    %125 = arith.mulf %123, %124 : vector<16x768xf32>
    %126 = arith.truncf %125 : vector<16x768xf32> to vector<16x768xbf16>
    %c0_101 = arith.constant 0 : index
    %c128_102 = arith.constant 128 : index
    %127 = vector.load %arg14[%c0_101, %c128_102] : memref<16x1024xbf16, #tpu.memory_space<vmem>>, vector<16x768xbf16>
    tpu.vector_store %arg14[%c0_101, %c128_102], %126 {strides = array<i32>} : memref<16x1024xbf16, #tpu.memory_space<vmem>>, vector<16x768xbf16>,
    %c0_103 = arith.constant 0 : index
    %c0_104 = arith.constant 0 : index
    %128 = vector.load %arg7[%c0_103, %c0_104] : memref<16x144xbf16, #tpu.memory_space<vmem>>, vector<16x144xbf16>
    %c0_105 = arith.constant 0 : index
    %c109_106 = arith.constant 109 : index
    %129 = vector.load %arg14[%c0_105, %c109_106] : memref<16x1024xbf16, #tpu.memory_space<vmem>>, vector<16x768xbf16>
    %130 = vector.extract_strided_slice %128 {offsets = [0, 0], sizes = [16, 16], strides = [1, 1]} : vector<16x144xbf16> to vector<16x16xbf16>
    %cst_107 = arith.constant dense<0.000000e+00> : vector<16x768xf32>
    %131 = tpu.matmul %130, %129, %cst_107 {dimension_numbers = #tpu.dot_dimension_numbers<[1], [0], [0], [1], [0, 0, 1, 1], [], []>} : vector<16x16xbf16>, vector<16x768xbf16>, vector<16x768xf32> -> vector<16x768xf32>
    %c0_108 = arith.constant 0 : index
    %c110_109 = arith.constant 110 : index
    %132 = vector.load %arg14[%c0_108, %c110_109] : memref<16x1024xbf16, #tpu.memory_space<vmem>>, vector<16x768xbf16>
    %133 = vector.extract_strided_slice %128 {offsets = [0, 16], sizes = [16, 16], strides = [1, 1]} : vector<16x144xbf16> to vector<16x16xbf16>
    %cst_110 = arith.constant dense<0.000000e+00> : vector<16x768xf32>
    %134 = tpu.matmul %133, %132, %cst_110 {dimension_numbers = #tpu.dot_dimension_numbers<[1], [0], [0], [1], [0, 0, 1, 1], [], []>} : vector<16x16xbf16>, vector<16x768xbf16>, vector<16x768xf32> -> vector<16x768xf32>
    %135 = arith.addf %131, %134 : vector<16x768xf32>
    %c0_111 = arith.constant 0 : index
    %c111_112 = arith.constant 111 : index
    %136 = vector.load %arg14[%c0_111, %c111_112] : memref<16x1024xbf16, #tpu.memory_space<vmem>>, vector<16x768xbf16>
    %137 = vector.extract_strided_slice %128 {offsets = [0, 32], sizes = [16, 16], strides = [1, 1]} : vector<16x144xbf16> to vector<16x16xbf16>
    %cst_113 = arith.constant dense<0.000000e+00> : vector<16x768xf32>
    %138 = tpu.matmul %137, %136, %cst_113 {dimension_numbers = #tpu.dot_dimension_numbers<[1], [0], [0], [1], [0, 0, 1, 1], [], []>} : vector<16x16xbf16>, vector<16x768xbf16>, vector<16x768xf32> -> vector<16x768xf32>
    %139 = arith.addf %135, %138 : vector<16x768xf32>
    %c0_114 = arith.constant 0 : index
    %c127_115 = arith.constant 127 : index
    %140 = vector.load %arg14[%c0_114, %c127_115] : memref<16x1024xbf16, #tpu.memory_space<vmem>>, vector<16x768xbf16>
    %141 = vector.extract_strided_slice %128 {offsets = [0, 48], sizes = [16, 16], strides = [1, 1]} : vector<16x144xbf16> to vector<16x16xbf16>
    %cst_116 = arith.constant dense<0.000000e+00> : vector<16x768xf32>
    %142 = tpu.matmul %141, %140, %cst_116 {dimension_numbers = #tpu.dot_dimension_numbers<[1], [0], [0], [1], [0, 0, 1, 1], [], []>} : vector<16x16xbf16>, vector<16x768xbf16>, vector<16x768xf32> -> vector<16x768xf32>
    %143 = arith.addf %139, %142 : vector<16x768xf32>
    %c0_117 = arith.constant 0 : index
    %c128_118 = arith.constant 128 : index
    %144 = vector.load %arg14[%c0_117, %c128_118] : memref<16x1024xbf16, #tpu.memory_space<vmem>>, vector<16x768xbf16>
    %145 = vector.extract_strided_slice %128 {offsets = [0, 64], sizes = [16, 16], strides = [1, 1]} : vector<16x144xbf16> to vector<16x16xbf16>
    %cst_119 = arith.constant dense<0.000000e+00> : vector<16x768xf32>
    %146 = tpu.matmul %145, %144, %cst_119 {dimension_numbers = #tpu.dot_dimension_numbers<[1], [0], [0], [1], [0, 0, 1, 1], [], []>} : vector<16x16xbf16>, vector<16x768xbf16>, vector<16x768xf32> -> vector<16x768xf32>
    %147 = arith.addf %143, %146 : vector<16x768xf32>
    %c0_120 = arith.constant 0 : index
    %c129_121 = arith.constant 129 : index
    %148 = vector.load %arg14[%c0_120, %c129_121] : memref<16x1024xbf16, #tpu.memory_space<vmem>>, vector<16x768xbf16>
    %149 = vector.extract_strided_slice %128 {offsets = [0, 80], sizes = [16, 16], strides = [1, 1]} : vector<16x144xbf16> to vector<16x16xbf16>
    %cst_122 = arith.constant dense<0.000000e+00> : vector<16x768xf32>
    %150 = tpu.matmul %149, %148, %cst_122 {dimension_numbers = #tpu.dot_dimension_numbers<[1], [0], [0], [1], [0, 0, 1, 1], [], []>} : vector<16x16xbf16>, vector<16x768xbf16>, vector<16x768xf32> -> vector<16x768xf32>
    %151 = arith.addf %147, %150 : vector<16x768xf32>
    %c0_123 = arith.constant 0 : index
    %c145_124 = arith.constant 145 : index
    %152 = vector.load %arg14[%c0_123, %c145_124] : memref<16x1024xbf16, #tpu.memory_space<vmem>>, vector<16x768xbf16>
    %153 = vector.extract_strided_slice %128 {offsets = [0, 96], sizes = [16, 16], strides = [1, 1]} : vector<16x144xbf16> to vector<16x16xbf16>
    %cst_125 = arith.constant dense<0.000000e+00> : vector<16x768xf32>
    %154 = tpu.matmul %153, %152, %cst_125 {dimension_numbers = #tpu.dot_dimension_numbers<[1], [0], [0], [1], [0, 0, 1, 1], [], []>} : vector<16x16xbf16>, vector<16x768xbf16>, vector<16x768xf32> -> vector<16x768xf32>
    %155 = arith.addf %151, %154 : vector<16x768xf32>
    %c0_126 = arith.constant 0 : index
    %c146_127 = arith.constant 146 : index
    %156 = vector.load %arg14[%c0_126, %c146_127] : memref<16x1024xbf16, #tpu.memory_space<vmem>>, vector<16x768xbf16>
    %157 = vector.extract_strided_slice %128 {offsets = [0, 112], sizes = [16, 16], strides = [1, 1]} : vector<16x144xbf16> to vector<16x16xbf16>
    %cst_128 = arith.constant dense<0.000000e+00> : vector<16x768xf32>
    %158 = tpu.matmul %157, %156, %cst_128 {dimension_numbers = #tpu.dot_dimension_numbers<[1], [0], [0], [1], [0, 0, 1, 1], [], []>} : vector<16x16xbf16>, vector<16x768xbf16>, vector<16x768xf32> -> vector<16x768xf32>
    %159 = arith.addf %155, %158 : vector<16x768xf32>
    %c0_129 = arith.constant 0 : index
    %c147_130 = arith.constant 147 : index
    %160 = vector.load %arg14[%c0_129, %c147_130] : memref<16x1024xbf16, #tpu.memory_space<vmem>>, vector<16x768xbf16>
    %161 = vector.extract_strided_slice %128 {offsets = [0, 128], sizes = [16, 16], strides = [1, 1]} : vector<16x144xbf16> to vector<16x16xbf16>
    %cst_131 = arith.constant dense<0.000000e+00> : vector<16x768xf32>
    %162 = tpu.matmul %161, %160, %cst_131 {dimension_numbers = #tpu.dot_dimension_numbers<[1], [0], [0], [1], [0, 0, 1, 1], [], []>} : vector<16x16xbf16>, vector<16x768xbf16>, vector<16x768xf32> -> vector<16x768xf32>
    %163 = arith.addf %159, %162 : vector<16x768xf32>
    %c0_132 = arith.constant 0 : index
    %c3_133 = arith.constant 3 : index
    %164 = vector.load %arg10[%c0_132, %c3_133] : memref<16x8xf32, #tpu.memory_space<vmem>>, vector<16x1xf32>
    %165 = vector.broadcast %164 : vector<16x1xf32> to vector<16x768xf32>
    %166 = arith.addf %163, %165 : vector<16x768xf32>
    %cst_134 = arith.constant 0.000000e+00 : f32
    %167 = vector.broadcast %cst_134 : f32 to vector<16x768xf32>
    %168 = arith.maximumf %166, %167 : vector<16x768xf32>
    %169 = vector.broadcast %20 : vector<1x768xf32> to vector<16x768xf32>
    %170 = arith.mulf %168, %169 : vector<16x768xf32>
    %171 = arith.truncf %170 : vector<16x768xf32> to vector<16x768xbf16>
    %c0_135 = arith.constant 0 : index
    %c128_136 = arith.constant 128 : index
    %172 = vector.load %arg15[%c0_135, %c128_136] : memref<16x1024xbf16, #tpu.memory_space<vmem>>, vector<16x768xbf16>
    tpu.vector_store %arg15[%c0_135, %c128_136], %171 {strides = array<i32>} : memref<16x1024xbf16, #tpu.memory_space<vmem>>, vector<16x768xbf16>,
    %c0_137 = arith.constant 0 : index
    %c128_138 = arith.constant 128 : index
    %173 = vector.load %arg14[%c0_137, %c128_138] : memref<16x1024xbf16, #tpu.memory_space<vmem>>, vector<16x768xbf16>
    %174 = arith.extf %173 : vector<16x768xbf16> to vector<16x768xf32>
    %c0_139 = arith.constant 0 : index
    %c0_140 = arith.constant 0 : index
    %175 = vector.load %arg8[%c0_139, %c0_140] : memref<16x144xbf16, #tpu.memory_space<vmem>>, vector<16x144xbf16>
    %c0_141 = arith.constant 0 : index
    %c109_142 = arith.constant 109 : index
    %176 = vector.load %arg15[%c0_141, %c109_142] : memref<16x1024xbf16, #tpu.memory_space<vmem>>, vector<16x768xbf16>
    %177 = vector.extract_strided_slice %175 {offsets = [0, 0], sizes = [16, 16], strides = [1, 1]} : vector<16x144xbf16> to vector<16x16xbf16>
    %cst_143 = arith.constant dense<0.000000e+00> : vector<16x768xf32>
    %178 = tpu.matmul %177, %176, %cst_143 {dimension_numbers = #tpu.dot_dimension_numbers<[1], [0], [0], [1], [0, 0, 1, 1], [], []>} : vector<16x16xbf16>, vector<16x768xbf16>, vector<16x768xf32> -> vector<16x768xf32>
    %c0_144 = arith.constant 0 : index
    %c110_145 = arith.constant 110 : index
    %179 = vector.load %arg15[%c0_144, %c110_145] : memref<16x1024xbf16, #tpu.memory_space<vmem>>, vector<16x768xbf16>
    %180 = vector.extract_strided_slice %175 {offsets = [0, 16], sizes = [16, 16], strides = [1, 1]} : vector<16x144xbf16> to vector<16x16xbf16>
    %cst_146 = arith.constant dense<0.000000e+00> : vector<16x768xf32>
    %181 = tpu.matmul %180, %179, %cst_146 {dimension_numbers = #tpu.dot_dimension_numbers<[1], [0], [0], [1], [0, 0, 1, 1], [], []>} : vector<16x16xbf16>, vector<16x768xbf16>, vector<16x768xf32> -> vector<16x768xf32>
    %182 = arith.addf %178, %181 : vector<16x768xf32>
    %c0_147 = arith.constant 0 : index
    %c111_148 = arith.constant 111 : index
    %183 = vector.load %arg15[%c0_147, %c111_148] : memref<16x1024xbf16, #tpu.memory_space<vmem>>, vector<16x768xbf16>
    %184 = vector.extract_strided_slice %175 {offsets = [0, 32], sizes = [16, 16], strides = [1, 1]} : vector<16x144xbf16> to vector<16x16xbf16>
    %cst_149 = arith.constant dense<0.000000e+00> : vector<16x768xf32>
    %185 = tpu.matmul %184, %183, %cst_149 {dimension_numbers = #tpu.dot_dimension_numbers<[1], [0], [0], [1], [0, 0, 1, 1], [], []>} : vector<16x16xbf16>, vector<16x768xbf16>, vector<16x768xf32> -> vector<16x768xf32>
    %186 = arith.addf %182, %185 : vector<16x768xf32>
    %c0_150 = arith.constant 0 : index
    %c127_151 = arith.constant 127 : index
    %187 = vector.load %arg15[%c0_150, %c127_151] : memref<16x1024xbf16, #tpu.memory_space<vmem>>, vector<16x768xbf16>
    %188 = vector.extract_strided_slice %175 {offsets = [0, 48], sizes = [16, 16], strides = [1, 1]} : vector<16x144xbf16> to vector<16x16xbf16>
    %cst_152 = arith.constant dense<0.000000e+00> : vector<16x768xf32>
    %189 = tpu.matmul %188, %187, %cst_152 {dimension_numbers = #tpu.dot_dimension_numbers<[1], [0], [0], [1], [0, 0, 1, 1], [], []>} : vector<16x16xbf16>, vector<16x768xbf16>, vector<16x768xf32> -> vector<16x768xf32>
    %190 = arith.addf %186, %189 : vector<16x768xf32>
    %c0_153 = arith.constant 0 : index
    %c128_154 = arith.constant 128 : index
    %191 = vector.load %arg15[%c0_153, %c128_154] : memref<16x1024xbf16, #tpu.memory_space<vmem>>, vector<16x768xbf16>
    %192 = vector.extract_strided_slice %175 {offsets = [0, 64], sizes = [16, 16], strides = [1, 1]} : vector<16x144xbf16> to vector<16x16xbf16>
    %cst_155 = arith.constant dense<0.000000e+00> : vector<16x768xf32>
    %193 = tpu.matmul %192, %191, %cst_155 {dimension_numbers = #tpu.dot_dimension_numbers<[1], [0], [0], [1], [0, 0, 1, 1], [], []>} : vector<16x16xbf16>, vector<16x768xbf16>, vector<16x768xf32> -> vector<16x768xf32>
    %194 = arith.addf %190, %193 : vector<16x768xf32>
    %c0_156 = arith.constant 0 : index
    %c129_157 = arith.constant 129 : index
    %195 = vector.load %arg15[%c0_156, %c129_157] : memref<16x1024xbf16, #tpu.memory_space<vmem>>, vector<16x768xbf16>
    %196 = vector.extract_strided_slice %175 {offsets = [0, 80], sizes = [16, 16], strides = [1, 1]} : vector<16x144xbf16> to vector<16x16xbf16>
    %cst_158 = arith.constant dense<0.000000e+00> : vector<16x768xf32>
    %197 = tpu.matmul %196, %195, %cst_158 {dimension_numbers = #tpu.dot_dimension_numbers<[1], [0], [0], [1], [0, 0, 1, 1], [], []>} : vector<16x16xbf16>, vector<16x768xbf16>, vector<16x768xf32> -> vector<16x768xf32>
    %198 = arith.addf %194, %197 : vector<16x768xf32>
    %c0_159 = arith.constant 0 : index
    %c145_160 = arith.constant 145 : index
    %199 = vector.load %arg15[%c0_159, %c145_160] : memref<16x1024xbf16, #tpu.memory_space<vmem>>, vector<16x768xbf16>
    %200 = vector.extract_strided_slice %175 {offsets = [0, 96], sizes = [16, 16], strides = [1, 1]} : vector<16x144xbf16> to vector<16x16xbf16>
    %cst_161 = arith.constant dense<0.000000e+00> : vector<16x768xf32>
    %201 = tpu.matmul %200, %199, %cst_161 {dimension_numbers = #tpu.dot_dimension_numbers<[1], [0], [0], [1], [0, 0, 1, 1], [], []>} : vector<16x16xbf16>, vector<16x768xbf16>, vector<16x768xf32> -> vector<16x768xf32>
    %202 = arith.addf %198, %201 : vector<16x768xf32>
    %c0_162 = arith.constant 0 : index
    %c146_163 = arith.constant 146 : index
    %203 = vector.load %arg15[%c0_162, %c146_163] : memref<16x1024xbf16, #tpu.memory_space<vmem>>, vector<16x768xbf16>
    %204 = vector.extract_strided_slice %175 {offsets = [0, 112], sizes = [16, 16], strides = [1, 1]} : vector<16x144xbf16> to vector<16x16xbf16>
    %cst_164 = arith.constant dense<0.000000e+00> : vector<16x768xf32>
    %205 = tpu.matmul %204, %203, %cst_164 {dimension_numbers = #tpu.dot_dimension_numbers<[1], [0], [0], [1], [0, 0, 1, 1], [], []>} : vector<16x16xbf16>, vector<16x768xbf16>, vector<16x768xf32> -> vector<16x768xf32>
    %206 = arith.addf %202, %205 : vector<16x768xf32>
    %c0_165 = arith.constant 0 : index
    %c147_166 = arith.constant 147 : index
    %207 = vector.load %arg15[%c0_165, %c147_166] : memref<16x1024xbf16, #tpu.memory_space<vmem>>, vector<16x768xbf16>
    %208 = vector.extract_strided_slice %175 {offsets = [0, 128], sizes = [16, 16], strides = [1, 1]} : vector<16x144xbf16> to vector<16x16xbf16>
    %cst_167 = arith.constant dense<0.000000e+00> : vector<16x768xf32>
    %209 = tpu.matmul %208, %207, %cst_167 {dimension_numbers = #tpu.dot_dimension_numbers<[1], [0], [0], [1], [0, 0, 1, 1], [], []>} : vector<16x16xbf16>, vector<16x768xbf16>, vector<16x768xf32> -> vector<16x768xf32>
    %210 = arith.addf %206, %209 : vector<16x768xf32>
    %c0_168 = arith.constant 0 : index
    %c4_169 = arith.constant 4 : index
    %211 = vector.load %arg10[%c0_168, %c4_169] : memref<16x8xf32, #tpu.memory_space<vmem>>, vector<16x1xf32>
    %212 = vector.broadcast %211 : vector<16x1xf32> to vector<16x768xf32>
    %213 = arith.addf %210, %212 : vector<16x768xf32>
    %214 = arith.addf %213, %174 : vector<16x768xf32>
    %cst_170 = arith.constant 0.000000e+00 : f32
    %215 = vector.broadcast %cst_170 : f32 to vector<16x768xf32>
    %216 = arith.maximumf %214, %215 : vector<16x768xf32>
    %c0_171 = arith.constant 0 : index
    %c128_172 = arith.constant 128 : index
    %217 = vector.load %arg13[%c0_171, %c128_172] : memref<16x1024xbf16, #tpu.memory_space<vmem>>, vector<16x768xbf16>
    %218 = arith.extf %217 : vector<16x768xbf16> to vector<16x768xf32>
    %219 = arith.addf %216, %218 : vector<16x768xf32>
    %220 = vector.broadcast %20 : vector<1x768xf32> to vector<16x768xf32>
    %221 = arith.mulf %219, %220 : vector<16x768xf32>
    %222 = arith.truncf %221 : vector<16x768xf32> to vector<16x768xbf16>
    %c0_173 = arith.constant 0 : index
    %c128_174 = arith.constant 128 : index
    %223 = vector.load %arg16[%c0_173, %c128_174] : memref<16x1024xbf16, #tpu.memory_space<vmem>>, vector<16x768xbf16>
    tpu.vector_store %arg16[%c0_173, %c128_174], %222 {strides = array<i32>} : memref<16x1024xbf16, #tpu.memory_space<vmem>>, vector<16x768xbf16>,
    %c0_175 = arith.constant 0 : index
    %c129_176 = arith.constant 129 : index
    %224 = vector.load %arg16[%c0_175, %c129_176] : memref<16x1024xbf16, #tpu.memory_space<vmem>>, vector<16x768xbf16>
    %225 = arith.extf %224 : vector<16x768xbf16> to vector<16x768xf32>
    %c0_177 = arith.constant 0 : index
    %c127_178 = arith.constant 127 : index
    %226 = vector.load %arg16[%c0_177, %c127_178] : memref<16x1024xbf16, #tpu.memory_space<vmem>>, vector<16x768xbf16>
    %227 = arith.extf %226 : vector<16x768xbf16> to vector<16x768xf32>
    %228 = vector.broadcast %21 : vector<1x768xf32> to vector<16x768xf32>
    %229 = arith.mulf %228, %225 : vector<16x768xf32>
    %230 = arith.addf %221, %229 : vector<16x768xf32>
    %231 = vector.broadcast %22 : vector<1x768xf32> to vector<16x768xf32>
    %232 = arith.mulf %231, %227 : vector<16x768xf32>
    %233 = arith.addf %230, %232 : vector<16x768xf32>
    %234 = arith.truncf %233 : vector<16x768xf32> to vector<16x768xbf16>
    %c0_179 = arith.constant 0 : index
    %c128_180 = arith.constant 128 : index
    %235 = vector.load %arg12[%c0_179, %c128_180] : memref<16x1024xbf16, #tpu.memory_space<vmem>>, vector<16x768xbf16>
    tpu.vector_store %arg12[%c0_179, %c128_180], %234 {strides = array<i32>} : memref<16x1024xbf16, #tpu.memory_space<vmem>>, vector<16x768xbf16>,
    %c0_181 = arith.constant 0 : index
    %c146_182 = arith.constant 146 : index
    %236 = vector.load %arg12[%c0_181, %c146_182] : memref<16x1024xbf16, #tpu.memory_space<vmem>>, vector<16x768xbf16>
    %237 = arith.extf %236 : vector<16x768xbf16> to vector<16x768xf32>
    %c0_183 = arith.constant 0 : index
    %c110_184 = arith.constant 110 : index
    %238 = vector.load %arg12[%c0_183, %c110_184] : memref<16x1024xbf16, #tpu.memory_space<vmem>>, vector<16x768xbf16>
    %239 = arith.extf %238 : vector<16x768xbf16> to vector<16x768xf32>
    %240 = vector.broadcast %23 : vector<1x768xf32> to vector<16x768xf32>
    %241 = arith.mulf %240, %237 : vector<16x768xf32>
    %242 = arith.addf %233, %241 : vector<16x768xf32>
    %243 = vector.broadcast %24 : vector<1x768xf32> to vector<16x768xf32>
    %244 = arith.mulf %243, %239 : vector<16x768xf32>
    %245 = arith.addf %242, %244 : vector<16x768xf32>
    %246 = arith.truncf %245 : vector<16x768xf32> to vector<16x768xbf16>
    %c0_185 = arith.constant 0 : index
    %c128_186 = arith.constant 128 : index
    %247 = vector.load %arg12[%c0_185, %c128_186] : memref<16x1024xbf16, #tpu.memory_space<vmem>>, vector<16x768xbf16>
    tpu.vector_store %arg12[%c0_185, %c128_186], %246 {strides = array<i32>} : memref<16x1024xbf16, #tpu.memory_space<vmem>>, vector<16x768xbf16>,
    %c0_187 = arith.constant 0 : index
    %c0_188 = arith.constant 0 : index
    %248 = vector.load %arg9[%c0_187, %c0_188] : memref<8x144xbf16, #tpu.memory_space<vmem>>, vector<8x144xbf16>
    %c0_189 = arith.constant 0 : index
    %c109_190 = arith.constant 109 : index
    %249 = vector.load %arg12[%c0_189, %c109_190] : memref<16x1024xbf16, #tpu.memory_space<vmem>>, vector<16x768xbf16>
    %250 = vector.extract_strided_slice %248 {offsets = [0, 0], sizes = [8, 16], strides = [1, 1]} : vector<8x144xbf16> to vector<8x16xbf16>
    %cst_191 = arith.constant dense<0.000000e+00> : vector<8x768xf32>
    %251 = tpu.matmul %250, %249, %cst_191 {dimension_numbers = #tpu.dot_dimension_numbers<[1], [0], [0], [1], [0, 0, 1, 1], [], []>} : vector<8x16xbf16>, vector<16x768xbf16>, vector<8x768xf32> -> vector<8x768xf32>
    %c0_192 = arith.constant 0 : index
    %c110_193 = arith.constant 110 : index
    %252 = vector.load %arg12[%c0_192, %c110_193] : memref<16x1024xbf16, #tpu.memory_space<vmem>>, vector<16x768xbf16>
    %253 = vector.extract_strided_slice %248 {offsets = [0, 16], sizes = [8, 16], strides = [1, 1]} : vector<8x144xbf16> to vector<8x16xbf16>
    %cst_194 = arith.constant dense<0.000000e+00> : vector<8x768xf32>
    %254 = tpu.matmul %253, %252, %cst_194 {dimension_numbers = #tpu.dot_dimension_numbers<[1], [0], [0], [1], [0, 0, 1, 1], [], []>} : vector<8x16xbf16>, vector<16x768xbf16>, vector<8x768xf32> -> vector<8x768xf32>
    %255 = arith.addf %251, %254 : vector<8x768xf32>
    %c0_195 = arith.constant 0 : index
    %c111_196 = arith.constant 111 : index
    %256 = vector.load %arg12[%c0_195, %c111_196] : memref<16x1024xbf16, #tpu.memory_space<vmem>>, vector<16x768xbf16>
    %257 = vector.extract_strided_slice %248 {offsets = [0, 32], sizes = [8, 16], strides = [1, 1]} : vector<8x144xbf16> to vector<8x16xbf16>
    %cst_197 = arith.constant dense<0.000000e+00> : vector<8x768xf32>
    %258 = tpu.matmul %257, %256, %cst_197 {dimension_numbers = #tpu.dot_dimension_numbers<[1], [0], [0], [1], [0, 0, 1, 1], [], []>} : vector<8x16xbf16>, vector<16x768xbf16>, vector<8x768xf32> -> vector<8x768xf32>
    %259 = arith.addf %255, %258 : vector<8x768xf32>
    %c0_198 = arith.constant 0 : index
    %c127_199 = arith.constant 127 : index
    %260 = vector.load %arg12[%c0_198, %c127_199] : memref<16x1024xbf16, #tpu.memory_space<vmem>>, vector<16x768xbf16>
    %261 = vector.extract_strided_slice %248 {offsets = [0, 48], sizes = [8, 16], strides = [1, 1]} : vector<8x144xbf16> to vector<8x16xbf16>
    %cst_200 = arith.constant dense<0.000000e+00> : vector<8x768xf32>
    %262 = tpu.matmul %261, %260, %cst_200 {dimension_numbers = #tpu.dot_dimension_numbers<[1], [0], [0], [1], [0, 0, 1, 1], [], []>} : vector<8x16xbf16>, vector<16x768xbf16>, vector<8x768xf32> -> vector<8x768xf32>
    %263 = arith.addf %259, %262 : vector<8x768xf32>
    %c0_201 = arith.constant 0 : index
    %c128_202 = arith.constant 128 : index
    %264 = vector.load %arg12[%c0_201, %c128_202] : memref<16x1024xbf16, #tpu.memory_space<vmem>>, vector<16x768xbf16>
    %265 = vector.extract_strided_slice %248 {offsets = [0, 64], sizes = [8, 16], strides = [1, 1]} : vector<8x144xbf16> to vector<8x16xbf16>
    %cst_203 = arith.constant dense<0.000000e+00> : vector<8x768xf32>
    %266 = tpu.matmul %265, %264, %cst_203 {dimension_numbers = #tpu.dot_dimension_numbers<[1], [0], [0], [1], [0, 0, 1, 1], [], []>} : vector<8x16xbf16>, vector<16x768xbf16>, vector<8x768xf32> -> vector<8x768xf32>
    %267 = arith.addf %263, %266 : vector<8x768xf32>
    %c0_204 = arith.constant 0 : index
    %c129_205 = arith.constant 129 : index
    %268 = vector.load %arg12[%c0_204, %c129_205] : memref<16x1024xbf16, #tpu.memory_space<vmem>>, vector<16x768xbf16>
    %269 = vector.extract_strided_slice %248 {offsets = [0, 80], sizes = [8, 16], strides = [1, 1]} : vector<8x144xbf16> to vector<8x16xbf16>
    %cst_206 = arith.constant dense<0.000000e+00> : vector<8x768xf32>
    %270 = tpu.matmul %269, %268, %cst_206 {dimension_numbers = #tpu.dot_dimension_numbers<[1], [0], [0], [1], [0, 0, 1, 1], [], []>} : vector<8x16xbf16>, vector<16x768xbf16>, vector<8x768xf32> -> vector<8x768xf32>
    %271 = arith.addf %267, %270 : vector<8x768xf32>
    %c0_207 = arith.constant 0 : index
    %c145_208 = arith.constant 145 : index
    %272 = vector.load %arg12[%c0_207, %c145_208] : memref<16x1024xbf16, #tpu.memory_space<vmem>>, vector<16x768xbf16>
    %273 = vector.extract_strided_slice %248 {offsets = [0, 96], sizes = [8, 16], strides = [1, 1]} : vector<8x144xbf16> to vector<8x16xbf16>
    %cst_209 = arith.constant dense<0.000000e+00> : vector<8x768xf32>
    %274 = tpu.matmul %273, %272, %cst_209 {dimension_numbers = #tpu.dot_dimension_numbers<[1], [0], [0], [1], [0, 0, 1, 1], [], []>} : vector<8x16xbf16>, vector<16x768xbf16>, vector<8x768xf32> -> vector<8x768xf32>
    %275 = arith.addf %271, %274 : vector<8x768xf32>
    %c0_210 = arith.constant 0 : index
    %c146_211 = arith.constant 146 : index
    %276 = vector.load %arg12[%c0_210, %c146_211] : memref<16x1024xbf16, #tpu.memory_space<vmem>>, vector<16x768xbf16>
    %277 = vector.extract_strided_slice %248 {offsets = [0, 112], sizes = [8, 16], strides = [1, 1]} : vector<8x144xbf16> to vector<8x16xbf16>
    %cst_212 = arith.constant dense<0.000000e+00> : vector<8x768xf32>
    %278 = tpu.matmul %277, %276, %cst_212 {dimension_numbers = #tpu.dot_dimension_numbers<[1], [0], [0], [1], [0, 0, 1, 1], [], []>} : vector<8x16xbf16>, vector<16x768xbf16>, vector<8x768xf32> -> vector<8x768xf32>
    %279 = arith.addf %275, %278 : vector<8x768xf32>
    %c0_213 = arith.constant 0 : index
    %c147_214 = arith.constant 147 : index
    %280 = vector.load %arg12[%c0_213, %c147_214] : memref<16x1024xbf16, #tpu.memory_space<vmem>>, vector<16x768xbf16>
    %281 = vector.extract_strided_slice %248 {offsets = [0, 128], sizes = [8, 16], strides = [1, 1]} : vector<8x144xbf16> to vector<8x16xbf16>
    %cst_215 = arith.constant dense<0.000000e+00> : vector<8x768xf32>
    %282 = tpu.matmul %281, %280, %cst_215 {dimension_numbers = #tpu.dot_dimension_numbers<[1], [0], [0], [1], [0, 0, 1, 1], [], []>} : vector<8x16xbf16>, vector<16x768xbf16>, vector<8x768xf32> -> vector<8x768xf32>
    %283 = arith.addf %279, %282 : vector<8x768xf32>
    %c0_216 = arith.constant 0 : index
    %c5 = arith.constant 5 : index
    %284 = vector.load %arg10[%c0_216, %c5] : memref<16x8xf32, #tpu.memory_space<vmem>>, vector<8x1xf32>
    %285 = vector.broadcast %284 : vector<8x1xf32> to vector<8x768xf32>
    %286 = arith.addf %283, %285 : vector<8x768xf32>
    %287 = arith.negf %286 : vector<8x768xf32>
    %288 = math.exp %287 : vector<8x768xf32>
    %cst_217 = arith.constant 1.000000e+00 : f32
    %289 = vector.broadcast %cst_217 : f32 to vector<8x768xf32>
    %290 = arith.addf %289, %288 : vector<8x768xf32>
    %291 = arith.divf %289, %290 : vector<8x768xf32>
    %c0_218 = arith.constant 0 : index
    %c0_219 = arith.constant 0 : index
    %292 = vector.load %arg11[%c0_218, %c0_219] : memref<8x768xf32, #tpu.memory_space<vmem>>, vector<8x768xf32>
    tpu.vector_store %arg11[%c0_218, %c0_219], %291 {strides = array<i32>} : memref<8x768xf32, #tpu.memory_space<vmem>>, vector<8x768xf32>,
    return
  }
  func.func @transform_0(%arg0: i32) -> (i32, i32) {
    %c0_i32 = arith.constant 0 : i32
    %c0_i32_0 = arith.constant 0 : i32
    return %c0_i32, %arg0 : i32, i32
  }
  func.func @transform_1(%arg0: i32) -> (i32, i32) {
    %c0_i32 = arith.constant 0 : i32
    %c0_i32_0 = arith.constant 0 : i32
    return %c0_i32, %arg0 : i32, i32
  }
  func.func @transform_2(%arg0: i32) -> (i32, i32) {
    %c0_i32 = arith.constant 0 : i32
    %c0_i32_0 = arith.constant 0 : i32
    %c0_i32_1 = arith.constant 0 : i32
    return %c0_i32, %c0_i32_0 : i32, i32
  }
  func.func @transform_3(%arg0: i32) -> (i32, i32) {
    %c0_i32 = arith.constant 0 : i32
    %c0_i32_0 = arith.constant 0 : i32
    %c0_i32_1 = arith.constant 0 : i32
    return %c0_i32, %c0_i32_0 : i32, i32
  }
  func.func @transform_4(%arg0: i32) -> (i32, i32) {
    %c0_i32 = arith.constant 0 : i32
    %c0_i32_0 = arith.constant 0 : i32
    %c0_i32_1 = arith.constant 0 : i32
    return %c0_i32, %c0_i32_0 : i32, i32
  }
  func.func @transform_5(%arg0: i32) -> (i32, i32) {
    %c0_i32 = arith.constant 0 : i32
    %c0_i32_0 = arith.constant 0 : i32
    %c0_i32_1 = arith.constant 0 : i32
    return %c0_i32, %c0_i32_0 : i32, i32
  }
  func.func @transform_6(%arg0: i32) -> (i32, i32) {
    %c0_i32 = arith.constant 0 : i32
    %c0_i32_0 = arith.constant 0 : i32
    %c0_i32_1 = arith.constant 0 : i32
    return %c0_i32, %c0_i32_0 : i32, i32
  }
  func.func @transform_7(%arg0: i32) -> (i32, i32) {
    %c0_i32 = arith.constant 0 : i32
    %c0_i32_0 = arith.constant 0 : i32
    %c0_i32_1 = arith.constant 0 : i32
    return %c0_i32, %c0_i32_0 : i32, i32
  }
  func.func @transform_8(%arg0: i32) -> (i32, i32) {
    %c0_i32 = arith.constant 0 : i32
    %c0_i32_0 = arith.constant 0 : i32
    %c0_i32_1 = arith.constant 0 : i32
    return %c0_i32, %c0_i32_0 : i32, i32
  }
  func.func @transform_9(%arg0: i32) -> (i32, i32) {
    %c0_i32 = arith.constant 0 : i32
    %c0_i32_0 = arith.constant 0 : i32
    %c0_i32_1 = arith.constant 0 : i32
    return %c0_i32, %c0_i32_0 : i32, i32
  }
  func.func @transform_10(%arg0: i32) -> (i32, i32) {
    %c0_i32 = arith.constant 0 : i32
    %c0_i32_0 = arith.constant 0 : i32
    return %c0_i32, %arg0 : i32, i32
  }
}

</mosaic_0001>

<bundles_post_ra>
// kernel: ulstm_forward.1
= control target key start
LH: loop header
LB: loop body
LE: loop exit
PB: predicated region body
PF: predicated region fallthrough
CT: control target
= control target key end

     0   :  { %v9769_v3 = vmov 2   ;;  %v12208_v7 = vmov 0   ;;  %s9771_s21 = smov 18   ;;  %s9772_s16 = smov 112   ;;  %vm125_vm0 = vcmask 146432   ;;  %vm138_vm1 = vcmask 130048   ;;  %s12193_s0 = inlined_call_operand.vmem [shape: bf16[16,1024], index: 0, kind: input, shape index: {}]   ;;  %s12194_s3 = inlined_call_operand.vmem [shape: bf16[16,144], index: 3, kind: input, shape index: {}]   ;;  %s12195_s9 = inlined_call_operand.vmem [shape: f32[16,8], index: 9, kind: input, shape index: {}]   ;;  %s12196_s5 = inlined_call_operand.vmem [shape: bf16[16,32], index: 5, kind: input, shape index: {}]   ;;  %s12197_s1 = inlined_call_operand.vmem [shape: bf16[32,1024], index: 1, kind: input, shape index: {}]   ;;  %s12198_s6 = inlined_call_operand.vmem [shape: bf16[16,144], index: 6, kind: input, shape index: {}]   ;;  %s12199_s2 = inlined_call_operand.vmem [shape: f32[8,768], index: 2, kind: input, shape index: {}]   ;;  %s12200_s4 = inlined_call_operand.vmem [shape: bf16[16,144], index: 4, kind: input, shape index: {}]   ;;  %s12201_s7 = inlined_call_operand.vmem [shape: bf16[16,144], index: 7, kind: input, shape index: {}]   ;;  %s12202_s8 = inlined_call_operand.vmem [shape: bf16[8,144], index: 8, kind: input, shape index: {}]   ;;  %s12203_s10 = inlined_call_operand.vmem [shape: f32[8,768], index: 10, kind: output, shape index: {}]  }
   0x1   :  { %v67_v0 = vld [vmem:[%s12193_s0] sm:$0xff]  ;;  %v68_v2 = vld [vmem:[%s12193_s0 + $0x8] sm:$0xff]  ;;  %9579 = vset.pattern.permute.xlu1 %v9769_v3  ;;  %9580 = vset.pattern.permute.xlu0 %v9769_v3  ;;  %v69_v11 = vld [vmem:[%s12193_s0 + $0x10] sm:$0xff]  ;;  %s9773_s17 = smov 19   ;;  %s9774_s18 = smov 17   ;;  %vm285_vm2 = vcmask 154624  }
   0x2   :  { %v71_v1 = vld [vmem:[%s12193_s0 + $0x20] sm:$0xff]  ;;  %v72_v6 = vld [vmem:[%s12193_s0 + $0x28] sm:$0xff]  ;;  %174 = vmatprep.mubr.bf16.mxu0 %v12208_v7  ;;  %217 = vmatprep.mubr.bf16.mxu1 %v12208_v7  ;;  %v73_v12 = vld [vmem:[%s12193_s0 + $0x30] sm:$0xff]  ;;  %s9775_s19 = smov 96   ;;  %s9776_s20 = smov 1   ;;  %vm446_vm3 = vcmask 138240  }
   0x3   :  { %v8989_v4 = vcombine.high %v67_v0, %v71_v1  ;;  %v8988_v5 = vcombine.low %v67_v0, %v71_v1  ;;  %v9859_v8 = vcombine.high %v68_v2, %v72_v6  ;;  %v8990_v9 = vcombine.low %v68_v2, %v72_v6  ;;  %v9866_v10 = vld [vmem:[%s12194_s3] ss:$8 sps:$4 sm:$0xff]   ;;  %v70_v13 = vld [vmem:[%s12193_s0 + $0x18] sm:$0xf]  ;;  %v959_v15 = vld [vmem:[%s12193_s0 + $0xc] sm:$0xff]  ;;  %s9777_s22 = smov 80  }
   0x4   :  { %v74_v14 = vld [vmem:[%s12193_s0 + $0x38] sm:$0xf]  ;;  %v963_v16 = vld [vmem:[%s12193_s0 + $0x2c] sm:$0xff]  ;;  %v8993_v18 = vcombine.high %v69_v11, %v73_v12  ;;  %v8992_v20 = vcombine.low %v69_v11, %v73_v12  ;;  %v958_v21 = vld [vmem:[%s12193_s0 + $0x4] sm:$0xff]  ;;  %s9778_s27 = smov 64   ;;  %s9779_s28 = smov 127  }
   0x5   :  { %113 = vrot.lane.b32.xlu0 %v8989_v4, %s9771_s21  ;;  %111 = vrot.lane.b32.xlu1 %v8988_v5, %s9771_s21  ;;  %v9886_v17 = vcombine.high %v959_v15, %v963_v16  ;;  %v8994_v19 = vcombine.low %v70_v13, %v74_v14  ;;  %v962_v22 = vld [vmem:[%s12193_s0 + $0x24] sm:$0xff]  ;;  %v9926_v24 = vcombine.low %v959_v15, %v963_v16  ;;  %v960_v26 = vld [vmem:[%s12193_s0 + $0x14] sm:$0xff]  ;;  %s9780_s24 = smov 48   ;;  %s9781_s25 = smov 111   ;;  %vm619_vm4 = vcmask 7168  }
   0x6   :  { %v9924_v23 = vcombine.high %v958_v21, %v962_v22  ;;  %v9932_v25 = vcombine.low %v958_v21, %v962_v22  ;;  %v964_v27 = vld [vmem:[%s12193_s0 + $0x34] sm:$0xff]  ;;  %v961_v28 = vld [vmem:[%s12193_s0 + $0x1c] sm:$0xf]  ;;  %s9782_s26 = smov 32   ;;  %s9783_s29 = smov 110   ;;  %v10005_v33 = vld [vmem:[%s12195_s9] sm:$0xff] }
   0x7   :  { %v965_v29 = vld [vmem:[%s12193_s0 + $0x3c] sm:$0xf]  ;;  %v9950_v30 = vcombine.high %v960_v26, %v964_v27  ;;  %v9955_v32 = vcombine.low %v960_v26, %v964_v27  ;;  %s12206_s30 = smov 16   ;;  %s12204_s11 = smov 109   ;;  %v10013_v36 = vld [vmem:[%s12195_s9 + $0x8] sm:$0xff]  ;;  %vm1011_vm5 = vcmask 1039360  }
   0x8   :  { %v9022_v31 = vcombine.low %v961_v28, %v965_v29  ;;  %vm1184_vm6 = vcmask 908288   ;;  %vm1357_vm7 = vcmask 900096   ;;  %vm1531_vm8 = vcmask 891904   ;;  %s12249_s23 = smov 109  }
   0x9   :  { %115 = vrot.lane.b32.xlu0 %v8990_v9, %s9771_s21  ;;  %80 = vrot.lane.b32.xlu1 %v9866_v10, %s9772_s16  ;;  %vm3492_vm9 = vcmask 261120  }
   0xd   :  { %121 = vrot.lane.b32.xlu0 %v8993_v18, %s9771_s21  ;;  %123 = vrot.lane.b32.xlu1 %v8994_v19, %s9771_s21 }
  0x11   :  { %119 = vrot.lane.b32.xlu0 %v8992_v20, %s9771_s21  ;;  %273 = vrot.lane.b32.xlu1 %v8989_v4, %s9773_s17 }
  0x15   :  { %275 = vrot.lane.b32.xlu0 %v8990_v9, %s9773_s17  ;;  %271 = vrot.lane.b32.xlu1 %v8988_v5, %s9773_s17 }
  0x19   :  { %281 = vrot.lane.b32.xlu0 %v8993_v18, %s9773_s17  ;;  %283 = vrot.lane.b32.xlu1 %v8994_v19, %s9773_s17 }
  0x1d   :  { %279 = vrot.lane.b32.xlu0 %v8992_v20, %s9773_s17  ;;  %434 = vrot.lane.b32.xlu1 %v8989_v4, %s9774_s18 }
  0x21   :  { %436 = vrot.lane.b32.xlu0 %v8990_v9, %s9774_s18  ;;  %432 = vrot.lane.b32.xlu1 %v8988_v5, %s9774_s18 }
  0x25   :  { %430 = vrot.lane.b32.xlu0 %v9866_v10, %s9775_s19  ;;  %442 = vrot.lane.b32.xlu1 %v8993_v18, %s9774_s18 }
  0x29   :  { %444 = vrot.lane.b32.xlu0 %v8994_v19, %s9774_s18  ;;  %440 = vrot.lane.b32.xlu1 %v8992_v20, %s9774_s18 }
  0x2d   :  { %607 = vrot.lane.b32.xlu0 %v8989_v4, %s9776_s20  ;;  %609 = vrot.lane.b32.xlu1 %v8990_v9, %s9776_s20 }
  0x31   :  { %605 = vrot.lane.b32.xlu0 %v8988_v5, %s9776_s20  ;;  %603 = vrot.lane.b32.xlu1 %v9866_v10, %s9777_s22 }
  0x35   :  { %615 = vrot.lane.b32.xlu0 %v8993_v18, %s9776_s20  ;;  %617 = vrot.lane.b32.xlu1 %v8994_v19, %s9776_s20 }
  0x39   :  { %613 = vrot.lane.b32.xlu0 %v8992_v20, %s9776_s20  ;;  %782 = vrot.lane.b32.xlu1 %v9866_v10, %s9778_s27 }
  0x3d   :  { %999 = vrot.lane.b32.xlu0 %v9924_v23, %s9779_s28  ;;  %1001 = vrot.lane.b32.xlu1 %v9926_v24, %s9779_s28 }
  0x41   :  { %997 = vrot.lane.b32.xlu0 %v9932_v25, %s9779_s28  ;;  %966 = vrot.lane.b32.xlu1 %v9866_v10, %s9780_s24 }
  0x45   :  { %1007 = vrot.lane.b32.xlu0 %v9950_v30, %s9779_s28  ;;  %1009 = vrot.lane.b32.xlu1 %v9022_v31, %s9779_s28 }
  0x49   :  { %1005 = vrot.lane.b32.xlu0 %v9955_v32, %s9779_s28  ;;  %1172 = vrot.lane.b32.xlu1 %v9924_v23, %s9781_s25 }
  0x4d   :  { %1174 = vrot.lane.b32.xlu0 %v9926_v24, %s9781_s25  ;;  %1170 = vrot.lane.b32.xlu1 %v9932_v25, %s9781_s25 }
  0x51   :  { %1168 = vrot.lane.b32.xlu0 %v9866_v10, %s9782_s26  ;;  %1180 = vrot.lane.b32.xlu1 %v9950_v30, %s9781_s25 }
  0x55   :  { %1182 = vrot.lane.b32.xlu0 %v9022_v31, %s9781_s25  ;;  %1178 = vrot.lane.b32.xlu1 %v9955_v32, %s9781_s25 }
  0x59   :  { %1345 = vrot.lane.b32.xlu0 %v9924_v23, %s9783_s29  ;;  %1347 = vrot.lane.b32.xlu1 %v9926_v24, %s9783_s29 }
  0x5d   :  { %1343 = vrot.lane.b32.xlu0 %v9932_v25, %s9783_s29  ;;  %1341 = vrot.lane.b32.xlu1 %v9866_v10, %s12206_s30 }
  0x61   :  { %1353 = vrot.lane.b32.xlu0 %v9950_v30, %s9783_s29  ;;  %1355 = vrot.lane.b32.xlu1 %v9022_v31, %s9783_s29 }
  0x65   :  { %1351 = vrot.lane.b32.xlu0 %v9955_v32, %s9783_s29  ;;  %1519 = vrot.lane.b32.xlu1 %v9924_v23, %s12204_s11 }
  0x69   :  { %1521 = vrot.lane.b32.xlu0 %v9926_v24, %s12204_s11  ;;  %1517 = vrot.lane.b32.xlu1 %v9932_v25, %s12204_s11 }
  0x6d   :  { %1527 = vrot.lane.b32.xlu0 %v9950_v30, %s12204_s11  ;;  %1529 = vrot.lane.b32.xlu1 %v9022_v31, %s12204_s11 }
  0x71   :  { %1525 = vrot.lane.b32.xlu0 %v9955_v32, %s12204_s11  ;;  %117 = vrot.lane.b32.xlu1 %v9859_v8, %s9771_s21 }
  0x75   :  { %277 = vrot.lane.b32.xlu0 %v9859_v8, %s9773_s17  ;;  %438 = vrot.lane.b32.xlu1 %v9859_v8, %s9774_s18 }
  0x77   :  { %v114_v34 = vpop.permute.xlu0 %113  ;;  %v112_v35 = vpop.permute.xlu1 %111 }
  0x78   :  { %v126_v40 = vsel %vm125_vm0, %v112_v35, %v114_v34 }
  0x79   :  { %611 = vrot.lane.b32.xlu0 %v9859_v8, %s9776_s20  ;;  %3419 = vperm.xlu1 %9579, %v10005_v33  }
  0x7b   :  { %v10015_v37 = vpop.permute.xlu0 %115  ;;  %v10017_v38 = vpop.permute.xlu1 %80 }
  0x7c   :  { %v127_v39 = vsel %vm125_vm0, %v114_v34, %v10015_v37 }
  0x7d   :  { %142 = vmatprep.subr.bf16.mxu0 %v127_v39  ;;  %3424 = vperm.xlu0 %9580, %v10013_v36  }
  0x7e   :  { %143 = vmatpush1.bf16.msra.mxu0 %v126_v40  ;;  %1003 = vrot.lane.b32.xlu1 %v9886_v17, %s9779_s28 }
  0x7f   :  { %v122_v41 = vpop.permute.xlu0 %121  ;;  %v124_v42 = vpop.permute.xlu1 %123  ;;  %9582 = vset.pattern.permute.xlu1 %v12208_v7 }
  0x80   :  { %v131_v43 = vsel %vm125_vm0, %v122_v41, %v124_v42 }
  0x81   :  { %8995 = vmatmul.mubr.msk.bf16.vlgmr.msra.gmra.mrb[0].mxu0 %vm138_vm1, %v10017_v38  ;;  %228 = vmatprep.subr.bf16.mxu0 %v131_v43 }
  0x82   :  { %260 = vmatprep.mubr.bf16.mxu0 %v12208_v7  ;;  %1349 = vrot.lane.b32.xlu0 %v9886_v17, %s9783_s29 }
  0x83   :  { %v10032_v44 = vpop.permute.xlu0 %119  ;;  %v274_v45 = vpop.permute.xlu1 %273  ;;  %1176 = vrot.lane.b32.xlu1 %v9886_v17, %s9781_s25  ;;  %9581 = vset.pattern.permute.xlu0 %v12208_v7 }
  0x84   :  { %v130_v46 = vsel %vm125_vm0, %v10032_v44, %v122_v41 }
  0x85   :  { %229 = vmatpush1.bf16.msra.mxu0 %v130_v46 }
  0x87   :  { %v10039_v47 = vpop.permute.xlu0 %275  ;;  %v272_v48 = vpop.permute.xlu1 %271  ;;  %1523 = vrot.lane.b32.xlu1 %v9886_v17, %s12204_s11 }
  0x88   :  { %v286_v49 = vsel %vm285_vm2, %v272_v48, %v274_v45  ;;  %v287_v50 = vsel %vm285_vm2, %v274_v45, %v10039_v47 }
  0x89   :  { %8997 = vmatmul.mubr.msk.bf16.vlgmr.msra.gmra.mrb[4].mxu0 %vm138_vm1, %v10017_v38  ;;  %301 = vmatprep.subr.bf16.mxu0 %v287_v50 }
  0x8a   :  { %302 = vmatpush1.bf16.msra.mxu0 %v286_v49  ;;  %333 = vmatprep.mubr.bf16.mxu0 %v12208_v7 }
  0x8b   :  { %v282_v51 = vpop.permute.xlu0 %281  ;;  %v284_v52 = vpop.permute.xlu1 %283 }
  0x8c   :  { %v291_v53 = vsel %vm285_vm2, %v282_v51, %v284_v52 }
  0x8d   :  { %387 = vmatprep.subr.bf16.mxu0 %v291_v53 }
  0x8f   :  { %v10050_v54 = vpop.permute.xlu0 %279  ;;  %v435_v55 = vpop.permute.xlu1 %434 }
  0x90   :  { %v290_v56 = vsel %vm285_vm2, %v10050_v54, %v282_v51 }
  0x91   :  { %8998 = vmatmul.mubr.msk.bf16.vlgmr.msra.gmra.mrb[0].mxu0 %vm138_vm1, %v9866_v10 }
  0x92   :  { %388 = vmatpush1.bf16.msra.mxu0 %v290_v56  ;;  %419 = vmatprep.mubr.bf16.mxu0 %v12208_v7 }
  0x93   :  { %v10057_v57 = vpop.permute.xlu0 %436  ;;  %v433_v58 = vpop.permute.xlu1 %432 }
  0x94   :  { %v448_v59 = vsel %vm446_vm3, %v435_v55, %v10057_v57  ;;  %v447_v60 = vsel %vm446_vm3, %v433_v58, %v435_v55 }
  0x95   :  { %462 = vmatprep.subr.bf16.mxu0 %v448_v59 }
  0x97   :  { %v10062_v61 = vpop.permute.xlu0 %430  ;;  %v443_v62 = vpop.permute.xlu1 %442 }
  0x99   :  { %9000 = vmatmul.mubr.msk.bf16.vlgmr.msra.gmra.mrb[4].mxu0 %vm138_vm1, %v9866_v10 }
  0x9a   :  { %463 = vmatpush1.bf16.msra.mxu0 %v447_v60  ;;  %494 = vmatprep.mubr.bf16.mxu0 %v12208_v7 }
  0x9b   :  { %v445_v63 = vpop.permute.xlu0 %444  ;;  %v10067_v0 = vpop.permute.xlu1 %440 }
  0x9c   :  { %v452_v1 = vsel %vm446_vm3, %v443_v62, %v445_v63  ;;  %v451_v4 = vsel %vm446_vm3, %v10067_v0, %v443_v62 }
  0x9d   :  { %548 = vmatprep.subr.bf16.mxu0 %v452_v1 }
  0x9f   :  { %v608_v2 = vpop.permute.xlu0 %607  ;;  %v10070_v3 = vpop.permute.xlu1 %609 }
  0xa0   :  { %v621_v5 = vsel %vm619_vm4, %v608_v2, %v10070_v3 }
  0xa1   :  { %9001 = vmatmul.mubr.msk.bf16.vlgmr.msra.gmra.mrb[0].mxu0 %vm138_vm1, %v10062_v61 }
  0xa2   :  { %549 = vmatpush1.bf16.msra.mxu0 %v451_v4  ;;  %580 = vmatprep.mubr.bf16.mxu0 %v12208_v7 }
  0xa3   :  { %v606_v6 = vpop.permute.xlu0 %605  ;;  %v10079_v8 = vpop.permute.xlu1 %603  ;;  %635 = vmatprep.subr.bf16.mxu0 %v621_v5 }
  0xa4   :  { %v620_v9 = vsel %vm619_vm4, %v606_v6, %v608_v2 }
  0xa7   :  { %v616_v11 = vpop.permute.xlu0 %615  ;;  %v618_v12 = vpop.permute.xlu1 %617 }
  0xa8   :  { %v625_v13 = vsel %vm619_vm4, %v616_v11, %v618_v12 }
  0xa9   :  { %9003 = vmatmul.mubr.msk.bf16.vlgmr.msra.gmra.mrb[4].mxu0 %vm138_vm1, %v10062_v61 }
  0xaa   :  { %636 = vmatpush1.bf16.msra.mxu0 %v620_v9  ;;  %667 = vmatprep.mubr.bf16.mxu0 %v12208_v7 }
  0xab   :  { %v10086_v14 = vpop.permute.xlu0 %613  ;;  %v10088_v15 = vpop.permute.xlu1 %782  ;;  %721 = vmatprep.subr.bf16.mxu0 %v625_v13 }
  0xac   :  { %v624_v19 = vsel %vm619_vm4, %v10086_v14, %v616_v11 }
  0xaf   :  { %v1000_v16 = vpop.permute.xlu0 %999  ;;  %v10090_v18 = vpop.permute.xlu1 %1001 }
  0xb1   :  { %9004 = vmatmul.mubr.msk.bf16.vlgmr.msra.gmra.mrb[0].mxu0 %vm138_vm1, %v10079_v8 }
  0xb2   :  { %722 = vmatpush1.bf16.msra.mxu0 %v624_v19  ;;  %753 = vmatprep.mubr.bf16.mxu0 %v12208_v7 }
  0xb3   :  { %v998_v20 = vpop.permute.xlu0 %997  ;;  %v10097_v21 = vpop.permute.xlu1 %966  ;;  %817 = vmatprep.subr.bf16.mxu0 %v9924_v23  ;;  %v1013_v23 = vsel %vm1011_vm5, %v1000_v16, %v10090_v18 }
  0xb7   :  { %v1008_v22 = vpop.permute.xlu0 %1007  ;;  %v1010_v26 = vpop.permute.xlu1 %1009 }
  0xb8   :  { %v1017_v40 = vsel %vm1011_vm5, %v1008_v22, %v1010_v26 }
  0xb9   :  { %9006 = vmatmul.mubr.msk.bf16.vlgmr.msra.gmra.mrb[4].mxu0 %vm138_vm1, %v10079_v8 }
  0xba   :  { %818 = vmatpush1.bf16.msra.mxu0 %v9932_v25  ;;  %849 = vmatprep.mubr.bf16.mxu0 %v12208_v7 }
  0xbb   :  { %v10104_v27 = vpop.permute.xlu0 %1005  ;;  %v1173_v28 = vpop.permute.xlu1 %1172  ;;  %903 = vmatprep.subr.bf16.mxu0 %v9950_v30  ;;  %v1012_v30 = vsel %vm1011_vm5, %v998_v20, %v1000_v16 }
  0xbc   :  { %v1016_v45 = vsel %vm1011_vm5, %v10104_v27, %v1008_v22 }
  0xbf   :  { %v10107_v29 = vpop.permute.xlu0 %1174  ;;  %v1171_v31 = vpop.permute.xlu1 %1170 }
  0xc0   :  { %v1186_v46 = vsel %vm1184_vm6, %v1173_v28, %v10107_v29  ;;  %v1185_v50 = vsel %vm1184_vm6, %v1171_v31, %v1173_v28 }
  0xc1   :  { %9013 = vmatmul.mubr.msk.bf16.vlgmr.msra.gmra.mrb[0].mxu0 %vm138_vm1, %v10088_v15 }
  0xc2   :  { %904 = vmatpush1.bf16.msra.mxu0 %v9955_v32  ;;  %935 = vmatprep.mubr.bf16.mxu0 %v12208_v7 }
  0xc3   :  { %v10115_v25 = vpop.permute.xlu0 %1168  ;;  %v1181_v34 = vpop.permute.xlu1 %1180  ;;  %1027 = vmatprep.subr.bf16.mxu0 %v1013_v23 }
  0xc7   :  { %v1183_v35 = vpop.permute.xlu0 %1182  ;;  %v10118_v39 = vpop.permute.xlu1 %1178 }
  0xc8   :  { %v1190_v53 = vsel %vm1184_vm6, %v1181_v34, %v1183_v35  ;;  %v1189_v60 = vsel %vm1184_vm6, %v10118_v39, %v1181_v34  ;;  %v3402_v34 = vld [vmem:[%s12197_s1 + $0xc] sm:$0xff] }
  0xc9   :  { %9015 = vmatmul.mubr.msk.bf16.vlgmr.msra.gmra.mrb[4].mxu0 %vm138_vm1, %v10088_v15 }
  0xca   :  { %1028 = vmatpush1.bf16.msra.mxu0 %v1012_v30  ;;  %1059 = vmatprep.mubr.bf16.mxu0 %v12208_v7  ;;  %v3405_v30 = vld [vmem:[%s12197_s1 + $0x2c] sm:$0xff] }
  0xcb   :  { %v1346_v32 = vpop.permute.xlu0 %1345  ;;  %v10124_v41 = vpop.permute.xlu1 %1347  ;;  %1113 = vmatprep.subr.bf16.mxu0 %v1017_v40  ;;  %v9069_v40 = vcombine.high %v3402_v34, %v3405_v30 }
  0xcc   :  { %v1359_v62 = vsel %vm1357_vm7, %v1346_v32, %v10124_v41 }
  0xcf   :  { %v1344_v42 = vpop.permute.xlu0 %1343  ;;  %v10126_v43 = vpop.permute.xlu1 %1341 }
  0xd0   :  { %v1358_v9 = vsel %vm1357_vm7, %v1344_v42, %v1346_v32  ;;  %v3408_v32 = vld [vmem:[%s12197_s1 + $0x4c] sm:$0xff] }
  0xd1   :  { %9023 = vmatmul.mubr.msk.bf16.vlgmr.msra.gmra.mrb[0].mxu0 %vm138_vm1, %v10097_v21  ;;  %v3411_v42 = vld [vmem:[%s12197_s1 + $0x6c] sm:$0xff] }
  0xd2   :  { %1114 = vmatpush1.bf16.msra.mxu0 %v1016_v45  ;;  %1145 = vmatprep.mubr.bf16.mxu0 %v12208_v7 }
  0xd3   :  { %v1354_v48 = vpop.permute.xlu0 %1353  ;;  %v1356_v49 = vpop.permute.xlu1 %1355  ;;  %1200 = vmatprep.subr.bf16.mxu0 %v1186_v46  ;;  %v9733_v46 = vld [vmem:[%s12196_s5] sm:$0xff]   ;;  %s12248_s5 = smov 16  }
  0xd7   :  { %v10136_v51 = vpop.permute.xlu0 %1351  ;;  %v1520_v52 = vpop.permute.xlu1 %1519 }
  0xd9   :  { %9025 = vmatmul.mubr.msk.bf16.vlgmr.msra.gmra.mrb[4].mxu0 %vm138_vm1, %v10097_v21 }
  0xda   :  { %1201 = vmatpush1.bf16.msra.mxu0 %v1185_v50  ;;  %1232 = vmatprep.mubr.bf16.mxu0 %v12208_v7 }
  0xdb   :  { %v10142_v55 = vpop.permute.xlu0 %1521  ;;  %v1518_v56 = vpop.permute.xlu1 %1517  ;;  %1286 = vmatprep.subr.bf16.mxu0 %v1190_v53  ;;  %v3412_v53 = vld [vmem:[%s12197_s1 + $0x74] sm:$0xff] }
  0xdc   :  { %v1532_v16 = vsel %vm1531_vm8, %v1518_v56, %v1520_v52 }
  0xdf   :  { %v1528_v58 = vpop.permute.xlu0 %1527  ;;  %v1530_v59 = vpop.permute.xlu1 %1529 }
  0xe0   :  { %v1537_v19 = vsel %vm1531_vm8, %v1528_v58, %v1530_v59 }
  0xe1   :  { %9026 = vmatmul.mubr.msk.bf16.vlgmr.msra.gmra.mrb[0].mxu0 %vm138_vm1, %v10115_v25 }
  0xe2   :  { %1287 = vmatpush1.bf16.msra.mxu0 %v1189_v60  ;;  %1318 = vmatprep.mubr.bf16.mxu0 %v12208_v7 }
  0xe3   :  { %v10151_v63 = vpop.permute.xlu0 %1525  ;;  %v118_v1 = vpop.permute.xlu1 %117  ;;  %1373 = vmatprep.subr.bf16.mxu0 %v1359_v62 }
  0xe4   :  { %v129_v2 = vsel %vm125_vm0, %v118_v1, %v10032_v44  ;;  %v128_v4 = vsel %vm125_vm0, %v10015_v37, %v118_v1  ;;  %v1363_v44 = vsel %vm1357_vm7, %v1354_v48, %v1356_v49  ;;  %v1536_v20 = vsel %vm1531_vm8, %v10151_v63, %v1528_v58  ;;  %v3403_v49 = vld [vmem:[%s12197_s1 + $0x14] sm:$0xff] }
  0xe5   :  { %185 = vmatprep.subr.bf16.mxu1 %v129_v2 }
  0xe6   :  { %186 = vmatpush1.bf16.msra.mxu1 %v128_v4 }
  0xe7   :  { %v278_v5 = vpop.permute.xlu0 %277  ;;  %v439_v6 = vpop.permute.xlu1 %438 }
  0xe8   :  { %v289_v11 = vsel %vm285_vm2, %v278_v5, %v10050_v54  ;;  %v288_v12 = vsel %vm285_vm2, %v10039_v47, %v278_v5  ;;  %v450_v37 = vsel %vm446_vm3, %v439_v6, %v10067_v0  ;;  %v1533_v47 = vsel %vm1531_vm8, %v1520_v52, %v10142_v55  ;;  %v3409_v52 = vld [vmem:[%s12197_s1 + $0x54] sm:$0xff] }
  0xe9   :  { %8996 = vmatmul.mubr.msk.bf16.vlgmr.msra.gmra.mrb[0].mxu1 %vm138_vm1, %v10017_v38  ;;  %344 = vmatprep.subr.bf16.mxu1 %v289_v11  ;;  %v1362_v38 = vsel %vm1357_vm7, %v10136_v51, %v1354_v48  ;;  %v449_v0 = vsel %vm446_vm3, %v10057_v57, %v439_v6  ;;  %v3404_v57 = vld [vmem:[%s12197_s1 + $0x24] sm:$0xff]  ;;  %v9075_v48 = vcombine.high %v3408_v32, %v3411_v42 }
  0xea   :  { %9028 = vmatmul.mubr.msk.bf16.vlgmr.msra.gmra.mrb[4].mxu0 %vm138_vm1, %v10115_v25  ;;  %345 = vmatpush1.bf16.msra.mxu1 %v288_v12  ;;  %v9077_v59 = vcombine.high %v3409_v52, %v3412_v53  ;;  %v9076_v1 = vcombine.low %v3409_v52, %v3412_v53 }
  0xeb   :  { %1374 = vmatpush1.bf16.msra.mxu0 %v1358_v9  ;;  %505 = vmatprep.subr.bf16.mxu1 %v450_v37  ;;  %v612_v54 = vpop.permute.xlu0 %611  ;;  %v46_v9 = vld [vmem:[%s12199_s2] ss:$8 sm:$0xf] }
  0xec   :  { %1405 = vmatprep.mubr.bf16.mxu0 %v12208_v7  ;;  %1459 = vmatprep.subr.bf16.mxu0 %v1363_v44  ;;  %v623_v13 = vsel %vm619_vm4, %v612_v54, %v10086_v14  ;;  %v10199_v14 = vld [vmem:[%s12194_s3 + $0x4] ss:$8 sps:$4 sm:$0xff]   ;;  %v622_v26 = vsel %vm619_vm4, %v10070_v3, %v612_v54  ;;  %v47_v44 = vld [vmem:[%s12199_s2] ss:$8 sm:$0x30] }
  0xed   :  { %376 = vmatprep.mubr.bf16.mxu1 %v12208_v7  ;;  %v3410_v3 = vld [vmem:[%s12197_s1 + $0x64] sm:$0xff] }
  0xf2   :  { %9029 = vmatmul.mubr.msk.bf16.vlgmr.msra.gmra.mrb[0].mxu0 %vm138_vm1, %v10126_v43 }
  0xf3   :  { %1460 = vmatpush1.bf16.msra.mxu0 %v1362_v38  ;;  %1491 = vmatprep.mubr.bf16.mxu0 %v12208_v7  ;;  %v48_v38 = vor.u32 %v47_v44, %v46_v9 }
  0xf4   :  { %1547 = vmatprep.subr.bf16.mxu0 %v1533_v47 }
  0xf5   :  { %8999 = vmatmul.mubr.msk.bf16.vlgmr.msra.gmra.mrb[0].mxu1 %vm138_vm1, %v9866_v10  ;;  %v3401_v10 = vld [vmem:[%s12197_s1 + $0x4] sm:$0xff] }
  0xf6   :  { %506 = vmatpush1.bf16.msra.mxu1 %v449_v0  ;;  %537 = vmatprep.mubr.bf16.mxu1 %v12208_v7  ;;  %v9067_v22 = vcombine.high %v3401_v10, %v3404_v57  ;;  %v9066_v31 = vcombine.low %v3401_v10, %v3404_v57 }
  0xf7   :  { %678 = vmatprep.subr.bf16.mxu1 %v623_v13 }
  0xf8   :  { %v10211_v28 = vpop.permute.xlu1 %3419 }
  0xfa   :  { %9031 = vmatmul.mubr.msk.bf16.vlgmr.msra.gmra.mrb[4].mxu0 %vm138_vm1, %v10126_v43 }
  0xfb   :  { %1548 = vmatpush1.bf16.msra.mxu0 %v1532_v16  ;;  %1579 = vmatprep.mubr.bf16.mxu0 %v12208_v7 }
  0xfc   :  { %1633 = vmatprep.subr.bf16.mxu0 %v1537_v19  ;;  %v10266_v2 = vpop.permute.xlu0 %3424 }
 0x101   :  { %9002 = vmatmul.mubr.msk.bf16.vlgmr.msra.gmra.mrb[0].mxu1 %vm138_vm1, %v10062_v61  ;;  %v3407_v61 = vld [vmem:[%s12197_s1 + $0x44] sm:$0xff] }
 0x102   :  { %679 = vmatpush1.bf16.msra.mxu1 %v622_v26  ;;  %9033 = vmatmul.mubr.msk.bf16.vlgmr.msra.gmra.mrb[0].mxu0 %vm138_vm1, %v10199_v14  ;;  %v9073_v23 = vcombine.high %v3407_v61, %v3410_v3  ;;  %v9072_v35 = vcombine.low %v3407_v61, %v3410_v3 }
 0x103   :  { %1634 = vmatpush1.bf16.msra.mxu0 %v1536_v20  ;;  %1665 = vmatprep.mubr.bf16.mxu0 %v12208_v7 }
 0x104   :  { %3496 = vmatprep.subr.bf16.mxu0 %v9067_v22  ;;  %710 = vmatprep.mubr.bf16.mxu1 %v12208_v7 }
 0x105   :  { %860 = vmatprep.subr.bf16.mxu1 %v9886_v17  ;;  %v1004_v17 = vpop.permute.xlu1 %1003 }
 0x106   :  { %v1015_v45 = vsel %vm1011_vm5, %v1004_v17, %v10104_v27  ;;  %v9074_v27 = vcombine.low %v3408_v32, %v3411_v42  ;;  %v1014_v60 = vsel %vm1011_vm5, %v10090_v18, %v1004_v17 }
 0x109   :  { %v1177_v56 = vpop.permute.xlu1 %1176 }
 0x10a   :  { %9035 = vmatmul.mubr.msk.bf16.vlgmr.msra.gmra.mrb[4].mxu0 %vm138_vm1, %v10199_v14  ;;  %v1188_v62 = vsel %vm1184_vm6, %v1177_v56, %v10118_v39  ;;  %v1187_v18 = vsel %vm1184_vm6, %v10107_v29, %v1177_v56 }
 0x10b   :  { %3497 = vmatpush1.bf16.msra.mxu0 %v9066_v31  ;;  %3528 = vmatprep.mubr.bf16.mxu0 %v12208_v7 }
 0x10c   :  { %3498 = vmatprep.subr.bf16.mxu0 %v9073_v23 }
 0x10d   :  { %9005 = vmatmul.mubr.msk.bf16.vlgmr.msra.gmra.mrb[0].mxu1 %vm138_vm1, %v10079_v8  ;;  %v9068_v8 = vcombine.low %v3402_v34, %v3405_v30  ;;  %v1524_v4 = vpop.permute.xlu1 %1523 }
 0x10e   :  { %861 = vmatpush1.bf16.msra.mxu1 %v9926_v24  ;;  %892 = vmatprep.mubr.bf16.mxu1 %v12208_v7  ;;  %v3406_v24 = vld [vmem:[%s12197_s1 + $0x34] sm:$0xff]  ;;  %v1534_v29 = vsel %vm1531_vm8, %v10142_v55, %v1524_v4 }
 0x10f   :  { %1070 = vmatprep.subr.bf16.mxu1 %v1015_v45  ;;  %3499 = vmatpush1.bf16.msra.mxu0 %v9072_v35  ;;  %v9071_v50 = vcombine.high %v3403_v49, %v3406_v24  ;;  %v9070_v58 = vcombine.low %v3403_v49, %v3406_v24  ;;  %v10356_v49 = vld [vmem:[%s12198_s6] ss:$8 sps:$4 sm:$0xff]  }
 0x110   :  { %3539 = vmatprep.subr.bf16.mxu0 %v9069_v40 }
 0x112   :  { %9078 = vmatmul.mubr.msk.bf16.vlgmr.msra.gmra.mrb[8].mxu0 %vm3492_vm9, %v9733_v46 }
 0x113   :  { %3540 = vmatpush1.bf16.msra.mxu0 %v9068_v8  ;;  %3571 = vmatprep.mubr.bf16.mxu0 %v12208_v7 }
 0x114   :  { %3541 = vmatprep.subr.bf16.mxu0 %v9075_v48 }
 0x117   :  { %3542 = vmatpush1.bf16.msra.mxu0 %v9074_v27 }
 0x118   :  { %3582 = vmatprep.subr.bf16.mxu0 %v9071_v50 }
 0x119   :  { %9014 = vmatmul.mubr.msk.bf16.vlgmr.msra.gmra.mrb[0].mxu1 %vm138_vm1, %v10088_v15  ;;  %v1350_v15 = vpop.permute.xlu0 %1349 }
 0x11a   :  { %1071 = vmatpush1.bf16.msra.mxu1 %v1014_v60  ;;  %9079 = vmatmul.mubr.msk.bf16.vlgmr.msra.gmra.mrb[12].mxu0 %vm3492_vm9, %v9733_v46  ;;  %v1361_v39 = vsel %vm1357_vm7, %v1350_v15, %v10136_v51  ;;  %v1360_v5 = vsel %vm1357_vm7, %v10124_v41, %v1350_v15 }
 0x11b   :  { %1243 = vmatprep.subr.bf16.mxu1 %v1188_v62  ;;  %3583 = vmatpush1.bf16.msra.mxu0 %v9070_v58 }
 0x11c   :  { %3584 = vmatprep.subr.bf16.mxu0 %v9077_v59  ;;  %3614 = vmatprep.mubr.bf16.mxu0 %v12208_v7 }
 0x11d   :  { %1102 = vmatprep.mubr.bf16.mxu1 %v12208_v7 }
 0x11f   :  { %3585 = vmatpush1.bf16.msra.mxu0 %v9076_v1 }
 0x122   :  { %9080 = vmatmul.mubr.msk.bf16.vlgmr.msra.gmra.mrb[16].mxu0 %vm3492_vm9, %v9733_v46 }
 0x123   :  { %3733 = vmatprep.mubr.bf16.mxu0 %v12208_v7 }
 0x125   :  { %9024 = vmatmul.mubr.msk.bf16.vlgmr.msra.gmra.mrb[0].mxu1 %vm138_vm1, %v10097_v21  ;;  %v1535_v21 = vsel %vm1531_vm8, %v1524_v4, %v10151_v63 }
 0x126   :  { %1244 = vmatpush1.bf16.msra.mxu1 %v1187_v18  ;;  %1275 = vmatprep.mubr.bf16.mxu1 %v12208_v7 }
 0x127   :  { %1416 = vmatprep.subr.bf16.mxu1 %v1361_v39 }
 0x131   :  { %9027 = vmatmul.mubr.msk.bf16.vlgmr.msra.gmra.mrb[0].mxu1 %vm138_vm1, %v10115_v25 }
 0x132   :  { %1417 = vmatpush1.bf16.msra.mxu1 %v1360_v5  ;;  %1448 = vmatprep.mubr.bf16.mxu1 %v12208_v7 }
 0x133   :  { %1590 = vmatprep.subr.bf16.mxu1 %v1535_v21 }
 0x13d   :  { %9030 = vmatmul.mubr.msk.bf16.vlgmr.msra.gmra.mrb[0].mxu1 %vm138_vm1, %v10126_v43  ;;  %v1725_v43 = vlaneseq }
 0x13e   :  { %1591 = vmatpush1.bf16.msra.mxu1 %v1534_v29  ;;  %1622 = vmatprep.mubr.bf16.mxu1 %v12208_v7 }
 0x13f   :  { %v1726_v11 = vshrl.u32 %v1725_v43, 7 }
 0x141   :  { %v10315_v47 = vsub.s32 0, %v1726_v11  ;;  %v10317_v54 = vsub.s32 1, %v1726_v11  ;;  %v10331_v31 = vsub.s32 2, %v1726_v11  ;;  %v10335_v30 = vsub.s32 3, %v1726_v11 }
 0x142   :  { %v10364_v56 = vsub.s32 4, %v1726_v11  ;;  %v10370_v60 = vsub.s32 5, %v1726_v11 }
 0x143   :  { %12236 = vst [vmem:[#allocation7_spill] sm:$0xff] %v10315_v47  ;;  %12237 = vst [vmem:[#allocation8_spill] sm:$0xff] %v10317_v54  ;;  %v10320_v13 = vrot.slane %v48_v38, %v10315_v47  ;;  %v10324_v10 = vrot.slane %v48_v38, %v10317_v54  ;;  %v10342_v32 = vrot.slane %v48_v38, %v10331_v31 }
 0x144   :  { %12238 = vst [vmem:[#allocation9_spill] sm:$0xff] %v10331_v31  ;;  %12239 = vst [vmem:[#allocation10_spill] sm:$0xff] %v10335_v30  ;;  %v10348_v46 = vrot.slane %v48_v38, %v10335_v30  ;;  %v10377_v18 = vrot.slane %v48_v38, %v10364_v56  ;;  %v10383_v5 = vrot.slane %v48_v38, %v10370_v60 }
 0x145   :  { %12242 = vst [vmem:[#allocation13_spill] sm:$0xff] %v10364_v56  ;;  %12243 = vst [vmem:[#allocation14_spill] sm:$0xff] %v10370_v60 }
 0x149   :  { %9034 = vmatmul.mubr.msk.bf16.vlgmr.msra.gmra.mrb[0].mxu1 %vm138_vm1, %v10199_v14 }
 0x14a   :  { %1881 = vmatprep.mubr.bf16.mxu1 %v12208_v7 }
 0x1d5   :  { %v10293_v25 = vpop.f32.mrb[0].mxu0 }
 0x1d6   :  { %v10295_v41 = vpop.f32.mrb[1].mxu0 }
 0x1d7   :  { %v10297_v51 = vpop.f32.mrb[2].mxu0 }
 0x1d8   :  { %v10299_v63 = vpop.f32.mrb[3].mxu0 }
 0x1dd   :  { %v10301_v6 = vpop.f32.mrb[4].mxu0 }
 0x1de   :  { %v10303_v55 = vpop.f32.mrb[5].mxu0 }
 0x1df   :  { %v10308_v12 = vpop.f32.mrb[6].mxu0 }
 0x1e0   :  { %v10313_v37 = vpop.f32.mrb[7].mxu0 }
 0x1e5   :  { %v3530_v0 = vpop.f32.mrb[8].mxu0 }
 0x1e6   :  { %v3531_v16 = vadd.f32 %v3530_v0, %v10211_v28  ;;  %v3532_v19 = vpop.f32.mrb[9].mxu0 }
 0x1e7   :  { %v3533_v57 = vadd.f32 %v3532_v19, %v10211_v28  ;;  %v3534_v14 = vpop.f32.mrb[10].mxu0 }
 0x1e8   :  { %v3535_v20 = vadd.f32 %v3534_v14, %v10266_v2  ;;  %v3536_v22 = vpop.f32.mrb[11].mxu0  ;;  %v3625_v61 = vmul.f32 %v3531_v16, %v10320_v13 }
 0x1e9   :  { %v3537_v26 = vadd.f32 %v3536_v22, %v10266_v2  ;;  %v3626_v23 = vmul.f32 %v3533_v57, %v10324_v10 }
 0x1ea   :  { %v3631_v3 = vmul.f32 %v3535_v20, %v10320_v13 }
 0x1eb   :  { %v3632_v34 = vmul.f32 %v3537_v26, %v10324_v10 }
 0x1ec   :  { %v10337_v17 = vpack.c.bf16 %v3631_v3, %v3625_v61 }
 0x1ed   :  { %v10339_v35 = vpack.c.bf16 %v3632_v34, %v3626_v23  ;;  %v3573_v40 = vpop.f32.mrb[12].mxu0 }
 0x1ee   :  { %12240 = vst [vmem:[#allocation11_spill] sm:$0xff] %v10337_v17  ;;  %v3574_v42 = vadd.f32 %v3573_v40, %v10211_v28  ;;  %v3575_v45 = vpop.f32.mrb[13].mxu0  ;;  %3674 = vrot.lane.b32.xlu0 %v10337_v17, %s9771_s21 }
 0x1ef   :  { %12241 = vst [vmem:[#allocation12_spill] sm:$0xff] %v10339_v35  ;;  %v3576_v8 = vadd.f32 %v3575_v45, %v10211_v28  ;;  %v3577_v48 = vpop.f32.mrb[14].mxu0  ;;  %3676 = vrot.lane.b32.xlu1 %v10339_v35, %s9771_s21 }
 0x1f0   :  { %v3578_v24 = vadd.f32 %v3577_v48, %v10266_v2  ;;  %v3579_v27 = vpop.f32.mrb[15].mxu0  ;;  %v3627_v52 = vmul.f32 %v3574_v42, %v10342_v32 }
 0x1f1   :  { %v3580_v50 = vadd.f32 %v3579_v27, %v10266_v2  ;;  %v3628_v58 = vmul.f32 %v3576_v8, %v10348_v46 }
 0x1f2   :  { %v3633_v53 = vmul.f32 %v3578_v24, %v10342_v32  ;;  %3672 = vrot.lane.b32.xlu0 %v12208_v7, %s9771_s21 }
 0x1f3   :  { %v3634_v59 = vmul.f32 %v3580_v50, %v10348_v46  ;;  %3663 = vrot.lane.b32.xlu1 %v10356_v49, %s9772_s16 }
 0x1f4   :  { %v10372_v62 = vpack.c.bf16 %v3633_v53, %v3627_v52 }
 0x1f5   :  { %v10374_v1 = vpack.c.bf16 %v3634_v59, %v3628_v58  ;;  %v3616_v15 = vpop.f32.mrb[16].mxu0 }
 0x1f6   :  { %12244 = vst [vmem:[#allocation15_spill] sm:$0xff] %v10372_v62  ;;  %v3617_v39 = vadd.f32 %v3616_v15, %v10211_v28  ;;  %v3618_v4 = vpop.f32.mrb[17].mxu0  ;;  %3678 = vrot.lane.b32.xlu0 %v10372_v62, %s9771_s21 }
 0x1f7   :  { %12245 = vst [vmem:[#allocation16_spill] sm:$0xff] %v10374_v1  ;;  %v3619_v21 = vadd.f32 %v3618_v4, %v10211_v28  ;;  %v3620_v29 = vpop.f32.mrb[18].mxu0  ;;  %3680 = vrot.lane.b32.xlu1 %v10374_v1, %s9771_s21 }
 0x1f8   :  { %v3621_v43 = vadd.f32 %v3620_v29, %v10266_v2  ;;  %v3622_v9 = vpop.f32.mrb[19].mxu0  ;;  %v3629_v44 = vmul.f32 %v3617_v39, %v10377_v18 }
 0x1f9   :  { %v3623_v11 = vadd.f32 %v3622_v9, %v10266_v2  ;;  %v3630_v16 = vmul.f32 %v3619_v21, %v10383_v5 }
 0x1fa   :  { %v3635_v0 = vmul.f32 %v3621_v43, %v10377_v18 }
 0x1fb   :  { %v3636_v38 = vmul.f32 %v3623_v11, %v10383_v5 }
 0x1fc   :  { %v10394_v19 = vpack.c.bf16 %v3635_v0, %v3629_v44 }
 0x1fd   :  { %v10396_v28 = vpack.c.bf16 %v3636_v38, %v3630_v16 }
 0x1fe   :  { %12246 = vst [vmem:[#allocation17_spill] sm:$0xff] %v10394_v19  ;;  %3682 = vrot.lane.b32.xlu0 %v10394_v19, %s9771_s21 }
 0x1ff   :  { %12247 = vst [vmem:[#allocation18_spill] sm:$0xff] %v10396_v28  ;;  %3684 = vrot.lane.b32.xlu1 %v10396_v28, %s9771_s21 }
 0x202   :  { %3832 = vrot.lane.b32.xlu0 %v10337_v17, %s9773_s17 }
 0x203   :  { %3834 = vrot.lane.b32.xlu1 %v10339_v35, %s9773_s17 }
 0x206   :  { %3830 = vrot.lane.b32.xlu0 %v12208_v7, %s9773_s17 }
 0x207   :  { %3836 = vrot.lane.b32.xlu1 %v10372_v62, %s9773_s17 }
 0x20a   :  { %3838 = vrot.lane.b32.xlu0 %v10374_v1, %s9773_s17 }
 0x20b   :  { %3840 = vrot.lane.b32.xlu1 %v10394_v19, %s9773_s17 }
 0x20e   :  { %3842 = vrot.lane.b32.xlu0 %v10396_v28, %s9773_s17 }
 0x20f   :  { %3992 = vrot.lane.b32.xlu1 %v10337_v17, %s9774_s18 }
 0x212   :  { %3994 = vrot.lane.b32.xlu0 %v10339_v35, %s9774_s18 }
 0x213   :  { %3990 = vrot.lane.b32.xlu1 %v12208_v7, %s9774_s18 }
 0x216   :  { %3988 = vrot.lane.b32.xlu0 %v10356_v49, %s9775_s19 }
 0x217   :  { %3996 = vrot.lane.b32.xlu1 %v10372_v62, %s9774_s18 }
 0x21a   :  { %3998 = vrot.lane.b32.xlu0 %v10374_v1, %s9774_s18 }
 0x21b   :  { %4000 = vrot.lane.b32.xlu1 %v10394_v19, %s9774_s18 }
 0x21c   :  { %v10430_v2 = vpop.f32.mrb[0].mxu1 }
 0x21d   :  { %v10432_v57 = vpop.f32.mrb[1].mxu1 }
 0x21e   :  { %4002 = vrot.lane.b32.xlu0 %v10396_v28, %s9774_s18  ;;  %v10436_v14 = vpop.f32.mrb[2].mxu1 }
 0x21f   :  { %4164 = vrot.lane.b32.xlu1 %v10337_v17, %s9776_s20  ;;  %v10440_v20 = vpop.f32.mrb[3].mxu1 }
 0x222   :  { %4166 = vrot.lane.b32.xlu0 %v10339_v35, %s9776_s20 }
 0x223   :  { %4162 = vrot.lane.b32.xlu1 %v12208_v7, %s9776_s20 }
 0x226   :  { %4160 = vrot.lane.b32.xlu0 %v10356_v49, %s9777_s22 }
 0x227   :  { %4168 = vrot.lane.b32.xlu1 %v10372_v62, %s9776_s20 }
 0x22a   :  { %4170 = vrot.lane.b32.xlu0 %v10374_v1, %s9776_s20 }
 0x22b   :  { %4172 = vrot.lane.b32.xlu1 %v10394_v19, %s9776_s20 }
 0x22e   :  { %4174 = vrot.lane.b32.xlu0 %v10396_v28, %s9776_s20 }
 0x22f   :  { %4332 = vrot.lane.b32.xlu1 %v10356_v49, %s9778_s27 }
 0x232   :  { %4496 = vrot.lane.b32.xlu0 %v10339_v35, %s9779_s28 }
 0x233   :  { %4498 = vrot.lane.b32.xlu1 %v10372_v62, %s9779_s28 }
 0x236   :  { %4494 = vrot.lane.b32.xlu0 %v10337_v17, %s9779_s28 }
 0x237   :  { %4485 = vrot.lane.b32.xlu1 %v10356_v49, %s9780_s24 }
 0x23a   :  { %4500 = vrot.lane.b32.xlu0 %v10374_v1, %s9779_s28 }
 0x23b   :  { %4502 = vrot.lane.b32.xlu1 %v10394_v19, %s9779_s28 }
 0x23e   :  { %4504 = vrot.lane.b32.xlu0 %v10396_v28, %s9779_s28 }
 0x23f   :  { %4506 = vrot.lane.b32.xlu1 %v12208_v7, %s9779_s28 }
 0x242   :  { %4668 = vrot.lane.b32.xlu0 %v10339_v35, %s9781_s25 }
 0x243   :  { %4670 = vrot.lane.b32.xlu1 %v10372_v62, %s9781_s25 }
 0x246   :  { %4666 = vrot.lane.b32.xlu0 %v10337_v17, %s9781_s25 }
 0x247   :  { %4664 = vrot.lane.b32.xlu1 %v10356_v49, %s9782_s26 }
 0x24a   :  { %4672 = vrot.lane.b32.xlu0 %v10374_v1, %s9781_s25 }
 0x24b   :  { %4674 = vrot.lane.b32.xlu1 %v10394_v19, %s9781_s25 }
 0x24e   :  { %4676 = vrot.lane.b32.xlu0 %v10396_v28, %s9781_s25 }
 0x24f   :  { %4678 = vrot.lane.b32.xlu1 %v12208_v7, %s9781_s25 }
 0x252   :  { %4840 = vrot.lane.b32.xlu0 %v10339_v35, %s9783_s29 }
 0x253   :  { %4842 = vrot.lane.b32.xlu1 %v10372_v62, %s9783_s29 }
 0x256   :  { %4838 = vrot.lane.b32.xlu0 %v10337_v17, %s9783_s29 }
 0x257   :  { %4836 = vrot.lane.b32.xlu1 %v10356_v49, %s12248_s5 }
 0x25a   :  { %4844 = vrot.lane.b32.xlu0 %v10374_v1, %s9783_s29 }
 0x25b   :  { %4846 = vrot.lane.b32.xlu1 %v10394_v19, %s9783_s29 }
 0x25e   :  { %4848 = vrot.lane.b32.xlu0 %v10396_v28, %s9783_s29 }
 0x25f   :  { %4850 = vrot.lane.b32.xlu1 %v12208_v7, %s9783_s29 }
 0x260   :  { %v3675_v22 = vpop.permute.xlu0 %3674 }
 0x261   :  { %v3677_v26 = vpop.permute.xlu1 %3676 }
 0x262   :  { %1692 = vperm.xlu0 %9581, %v10005_v33   ;;  %v3687_v61 = vsel %vm125_vm0, %v3675_v22, %v3677_v26 }
 0x263   :  { %1697 = vperm.xlu1 %9582, %v10013_v36   ;;  %3701 = vmatprep.subr.bf16.mxu0 %v3687_v61 }
 0x264   :  { %v3673_v3 = vpop.permute.xlu0 %3672 }
 0x265   :  { %v3686_v23 = vsel %vm125_vm0, %v3673_v3, %v3675_v22  ;;  %v3664_v34 = vpop.permute.xlu1 %3663 }
 0x266   :  { %5015 = vrot.lane.b32.xlu0 %v10372_v62, %s12249_s23  ;;  %3702 = vmatpush1.bf16.msra.mxu0 %v3686_v23 }
 0x267   :  { %5013 = vrot.lane.b32.xlu1 %v10339_v35, %s12249_s23 }
 0x268   :  { %v3679_v40 = vpop.permute.xlu0 %3678 }
 0x269   :  { %9082 = vmatmul.mubr.msk.bf16.vlgmr.msra.gmra.mrb[20].mxu0 %vm138_vm1, %v3664_v34  ;;  %v3681_v33 = vpop.permute.xlu1 %3680  ;;  %v3688_v42 = vsel %vm125_vm0, %v3677_v26, %v3679_v40 }
 0x26a   :  { %5017 = vrot.lane.b32.xlu0 %v10374_v1, %s12249_s23  ;;  %v3689_v36 = vsel %vm125_vm0, %v3679_v40, %v3681_v33  ;;  %3776 = vmatprep.mubr.bf16.mxu0 %v12208_v7 }
 0x26b   :  { %5011 = vrot.lane.b32.xlu1 %v10337_v17, %s12249_s23  ;;  %3744 = vmatprep.subr.bf16.mxu0 %v3689_v36 }
 0x26c   :  { %3745 = vmatpush1.bf16.msra.mxu0 %v3688_v42 }
 0x26e   :  { %5021 = vrot.lane.b32.xlu0 %v10396_v28, %s12249_s23 }
 0x26f   :  { %5019 = vrot.lane.b32.xlu1 %v10394_v19, %s12249_s23 }
 0x270   :  { %v3683_v45 = vpop.permute.xlu0 %3682 }
 0x271   :  { %9083 = vmatmul.mubr.msk.bf16.vlgmr.msra.gmra.mrb[24].mxu0 %vm138_vm1, %v3664_v34  ;;  %v3685_v8 = vpop.permute.xlu1 %3684  ;;  %v3690_v24 = vsel %vm125_vm0, %v3681_v33, %v3683_v45 }
 0x272   :  { %v3691_v48 = vsel %vm125_vm0, %v3683_v45, %v3685_v8  ;;  %3819 = vmatprep.mubr.bf16.mxu0 %v12208_v7 }
 0x273   :  { %3787 = vmatprep.subr.bf16.mxu0 %v3691_v48  ;;  %5023 = vrot.lane.b32.xlu1 %v12208_v7, %s12249_s23 }
 0x274   :  { %v3833_v27 = vpop.permute.xlu0 %3832  ;;  %3788 = vmatpush1.bf16.msra.mxu0 %v3690_v24 }
 0x275   :  { %v3835_v50 = vpop.permute.xlu1 %3834 }
 0x276   :  { %v3845_v52 = vsel %vm285_vm2, %v3833_v27, %v3835_v50 }
 0x277   :  { %3859 = vmatprep.subr.bf16.mxu0 %v3845_v52 }
 0x278   :  { %v3831_v53 = vpop.permute.xlu0 %3830 }
 0x279   :  { %v3844_v58 = vsel %vm285_vm2, %v3831_v53, %v3833_v27  ;;  %9084 = vmatmul.mubr.msk.bf16.vlgmr.msra.gmra.mrb[28].mxu0 %vm138_vm1, %v3664_v34  ;;  %v3837_v59 = vpop.permute.xlu1 %3836 }
 0x27a   :  { %3860 = vmatpush1.bf16.msra.mxu0 %v3844_v58  ;;  %3891 = vmatprep.mubr.bf16.mxu0 %v12208_v7  ;;  %v3846_v29 = vsel %vm285_vm2, %v3835_v50, %v3837_v59 }
 0x27c   :  { %v3839_v15 = vpop.permute.xlu0 %3838 }
 0x27d   :  { %v3841_v39 = vpop.permute.xlu1 %3840  ;;  %v3847_v4 = vsel %vm285_vm2, %v3837_v59, %v3839_v15 }
 0x27e   :  { %3902 = vmatprep.subr.bf16.mxu0 %v3847_v4  ;;  %v3848_v16 = vsel %vm285_vm2, %v3839_v15, %v3841_v39 }
 0x280   :  { %v3843_v21 = vpop.permute.xlu0 %3842 }
 0x281   :  { %9085 = vmatmul.mubr.msk.bf16.vlgmr.msra.gmra.mrb[20].mxu0 %vm138_vm1, %v10356_v49  ;;  %v3993_v43 = vpop.permute.xlu1 %3992  ;;  %v3849_v9 = vsel %vm285_vm2, %v3841_v39, %v3843_v21 }
 0x282   :  { %3903 = vmatpush1.bf16.msra.mxu0 %v3846_v29  ;;  %3934 = vmatprep.mubr.bf16.mxu0 %v12208_v7 }
 0x283   :  { %3945 = vmatprep.subr.bf16.mxu0 %v3849_v9 }
 0x284   :  { %v3995_v11 = vpop.permute.xlu0 %3994 }
 0x285   :  { %v3991_v44 = vpop.permute.xlu1 %3990  ;;  %v4005_v22 = vsel %vm446_vm3, %v3993_v43, %v3995_v11 }
 0x286   :  { %v4004_v23 = vsel %vm446_vm3, %v3991_v44, %v3993_v43 }
 0x288   :  { %v3989_v0 = vpop.permute.xlu0 %3988 }
 0x289   :  { %9086 = vmatmul.mubr.msk.bf16.vlgmr.msra.gmra.mrb[24].mxu0 %vm138_vm1, %v10356_v49  ;;  %v3997_v38 = vpop.permute.xlu1 %3996 }
 0x28a   :  { %3946 = vmatpush1.bf16.msra.mxu0 %v3848_v16  ;;  %3977 = vmatprep.mubr.bf16.mxu0 %v12208_v7  ;;  %v4006_v45 = vsel %vm446_vm3, %v3995_v11, %v3997_v38 }
 0x28b   :  { %4019 = vmatprep.subr.bf16.mxu0 %v4005_v22 }
 0x28c   :  { %v3999_v26 = vpop.permute.xlu0 %3998 }
 0x28d   :  { %v4001_v61 = vpop.permute.xlu1 %4000  ;;  %v4007_v40 = vsel %vm446_vm3, %v3997_v38, %v3999_v26 }
 0x28e   :  { %v4008_v50 = vsel %vm446_vm3, %v3999_v26, %v4001_v61 }
 0x290   :  { %v4003_v3 = vpop.permute.xlu0 %4002 }
 0x291   :  { %9087 = vmatmul.mubr.msk.bf16.vlgmr.msra.gmra.mrb[28].mxu0 %vm138_vm1, %v10356_v49  ;;  %v4165_v34 = vpop.permute.xlu1 %4164  ;;  %v4009_v48 = vsel %vm446_vm3, %v4001_v61, %v4003_v3  ;;  %v9786_v3 = vmov 3  }
 0x292   :  { %4020 = vmatpush1.bf16.msra.mxu0 %v4004_v23  ;;  %4051 = vmatprep.mubr.bf16.mxu0 %v12208_v7 }
 0x293   :  { %4062 = vmatprep.subr.bf16.mxu0 %v4007_v40  ;;  %9584 = vset.pattern.permute.xlu1 %v9786_v3 }
 0x294   :  { %v4167_v33 = vpop.permute.xlu0 %4166  ;;  %9583 = vset.pattern.permute.xlu0 %v9786_v3 }
 0x295   :  { %v4163_v36 = vpop.permute.xlu1 %4162  ;;  %v4177_v53 = vsel %vm619_vm4, %v4165_v34, %v4167_v33 }
 0x296   :  { %v4176_v39 = vsel %vm619_vm4, %v4163_v36, %v4165_v34 }
 0x298   :  { %v4161_v42 = vpop.permute.xlu0 %4160 }
 0x299   :  { %9088 = vmatmul.mubr.msk.bf16.vlgmr.msra.gmra.mrb[20].mxu0 %vm138_vm1, %v3989_v0  ;;  %v4169_v8 = vpop.permute.xlu1 %4168 }
 0x29a   :  { %4063 = vmatpush1.bf16.msra.mxu0 %v4006_v45  ;;  %4094 = vmatprep.mubr.bf16.mxu0 %v12208_v7  ;;  %v4178_v11 = vsel %vm619_vm4, %v4167_v33, %v4169_v8 }
 0x29b   :  { %4105 = vmatprep.subr.bf16.mxu0 %v4009_v48 }
 0x29c   :  { %v4171_v49 = vpop.permute.xlu0 %4170 }
 0x29d   :  { %v4173_v24 = vpop.permute.xlu1 %4172  ;;  %v4179_v21 = vsel %vm619_vm4, %v4169_v8, %v4171_v49 }
 0x29e   :  { %v4180_v26 = vsel %vm619_vm4, %v4171_v49, %v4173_v24 }
 0x2a0   :  { %v4175_v27 = vpop.permute.xlu0 %4174 }
 0x2a1   :  { %9089 = vmatmul.mubr.msk.bf16.vlgmr.msra.gmra.mrb[24].mxu0 %vm138_vm1, %v3989_v0  ;;  %v4333_v52 = vpop.permute.xlu1 %4332 }
 0x2a2   :  { %4106 = vmatpush1.bf16.msra.mxu0 %v4008_v50  ;;  %4137 = vmatprep.mubr.bf16.mxu0 %v12208_v7 }
 0x2a3   :  { %4191 = vmatprep.subr.bf16.mxu0 %v4177_v53 }
 0x2a4   :  { %v4497_v58 = vpop.permute.xlu0 %4496 }
 0x2a5   :  { %v10560_v59 = vpop.permute.xlu1 %4498 }
 0x2a6   :  { %v4509_v48 = vsel %vm1011_vm5, %v4497_v58, %v10560_v59 }
 0x2a8   :  { %v4495_v15 = vpop.permute.xlu0 %4494 }
 0x2a9   :  { %9090 = vmatmul.mubr.msk.bf16.vlgmr.msra.gmra.mrb[28].mxu0 %vm138_vm1, %v3989_v0  ;;  %v10564_v4 = vpop.permute.xlu1 %4485  ;;  %v4181_v0 = vsel %vm619_vm4, %v4173_v24, %v4175_v27  ;;  %v4508_v27 = vsel %vm1011_vm5, %v4495_v15, %v4497_v58 }
 0x2aa   :  { %4192 = vmatpush1.bf16.msra.mxu0 %v4176_v39  ;;  %4223 = vmatprep.mubr.bf16.mxu0 %v12208_v7 }
 0x2ab   :  { %4234 = vmatprep.subr.bf16.mxu0 %v4179_v21 }
 0x2ac   :  { %v4501_v29 = vpop.permute.xlu0 %4500 }
 0x2ad   :  { %v10568_v43 = vpop.permute.xlu1 %4502  ;;  %v4510_v58 = vsel %vm1011_vm5, %v10560_v59, %v4501_v29 }
 0x2ae   :  { %v4511_v50 = vsel %vm1011_vm5, %v4501_v29, %v10568_v43 }
 0x2b0   :  { %v10570_v9 = vpop.permute.xlu0 %4504 }
 0x2b1   :  { %9091 = vmatmul.mubr.msk.bf16.vlgmr.msra.gmra.mrb[20].mxu0 %vm138_vm1, %v4161_v42  ;;  %v4507_v44 = vpop.permute.xlu1 %4506 }
 0x2b2   :  { %4235 = vmatpush1.bf16.msra.mxu0 %v4178_v11  ;;  %4266 = vmatprep.mubr.bf16.mxu0 %v12208_v7 }
 0x2b3   :  { %4277 = vmatprep.subr.bf16.mxu0 %v4181_v0 }
 0x2b4   :  { %v10576_v16 = vpop.permute.xlu0 %4668 }
 0x2b5   :  { %v10578_v38 = vpop.permute.xlu1 %4670 }
 0x2b8   :  { %v10580_v22 = vpop.permute.xlu0 %4666 }
 0x2b9   :  { %9092 = vmatmul.mubr.msk.bf16.vlgmr.msra.gmra.mrb[24].mxu0 %vm138_vm1, %v4161_v42  ;;  %v10584_v61 = vpop.permute.xlu1 %4664 }
 0x2ba   :  { %4278 = vmatpush1.bf16.msra.mxu0 %v4180_v26  ;;  %4309 = vmatprep.mubr.bf16.mxu0 %v12208_v7 }
 0x2bb   :  { %4337 = vmatprep.subr.bf16.mxu0 %v10339_v35 }
 0x2bc   :  { %v10588_v23 = vpop.permute.xlu0 %4672 }
 0x2bd   :  { %v10590_v34 = vpop.permute.xlu1 %4674 }
 0x2c0   :  { %v10596_v40 = vpop.permute.xlu0 %4676 }
 0x2c1   :  { %9093 = vmatmul.mubr.msk.bf16.vlgmr.msra.gmra.mrb[28].mxu0 %vm138_vm1, %v4161_v42  ;;  %v10598_v33 = vpop.permute.xlu1 %4678 }
 0x2c2   :  { %4338 = vmatpush1.bf16.msra.mxu0 %v10337_v17  ;;  %4369 = vmatprep.mubr.bf16.mxu0 %v12208_v7 }
 0x2c3   :  { %4380 = vmatprep.subr.bf16.mxu0 %v10374_v1 }
 0x2c4   :  { %v10603_v36 = vpop.permute.xlu0 %4840 }
 0x2c5   :  { %v10606_v42 = vpop.permute.xlu1 %4842 }
 0x2c8   :  { %v10608_v45 = vpop.permute.xlu0 %4838 }
 0x2c9   :  { %9094 = vmatmul.mubr.msk.bf16.vlgmr.msra.gmra.mrb[20].mxu0 %vm138_vm1, %v4333_v52  ;;  %v10611_v8 = vpop.permute.xlu1 %4836 }
 0x2ca   :  { %4381 = vmatpush1.bf16.msra.mxu0 %v10372_v62  ;;  %4412 = vmatprep.mubr.bf16.mxu0 %v12208_v7 }
 0x2cb   :  { %4423 = vmatprep.subr.bf16.mxu0 %v10396_v28 }
 0x2cc   :  { %v10617_v49 = vpop.permute.xlu0 %4844 }
 0x2cd   :  { %v10619_v24 = vpop.permute.xlu1 %4846 }
 0x2d0   :  { %v10626_v53 = vpop.permute.xlu0 %4848 }
 0x2d1   :  { %9095 = vmatmul.mubr.msk.bf16.vlgmr.msra.gmra.mrb[24].mxu0 %vm138_vm1, %v4333_v52  ;;  %v10628_v39 = vpop.permute.xlu1 %4850 }
 0x2d2   :  { %4424 = vmatpush1.bf16.msra.mxu0 %v10394_v19  ;;  %4455 = vmatprep.mubr.bf16.mxu0 %v12208_v7 }
 0x2d3   :  { %4523 = vmatprep.subr.bf16.mxu0 %v4509_v48 }
 0x2d9   :  { %9096 = vmatmul.mubr.msk.bf16.vlgmr.msra.gmra.mrb[28].mxu0 %vm138_vm1, %v4333_v52  ;;  %v4513_v52 = vsel %vm1011_vm5, %v10570_v9, %v4507_v44 }
 0x2da   :  { %4524 = vmatpush1.bf16.msra.mxu0 %v4508_v27  ;;  %4555 = vmatprep.mubr.bf16.mxu0 %v12208_v7 }
 0x2db   :  { %4566 = vmatprep.subr.bf16.mxu0 %v4511_v50 }
 0x2e1   :  { %v1693_v21 = vpop.permute.xlu0 %1692  ;;  %9097 = vmatmul.mubr.msk.bf16.vlgmr.msra.gmra.mrb[20].mxu0 %vm138_vm1, %v10564_v4 }
 0x2e2   :  { %v1700_v15 = vadd.f32 %v1693_v21, %v10293_v25  ;;  %v1701_v11 = vadd.f32 %v1693_v21, %v10295_v41  ;;  %v1702_v0 = vadd.f32 %v1693_v21, %v10430_v2  ;;  %v1703_v26 = vadd.f32 %v1693_v21, %v10432_v57  ;;  %4567 = vmatpush1.bf16.msra.mxu0 %v4510_v58  ;;  %v1698_v3 = vpop.permute.xlu1 %1697 }
 0x2e3   :  { %v1704_v48 = vadd.f32 %v1693_v21, %v10301_v6  ;;  %v1705_v27 = vadd.f32 %v1693_v21, %v10303_v55  ;;  %4609 = vmatprep.subr.bf16.mxu0 %v4513_v52  ;;  %v1706_v59 = vadd.f32 %v1698_v3, %v10297_v51  ;;  %v1707_v29 = vadd.f32 %v1698_v3, %v10299_v63 }
 0x2e4   :  { %v1712_v44 = vmax.f32 %v1700_v15, 0.0  ;;  %v1713_v50 = vmax.f32 %v1701_v11, 0.0  ;;  %v1714_v25 = vmax.f32 %v1702_v0, 0.0  ;;  %v1715_v7 = vmax.f32 %v1703_v26, 0.0 }
 0x2e5   :  { %v12250_v41 = vmov 0   ;;  %v1716_v2 = vmax.f32 %v1704_v48, 0.0  ;;  %v1717_v60 = vmax.f32 %v1705_v27, 0.0  ;;  %v1708_v57 = vadd.f32 %v1698_v3, %v10436_v14 }
 0x2e6   :  { %4598 = vmatprep.mubr.bf16.mxu0 %v12250_v41  ;;  %v1709_v58 = vadd.f32 %v1698_v3, %v10440_v20  ;;  %v1755_v6 = vmul.f32 %v10320_v13, %v1712_v44  ;;  %v1756_v55 = vmul.f32 %v10324_v10, %v1713_v50  ;;  %v4512_v51 = vsel %vm1011_vm5, %v10568_v43, %v10570_v9 }
 0x2e7   :  { %v4681_v63 = vsel %vm1184_vm6, %v10576_v16, %v10578_v38  ;;  %v1757_v21 = vmul.f32 %v10342_v32, %v1714_v25  ;;  %v1758_v52 = vmul.f32 %v10348_v46, %v1715_v7  ;;  %v1710_v14 = vadd.f32 %v1698_v3, %v10308_v12 }
 0x2e8   :  { %v1711_v20 = vadd.f32 %v1698_v3, %v10313_v37  ;;  %v1718_v15 = vmax.f32 %v1706_v59, 0.0  ;;  %v1719_v11 = vmax.f32 %v1707_v29, 0.0  ;;  %v1720_v0 = vmax.f32 %v1708_v57, 0.0 }
 0x2e9   :  { %v1721_v26 = vmax.f32 %v1709_v58, 0.0  ;;  %v1759_v48 = vmul.f32 %v10377_v18, %v1716_v2  ;;  %v1760_v43 = vmul.f32 %v10383_v5, %v1717_v60  ;;  %v1722_v9 = vmax.f32 %v1710_v14, 0.0  ;;  %9098 = vmatmul.mubr.msk.bf16.vlgmr.msra.gmra.mrb[24].mxu0 %vm138_vm1, %v10564_v4  ;;  %v10689_v58 = vld [vmem:[%s12200_s4] ss:$8 sps:$4 sm:$0xff]  }
 0x2ea   :  { %v1723_v27 = vmax.f32 %v1711_v20, 0.0  ;;  %v1761_v44 = vmul.f32 %v10320_v13, %v1718_v15  ;;  %v1762_v7 = vmul.f32 %v10324_v10, %v1719_v11  ;;  %v1763_v12 = vmul.f32 %v10342_v32, %v1720_v0  ;;  %4610 = vmatpush1.bf16.msra.mxu0 %v4512_v51  ;;  %4641 = vmatprep.mubr.bf16.mxu0 %v12250_v41  ;;  %v10838_v15 = vld [vmem:[%s12195_s9 + $0x8] sm:$0xff]  ;;  %v10843_v11 = vld [vmem:[%s12195_s9] sm:$0xff] }
 0x2eb   :  { %v1764_v37 = vmul.f32 %v10348_v46, %v1721_v26  ;;  %v1765_v3 = vmul.f32 %v10377_v18, %v1722_v9  ;;  %4695 = vmatprep.subr.bf16.mxu0 %v4681_v63 }
 0x2ec   :  { %v1766_v59 = vmul.f32 %v10383_v5, %v1723_v27  ;;  %v10670_v60 = vpack.c.bf16 %v1761_v44, %v1755_v6  ;;  %v10672_v29 = vpack.c.bf16 %v1762_v7, %v1756_v55  ;;  %v10674_v50 = vpack.c.bf16 %v1763_v12, %v1757_v21 }
 0x2ed   :  { %v10676_v25 = vpack.c.bf16 %v1764_v37, %v1758_v52  ;;  %v10678_v2 = vpack.c.bf16 %v1765_v3, %v1759_v48  ;;  %v4680_v6 = vsel %vm1184_vm6, %v10580_v22, %v10576_v16  ;;  %v4683_v55 = vsel %vm1184_vm6, %v10588_v23, %v10590_v34 }
 0x2ee   :  { %v10680_v57 = vpack.c.bf16 %v1766_v59, %v1760_v43  ;;  %1824 = vrot.lane.b32.xlu1 %v10672_v29, %s9771_s21  ;;  %1822 = vrot.lane.b32.xlu0 %v10670_v60, %s9771_s21  ;;  %v4685_v16 = vsel %vm1184_vm6, %v10596_v40, %v10598_v33  ;;  %v4853_v22 = vsel %vm1357_vm7, %v10603_v36, %v10606_v42  ;;  %v5014_v33 = vpop.permute.xlu1 %5013 }
 0x2f1   :  { %9099 = vmatmul.mubr.msk.bf16.vlgmr.msra.gmra.mrb[28].mxu0 %vm138_vm1, %v10564_v4  ;;  %v4682_v4 = vsel %vm1184_vm6, %v10578_v38, %v10588_v23  ;;  %v4684_v38 = vsel %vm1184_vm6, %v10590_v34, %v10596_v40  ;;  %v4852_v23 = vsel %vm1357_vm7, %v10608_v45, %v10603_v36  ;;  %v4855_v34 = vsel %vm1357_vm7, %v10617_v49, %v10619_v24  ;;  %v5016_v36 = vpop.permute.xlu0 %5015 }
 0x2f2   :  { %1811 = vrot.lane.b32.xlu1 %v10689_v58, %s9772_s16  ;;  %1820 = vrot.lane.b32.xlu0 %v12250_v41, %s9771_s21  ;;  %v4857_v40 = vsel %vm1357_vm7, %v10626_v53, %v10628_v39  ;;  %v4856_v45 = vsel %vm1357_vm7, %v10619_v24, %v10626_v53  ;;  %v9738_v53 = vld [vmem:[%s12198_s6 + $0x4] ss:$8 sps:$4 sm:$0xff]  }
 0x2f3   :  { %4696 = vmatpush1.bf16.msra.mxu0 %v4680_v6  ;;  %4727 = vmatprep.mubr.bf16.mxu0 %v12250_v41 }
 0x2f4   :  { %4738 = vmatprep.subr.bf16.mxu0 %v4683_v55 }
 0x2f5   :  { %v5018_v51 = vpop.permute.xlu0 %5017 }
 0x2f6   :  { %1828 = vrot.lane.b32.xlu1 %v10676_v25, %s9771_s21  ;;  %1826 = vrot.lane.b32.xlu0 %v10674_v50, %s9771_s21  ;;  %v5027_v52 = vsel %vm1531_vm8, %v5016_v36, %v5018_v51 }
 0x2f9   :  { %9100 = vmatmul.mubr.msk.bf16.vlgmr.msra.gmra.mrb[20].mxu0 %vm138_vm1, %v10584_v61  ;;  %v5022_v21 = vpop.permute.xlu0 %5021 }
 0x2fa   :  { %1832 = vrot.lane.b32.xlu1 %v10680_v57, %s9771_s21  ;;  %1830 = vrot.lane.b32.xlu0 %v10678_v2, %s9771_s21 }
 0x2fb   :  { %4739 = vmatpush1.bf16.msra.mxu0 %v4682_v4  ;;  %4770 = vmatprep.mubr.bf16.mxu0 %v12250_v41 }
 0x2fc   :  { %4781 = vmatprep.subr.bf16.mxu0 %v4685_v16 }
 0x2fe   :  { %1982 = vrot.lane.b32.xlu1 %v10672_v29, %s9773_s17  ;;  %1980 = vrot.lane.b32.xlu0 %v10670_v60, %s9773_s17 }
 0x301   :  { %9101 = vmatmul.mubr.msk.bf16.vlgmr.msra.gmra.mrb[24].mxu0 %vm138_vm1, %v10584_v61 }
 0x302   :  { %1984 = vrot.lane.b32.xlu1 %v10674_v50, %s9773_s17  ;;  %1978 = vrot.lane.b32.xlu0 %v12250_v41, %s9773_s17 }
 0x303   :  { %4782 = vmatpush1.bf16.msra.mxu0 %v4684_v38  ;;  %4813 = vmatprep.mubr.bf16.mxu0 %v12250_v41 }
 0x304   :  { %4867 = vmatprep.subr.bf16.mxu0 %v4853_v22 }
 0x306   :  { %1988 = vrot.lane.b32.xlu1 %v10678_v2, %s9773_s17  ;;  %1986 = vrot.lane.b32.xlu0 %v10676_v25, %s9773_s17 }
 0x309   :  { %9102 = vmatmul.mubr.msk.bf16.vlgmr.msra.gmra.mrb[28].mxu0 %vm138_vm1, %v10584_v61  ;;  %v4854_v61 = vsel %vm1357_vm7, %v10606_v42, %v10617_v49  ;;  %v5012_v42 = vpop.permute.xlu1 %5011  ;;  %v5026_v49 = vsel %vm1531_vm8, %v5014_v33, %v5016_v36 }
 0x30a   :  { %2140 = vrot.lane.b32.xlu1 %v10670_v60, %s9774_s18  ;;  %1990 = vrot.lane.b32.xlu0 %v10680_v57, %s9773_s17  ;;  %v5025_v63 = vsel %vm1531_vm8, %v5012_v42, %v5014_v33 }
 0x30b   :  { %4868 = vmatpush1.bf16.msra.mxu0 %v4852_v23  ;;  %4899 = vmatprep.mubr.bf16.mxu0 %v12250_v41 }
 0x30c   :  { %4910 = vmatprep.subr.bf16.mxu0 %v4855_v34 }
 0x30d   :  { %v5020_v39 = vpop.permute.xlu1 %5019 }
 0x30e   :  { %2138 = vrot.lane.b32.xlu1 %v12250_v41, %s9774_s18  ;;  %2142 = vrot.lane.b32.xlu0 %v10672_v29, %s9774_s18  ;;  %v5028_v24 = vsel %vm1531_vm8, %v5018_v51, %v5020_v39  ;;  %v5029_v20 = vsel %vm1531_vm8, %v5020_v39, %v5022_v21 }
 0x311   :  { %9103 = vmatmul.mubr.msk.bf16.vlgmr.msra.gmra.mrb[20].mxu0 %vm138_vm1, %v10611_v8 }
 0x312   :  { %2144 = vrot.lane.b32.xlu1 %v10674_v50, %s9774_s18  ;;  %2136 = vrot.lane.b32.xlu0 %v10689_v58, %s9775_s19 }
 0x313   :  { %4911 = vmatpush1.bf16.msra.mxu0 %v4854_v61  ;;  %4942 = vmatprep.mubr.bf16.mxu0 %v12250_v41 }
 0x314   :  { %4953 = vmatprep.subr.bf16.mxu0 %v4857_v40 }
 0x316   :  { %2148 = vrot.lane.b32.xlu1 %v10678_v2, %s9774_s18  ;;  %2146 = vrot.lane.b32.xlu0 %v10676_v25, %s9774_s18 }
 0x319   :  { %9104 = vmatmul.mubr.msk.bf16.vlgmr.msra.gmra.mrb[24].mxu0 %vm138_vm1, %v10611_v8 }
 0x31a   :  { %2312 = vrot.lane.b32.xlu1 %v10670_v60, %s9776_s20  ;;  %2150 = vrot.lane.b32.xlu0 %v10680_v57, %s9774_s18 }
 0x31b   :  { %4954 = vmatpush1.bf16.msra.mxu0 %v4856_v45  ;;  %4985 = vmatprep.mubr.bf16.mxu0 %v12250_v41 }
 0x31c   :  { %5040 = vmatprep.subr.bf16.mxu0 %v5026_v49 }
 0x31e   :  { %2310 = vrot.lane.b32.xlu1 %v12250_v41, %s9776_s20  ;;  %2314 = vrot.lane.b32.xlu0 %v10672_v29, %s9776_s20 }
 0x321   :  { %9105 = vmatmul.mubr.msk.bf16.vlgmr.msra.gmra.mrb[28].mxu0 %vm138_vm1, %v10611_v8  ;;  %v5024_v8 = vpop.permute.xlu1 %5023 }
 0x322   :  { %2316 = vrot.lane.b32.xlu1 %v10674_v50, %s9776_s20  ;;  %2308 = vrot.lane.b32.xlu0 %v10689_v58, %s9777_s22  ;;  %v5030_v14 = vsel %vm1531_vm8, %v5022_v21, %v5024_v8 }
 0x323   :  { %5041 = vmatpush1.bf16.msra.mxu0 %v5025_v63  ;;  %5072 = vmatprep.mubr.bf16.mxu0 %v12250_v41 }
 0x324   :  { %5083 = vmatprep.subr.bf16.mxu0 %v5028_v24 }
 0x326   :  { %2320 = vrot.lane.b32.xlu1 %v10678_v2, %s9776_s20  ;;  %2318 = vrot.lane.b32.xlu0 %v10676_v25, %s9776_s20 }
 0x329   :  { %9107 = vmatmul.mubr.msk.bf16.vlgmr.msra.gmra.mrb[20].mxu0 %vm138_vm1, %v9738_v53 }
 0x32a   :  { %2480 = vrot.lane.b32.xlu1 %v10689_v58, %s9778_s27  ;;  %2322 = vrot.lane.b32.xlu0 %v10680_v57, %s9776_s20 }
 0x32b   :  { %5084 = vmatpush1.bf16.msra.mxu0 %v5027_v52  ;;  %5115 = vmatprep.mubr.bf16.mxu0 %v12250_v41 }
 0x32c   :  { %5126 = vmatprep.subr.bf16.mxu0 %v5030_v14 }
 0x32e   :  { %2646 = vrot.lane.b32.xlu1 %v10674_v50, %s9779_s28  ;;  %2644 = vrot.lane.b32.xlu0 %v10672_v29, %s9779_s28 }
 0x331   :  { %9108 = vmatmul.mubr.msk.bf16.vlgmr.msra.gmra.mrb[24].mxu0 %vm138_vm1, %v9738_v53 }
 0x332   :  { %2633 = vrot.lane.b32.xlu1 %v10689_v58, %s9780_s24  ;;  %2642 = vrot.lane.b32.xlu0 %v10670_v60, %s9779_s28 }
 0x333   :  { %5127 = vmatpush1.bf16.msra.mxu0 %v5029_v20  ;;  %5158 = vmatprep.mubr.bf16.mxu0 %v12250_v41 }
 0x336   :  { %2650 = vrot.lane.b32.xlu1 %v10678_v2, %s9779_s28  ;;  %2648 = vrot.lane.b32.xlu0 %v10676_v25, %s9779_s28 }
 0x339   :  { %9109 = vmatmul.mubr.msk.bf16.vlgmr.msra.gmra.mrb[28].mxu0 %vm138_vm1, %v9738_v53 }
 0x33a   :  { %2654 = vrot.lane.b32.xlu1 %v12250_v41, %s9779_s28  ;;  %2652 = vrot.lane.b32.xlu0 %v10680_v57, %s9779_s28 }
 0x33b   :  { %7570 = vmatprep.mubr.bf16.mxu0 %v12250_v41 }
 0x33e   :  { %5190 = vperm.xlu1 %9584, %v10838_v15   ;;  %5185 = vperm.xlu0 %9583, %v10843_v11  }
 0x342   :  { %2816 = vrot.lane.b32.xlu1 %v10672_v29, %s9781_s25  ;;  %2818 = vrot.lane.b32.xlu0 %v10674_v50, %s9781_s25 }
 0x346   :  { %2814 = vrot.lane.b32.xlu1 %v10670_v60, %s9781_s25  ;;  %2812 = vrot.lane.b32.xlu0 %v10689_v58, %s9782_s26 }
 0x34a   :  { %2820 = vrot.lane.b32.xlu1 %v10676_v25, %s9781_s25  ;;  %2822 = vrot.lane.b32.xlu0 %v10678_v2, %s9781_s25 }
 0x34e   :  { %2824 = vrot.lane.b32.xlu1 %v10680_v57, %s9781_s25  ;;  %2826 = vrot.lane.b32.xlu0 %v12250_v41, %s9781_s25 }
 0x352   :  { %2988 = vrot.lane.b32.xlu1 %v10672_v29, %s9783_s29  ;;  %2990 = vrot.lane.b32.xlu0 %v10674_v50, %s9783_s29 }
 0x356   :  { %2986 = vrot.lane.b32.xlu1 %v10670_v60, %s9783_s29  ;;  %2984 = vrot.lane.b32.xlu0 %v10689_v58, %s12248_s5 }
 0x35a   :  { %2992 = vrot.lane.b32.xlu1 %v10676_v25, %s9783_s29  ;;  %2994 = vrot.lane.b32.xlu0 %v10678_v2, %s9783_s29 }
 0x35e   :  { %2996 = vrot.lane.b32.xlu1 %v10680_v57, %s9783_s29  ;;  %2998 = vrot.lane.b32.xlu0 %v12250_v41, %s9783_s29 }
 0x360   :  { %v1823_v0 = vpop.permute.xlu0 %1822  ;;  %v1825_v26 = vpop.permute.xlu1 %1824 }
 0x361   :  { %v1835_v48 = vsel %vm125_vm0, %v1823_v0, %v1825_v26 }
 0x362   :  { %3161 = vrot.lane.b32.xlu1 %v10672_v29, %s12249_s23  ;;  %3163 = vrot.lane.b32.xlu0 %v10674_v50, %s12249_s23 }
 0x363   :  { %1849 = vmatprep.subr.bf16.mxu1 %v1835_v48 }
 0x364   :  { %v1821_v43 = vpop.permute.xlu0 %1820  ;;  %v1812_v9 = vpop.permute.xlu1 %1811 }
 0x365   :  { %v1834_v27 = vsel %vm125_vm0, %v1821_v43, %v1823_v0 }
 0x366   :  { %3159 = vrot.lane.b32.xlu1 %v10670_v60, %s12249_s23  ;;  %3165 = vrot.lane.b32.xlu0 %v10676_v25, %s12249_s23 }
 0x367   :  { %1850 = vmatpush1.bf16.msra.mxu1 %v1834_v27 }
 0x368   :  { %v1827_v44 = vpop.permute.xlu0 %1826  ;;  %v1829_v7 = vpop.permute.xlu1 %1828 }
 0x369   :  { %v1837_v12 = vsel %vm125_vm0, %v1827_v44, %v1829_v7  ;;  %v1836_v37 = vsel %vm125_vm0, %v1825_v26, %v1827_v44 }
 0x36a   :  { %9037 = vmatmul.mubr.msk.bf16.vlgmr.msra.gmra.mrb[4].mxu1 %vm138_vm1, %v1812_v9  ;;  %3167 = vrot.lane.b32.xlu1 %v10678_v2, %s12249_s23 }
 0x36b   :  { %3169 = vrot.lane.b32.xlu0 %v10680_v57, %s12249_s23  ;;  %1892 = vmatprep.subr.bf16.mxu1 %v1837_v12 }
 0x36c   :  { %1893 = vmatpush1.bf16.msra.mxu1 %v1836_v37  ;;  %v1831_v3 = vpop.permute.xlu0 %1830  ;;  %v1833_v59 = vpop.permute.xlu1 %1832  ;;  %1924 = vmatprep.mubr.bf16.mxu1 %v12250_v41 }
 0x36d   :  { %v1839_v6 = vsel %vm125_vm0, %v1831_v3, %v1833_v59  ;;  %v1838_v38 = vsel %vm125_vm0, %v1829_v7, %v1831_v3 }
 0x36e   :  { %1935 = vmatprep.subr.bf16.mxu1 %v1839_v6  ;;  %3171 = vrot.lane.b32.xlu1 %v12250_v41, %s12249_s23 }
 0x370   :  { %v1981_v55 = vpop.permute.xlu0 %1980  ;;  %v1983_v4 = vpop.permute.xlu1 %1982 }
 0x371   :  { %v1993_v16 = vsel %vm285_vm2, %v1981_v55, %v1983_v4 }
 0x372   :  { %9038 = vmatmul.mubr.msk.bf16.vlgmr.msra.gmra.mrb[8].mxu1 %vm138_vm1, %v1812_v9 }
 0x373   :  { %1936 = vmatpush1.bf16.msra.mxu1 %v1838_v38  ;;  %1967 = vmatprep.mubr.bf16.mxu1 %v12250_v41 }
 0x374   :  { %2007 = vmatprep.subr.bf16.mxu1 %v1993_v16  ;;  %v1979_v22 = vpop.permute.xlu0 %1978  ;;  %v1985_v23 = vpop.permute.xlu1 %1984 }
 0x375   :  { %v1992_v40 = vsel %vm285_vm2, %v1979_v22, %v1981_v55  ;;  %v1994_v42 = vsel %vm285_vm2, %v1983_v4, %v1985_v23 }
 0x378   :  { %v1987_v34 = vpop.permute.xlu0 %1986  ;;  %v1989_v36 = vpop.permute.xlu1 %1988 }
 0x379   :  { %v1995_v61 = vsel %vm285_vm2, %v1985_v23, %v1987_v34  ;;  %v1996_v63 = vsel %vm285_vm2, %v1987_v34, %v1989_v36 }
 0x37a   :  { %9039 = vmatmul.mubr.msk.bf16.vlgmr.msra.gmra.mrb[12].mxu1 %vm138_vm1, %v1812_v9 }
 0x37b   :  { %2008 = vmatpush1.bf16.msra.mxu1 %v1992_v40  ;;  %2039 = vmatprep.mubr.bf16.mxu1 %v12250_v41 }
 0x37c   :  { %2050 = vmatprep.subr.bf16.mxu1 %v1995_v61  ;;  %v1991_v33 = vpop.permute.xlu0 %1990  ;;  %v2141_v39 = vpop.permute.xlu1 %2140 }
 0x37d   :  { %v1997_v45 = vsel %vm285_vm2, %v1989_v36, %v1991_v33 }
 0x380   :  { %v2143_v49 = vpop.permute.xlu0 %2142  ;;  %v2139_v53 = vpop.permute.xlu1 %2138 }
 0x381   :  { %v2153_v24 = vsel %vm446_vm3, %v2141_v39, %v2143_v49  ;;  %v2152_v21 = vsel %vm446_vm3, %v2139_v53, %v2141_v39 }
 0x382   :  { %9040 = vmatmul.mubr.msk.bf16.vlgmr.msra.gmra.mrb[4].mxu1 %vm138_vm1, %v10689_v58 }
 0x383   :  { %2051 = vmatpush1.bf16.msra.mxu1 %v1994_v42  ;;  %2082 = vmatprep.mubr.bf16.mxu1 %v12250_v41 }
 0x384   :  { %2093 = vmatprep.subr.bf16.mxu1 %v1997_v45  ;;  %v2137_v51 = vpop.permute.xlu0 %2136  ;;  %v2145_v52 = vpop.permute.xlu1 %2144 }
 0x385   :  { %v2154_v26 = vsel %vm446_vm3, %v2143_v49, %v2145_v52 }
 0x388   :  { %v2147_v8 = vpop.permute.xlu0 %2146  ;;  %v2149_v0 = vpop.permute.xlu1 %2148 }
 0x389   :  { %v2155_v14 = vsel %vm446_vm3, %v2145_v52, %v2147_v8  ;;  %v2156_v27 = vsel %vm446_vm3, %v2147_v8, %v2149_v0 }
 0x38a   :  { %9041 = vmatmul.mubr.msk.bf16.vlgmr.msra.gmra.mrb[8].mxu1 %vm138_vm1, %v10689_v58 }
 0x38b   :  { %2094 = vmatpush1.bf16.msra.mxu1 %v1996_v63  ;;  %2125 = vmatprep.mubr.bf16.mxu1 %v12250_v41 }
 0x38c   :  { %2167 = vmatprep.subr.bf16.mxu1 %v2153_v24  ;;  %v2151_v20 = vpop.permute.xlu0 %2150 }
 0x38d   :  { %v2157_v48 = vsel %vm446_vm3, %v2149_v0, %v2151_v20 }
 0x390   :  { %v2315_v43 = vpop.permute.xlu0 %2314 }
 0x392   :  { %9042 = vmatmul.mubr.msk.bf16.vlgmr.msra.gmra.mrb[12].mxu1 %vm138_vm1, %v10689_v58  ;;  %v2313_v58 = vpop.permute.xlu1 %2312 }
 0x393   :  { %2168 = vmatpush1.bf16.msra.mxu1 %v2152_v21  ;;  %2199 = vmatprep.mubr.bf16.mxu1 %v12250_v41  ;;  %v2325_v44 = vsel %vm619_vm4, %v2313_v58, %v2315_v43 }
 0x394   :  { %2210 = vmatprep.subr.bf16.mxu1 %v2155_v14  ;;  %v2309_v9 = vpop.permute.xlu0 %2308 }
 0x396   :  { %v2311_v7 = vpop.permute.xlu1 %2310 }
 0x397   :  { %v2324_v37 = vsel %vm619_vm4, %v2311_v7, %v2313_v58 }
 0x398   :  { %v2319_v12 = vpop.permute.xlu0 %2318 }
 0x39a   :  { %9043 = vmatmul.mubr.msk.bf16.vlgmr.msra.gmra.mrb[4].mxu1 %vm138_vm1, %v2137_v51  ;;  %v2317_v3 = vpop.permute.xlu1 %2316 }
 0x39b   :  { %2211 = vmatpush1.bf16.msra.mxu1 %v2154_v26  ;;  %2242 = vmatprep.mubr.bf16.mxu1 %v12250_v41  ;;  %v2327_v59 = vsel %vm619_vm4, %v2317_v3, %v2319_v12  ;;  %v2326_v4 = vsel %vm619_vm4, %v2315_v43, %v2317_v3 }
 0x39c   :  { %2253 = vmatprep.subr.bf16.mxu1 %v2157_v48  ;;  %v2323_v6 = vpop.permute.xlu0 %2322 }
 0x39e   :  { %v2321_v55 = vpop.permute.xlu1 %2320 }
 0x39f   :  { %v2329_v16 = vsel %vm619_vm4, %v2321_v55, %v2323_v6  ;;  %v2328_v38 = vsel %vm619_vm4, %v2319_v12, %v2321_v55 }
 0x3a0   :  { %v2645_v23 = vpop.permute.xlu0 %2644 }
 0x3a2   :  { %9044 = vmatmul.mubr.msk.bf16.vlgmr.msra.gmra.mrb[8].mxu1 %vm138_vm1, %v2137_v51  ;;  %v2481_v22 = vpop.permute.xlu1 %2480 }
 0x3a3   :  { %2254 = vmatpush1.bf16.msra.mxu1 %v2156_v27  ;;  %2285 = vmatprep.mubr.bf16.mxu1 %v12250_v41 }
 0x3a4   :  { %2339 = vmatprep.subr.bf16.mxu1 %v2325_v44 }
 0x3a6   :  { %v2647_v34 = vpop.permute.xlu1 %2646 }
 0x3aa   :  { %9045 = vmatmul.mubr.msk.bf16.vlgmr.msra.gmra.mrb[12].mxu1 %vm138_vm1, %v2137_v51  ;;  %v2634_v61 = vpop.permute.xlu1 %2633 }
 0x3ab   :  { %2340 = vmatpush1.bf16.msra.mxu1 %v2324_v37  ;;  %2371 = vmatprep.mubr.bf16.mxu1 %v12250_v41 }
 0x3ac   :  { %2382 = vmatprep.subr.bf16.mxu1 %v2327_v59 }
 0x3b2   :  { %9046 = vmatmul.mubr.msk.bf16.vlgmr.msra.gmra.mrb[4].mxu1 %vm138_vm1, %v2309_v9 }
 0x3b3   :  { %2383 = vmatpush1.bf16.msra.mxu1 %v2326_v4  ;;  %2414 = vmatprep.mubr.bf16.mxu1 %v12250_v41 }
 0x3b4   :  { %2425 = vmatprep.subr.bf16.mxu1 %v2329_v16 }
 0x3ba   :  { %9047 = vmatmul.mubr.msk.bf16.vlgmr.msra.gmra.mrb[8].mxu1 %vm138_vm1, %v2309_v9 }
 0x3bb   :  { %2426 = vmatpush1.bf16.msra.mxu1 %v2328_v38  ;;  %2457 = vmatprep.mubr.bf16.mxu1 %v12250_v41 }
 0x3bc   :  { %2485 = vmatprep.subr.bf16.mxu1 %v10672_v29  ;;  %v2643_v29 = vpop.permute.xlu0 %2642 }
 0x3c0   :  { %v2649_v40 = vpop.permute.xlu0 %2648 }
 0x3c1   :  { %v2658_v45 = vsel %vm1011_vm5, %v2647_v34, %v2649_v40 }
 0x3c2   :  { %9048 = vmatmul.mubr.msk.bf16.vlgmr.msra.gmra.mrb[12].mxu1 %vm138_vm1, %v2309_v9 }
 0x3c3   :  { %2486 = vmatpush1.bf16.msra.mxu1 %v10670_v60  ;;  %2517 = vmatprep.mubr.bf16.mxu1 %v12250_v41  ;;  %v2657_v60 = vsel %vm1011_vm5, %v2645_v23, %v2647_v34 }
 0x3c4   :  { %2528 = vmatprep.subr.bf16.mxu1 %v10676_v25  ;;  %v2651_v25 = vpop.permute.xlu1 %2650  ;;  %v2653_v33 = vpop.permute.xlu0 %2652 }
 0x3c5   :  { %v2660_v53 = vsel %vm1011_vm5, %v2651_v25, %v2653_v33 }
 0x3c8   :  { %v2655_v36 = vpop.permute.xlu1 %2654  ;;  %v10960_v42 = vpop.permute.xlu0 %5185 }
 0x3c9   :  { %v2661_v39 = vsel %vm1011_vm5, %v2653_v33, %v2655_v36 }
 0x3ca   :  { %9049 = vmatmul.mubr.msk.bf16.vlgmr.msra.gmra.mrb[4].mxu1 %vm138_vm1, %v2481_v22 }
 0x3cb   :  { %2529 = vmatpush1.bf16.msra.mxu1 %v10674_v50  ;;  %2560 = vmatprep.mubr.bf16.mxu1 %v12250_v41  ;;  %v2656_v50 = vsel %vm1011_vm5, %v2643_v29, %v2645_v23 }
 0x3cc   :  { %2571 = vmatprep.subr.bf16.mxu1 %v10680_v57  ;;  %v2659_v57 = vsel %vm1011_vm5, %v2649_v40, %v2651_v25  ;;  %v2819_v49 = vpop.permute.xlu0 %2818 }
 0x3d0   :  { %v10968_v63 = vpop.permute.xlu0 %2812 }
 0x3d2   :  { %9050 = vmatmul.mubr.msk.bf16.vlgmr.msra.gmra.mrb[8].mxu1 %vm138_vm1, %v2481_v22 }
 0x3d3   :  { %2572 = vmatpush1.bf16.msra.mxu1 %v10678_v2  ;;  %2603 = vmatprep.mubr.bf16.mxu1 %v12250_v41  ;;  %v10962_v2 = vpop.permute.xlu1 %5190 }
 0x3d4   :  { %2671 = vmatprep.subr.bf16.mxu1 %v2657_v60  ;;  %v2823_v21 = vpop.permute.xlu0 %2822 }
 0x3d7   :  { %v2817_v51 = vpop.permute.xlu1 %2816 }
 0x3d8   :  { %v2829_v8 = vsel %vm1184_vm6, %v2817_v51, %v2819_v49  ;;  %v2827_v0 = vpop.permute.xlu0 %2826 }
 0x3da   :  { %9051 = vmatmul.mubr.msk.bf16.vlgmr.msra.gmra.mrb[12].mxu1 %vm138_vm1, %v2481_v22 }
 0x3db   :  { %2672 = vmatpush1.bf16.msra.mxu1 %v2656_v50  ;;  %2703 = vmatprep.mubr.bf16.mxu1 %v12250_v41  ;;  %v2815_v24 = vpop.permute.xlu1 %2814 }
 0x3dc   :  { %2714 = vmatprep.subr.bf16.mxu1 %v2659_v57  ;;  %v2828_v14 = vsel %vm1184_vm6, %v2815_v24, %v2817_v51  ;;  %v10981_v43 = vpop.permute.xlu0 %2990  ;;  %v9787_v51 = vmov 1  }
 0x3dd   :  { %9585 = vset.pattern.permute.xlu1 %v9787_v51  ;;  %9586 = vset.pattern.permute.xlu0 %v9787_v51 }
 0x3df   :  { %v2821_v52 = vpop.permute.xlu1 %2820 }
 0x3e0   :  { %v2831_v20 = vsel %vm1184_vm6, %v2821_v52, %v2823_v21  ;;  %v2830_v48 = vsel %vm1184_vm6, %v2819_v49, %v2821_v52  ;;  %v10989_v38 = vpop.permute.xlu0 %2984 }
 0x3e2   :  { %9052 = vmatmul.mubr.msk.bf16.vlgmr.msra.gmra.mrb[4].mxu1 %vm138_vm1, %v2634_v61 }
 0x3e3   :  { %2715 = vmatpush1.bf16.msra.mxu1 %v2658_v45  ;;  %2746 = vmatprep.mubr.bf16.mxu1 %v12250_v41  ;;  %v2825_v26 = vpop.permute.xlu1 %2824 }
 0x3e4   :  { %2757 = vmatprep.subr.bf16.mxu1 %v2661_v39  ;;  %v2833_v58 = vsel %vm1184_vm6, %v2825_v26, %v2827_v0  ;;  %v2832_v23 = vsel %vm1184_vm6, %v2823_v21, %v2825_v26  ;;  %v2995_v21 = vpop.permute.xlu0 %2994  ;;  %v11016_v0 = vld [vmem:[%s12201_s7] ss:$8 sps:$4 sm:$0xff]  }
 0x3e7   :  { %v2989_v9 = vpop.permute.xlu1 %2988 }
 0x3e8   :  { %v3001_v40 = vsel %vm1357_vm7, %v2989_v9, %v10981_v43 }
 0x3ea   :  { %9053 = vmatmul.mubr.msk.bf16.vlgmr.msra.gmra.mrb[8].mxu1 %vm138_vm1, %v2634_v61 }
 0x3eb   :  { %2758 = vmatpush1.bf16.msra.mxu1 %v2660_v53  ;;  %2789 = vmatprep.mubr.bf16.mxu1 %v12250_v41  ;;  %v2987_v22 = vpop.permute.xlu1 %2986 }
 0x3ec   :  { %2843 = vmatprep.subr.bf16.mxu1 %v2829_v8 }
 0x3ef   :  { %v2993_v52 = vpop.permute.xlu1 %2992 }
 0x3f2   :  { %9054 = vmatmul.mubr.msk.bf16.vlgmr.msra.gmra.mrb[12].mxu1 %vm138_vm1, %v2634_v61 }
 0x3f3   :  { %2844 = vmatpush1.bf16.msra.mxu1 %v2828_v14  ;;  %2875 = vmatprep.mubr.bf16.mxu1 %v12250_v41 }
 0x3f4   :  { %2886 = vmatprep.subr.bf16.mxu1 %v2831_v20 }
 0x3fa   :  { %9055 = vmatmul.mubr.msk.bf16.vlgmr.msra.gmra.mrb[4].mxu1 %vm138_vm1, %v10968_v63 }
 0x3fb   :  { %2887 = vmatpush1.bf16.msra.mxu1 %v2830_v48  ;;  %2918 = vmatprep.mubr.bf16.mxu1 %v12250_v41  ;;  %v3000_v48 = vsel %vm1357_vm7, %v2987_v22, %v2989_v9 }
 0x3fc   :  { %2929 = vmatprep.subr.bf16.mxu1 %v2833_v58  ;;  %v5074_v27 = vpop.f32.mrb[20].mxu0 }
 0x3fd   :  { %v5193_v44 = vadd.f32 %v10960_v42, %v5074_v27  ;;  %v5076_v7 = vpop.f32.mrb[21].mxu0 }
 0x3fe   :  { %v5194_v12 = vadd.f32 %v10960_v42, %v5076_v7  ;;  %v5078_v37 = vpop.f32.mrb[22].mxu0  ;;  %v3003_v7 = vsel %vm1357_vm7, %v2993_v52, %v2995_v21 }
 0x3ff   :  { %v5205_v3 = vmax.f32 %v5193_v44, 0.0  ;;  %v5199_v59 = vadd.f32 %v10962_v2, %v5078_v37  ;;  %v5080_v6 = vpop.f32.mrb[23].mxu0 }
 0x400   :  { %v5206_v55 = vmax.f32 %v5194_v12, 0.0  ;;  %v5200_v4 = vadd.f32 %v10962_v2, %v5080_v6  ;;  %v2997_v6 = vpop.permute.xlu1 %2996 }
 0x401   :  { %v5211_v16 = vmax.f32 %v5199_v59, 0.0  ;;  %v5217_v29 = vmul.f32 %v5205_v3, %v10320_v13 }
 0x402   :  { %9056 = vmatmul.mubr.msk.bf16.vlgmr.msra.gmra.mrb[8].mxu1 %vm138_vm1, %v10968_v63  ;;  %v5212_v34 = vmax.f32 %v5200_v4, 0.0  ;;  %v5218_v60 = vmul.f32 %v5206_v55, %v10324_v10 }
 0x403   :  { %2930 = vmatpush1.bf16.msra.mxu1 %v2832_v23  ;;  %v5223_v61 = vmul.f32 %v5211_v16, %v10320_v13  ;;  %2961 = vmatprep.mubr.bf16.mxu1 %v12250_v41 }
 0x404   :  { %3015 = vmatprep.subr.bf16.mxu1 %v3001_v40  ;;  %v5224_v25 = vmul.f32 %v5212_v34, %v10324_v10  ;;  %v5117_v33 = vpop.f32.mrb[24].mxu0 }
 0x405   :  { %v11001_v50 = vpack.c.bf16 %v5223_v61, %v5217_v29  ;;  %v5195_v36 = vadd.f32 %v10960_v42, %v5117_v33  ;;  %v5119_v57 = vpop.f32.mrb[25].mxu0  ;;  %v2999_v29 = vpop.permute.xlu0 %2998 }
 0x406   :  { %v11004_v45 = vpack.c.bf16 %v5224_v25, %v5218_v60  ;;  %v5196_v49 = vadd.f32 %v10960_v42, %v5119_v57  ;;  %v5121_v39 = vpop.f32.mrb[26].mxu0  ;;  %v3005_v57 = vsel %vm1357_vm7, %v2997_v6, %v2999_v29 }
 0x407   :  { %v5207_v24 = vmax.f32 %v5195_v36, 0.0  ;;  %v5201_v53 = vadd.f32 %v10962_v2, %v5121_v39  ;;  %v5123_v8 = vpop.f32.mrb[27].mxu0  ;;  %5284 = vrot.lane.b32.xlu0 %v11001_v50, %s9771_s21 }
 0x408   :  { %v5208_v14 = vmax.f32 %v5196_v49, 0.0  ;;  %v5202_v20 = vadd.f32 %v10962_v2, %v5123_v8  ;;  %5286 = vrot.lane.b32.xlu1 %v11004_v45, %s9771_s21  ;;  %v3004_v8 = vsel %vm1357_vm7, %v2995_v21, %v2997_v6 }
 0x409   :  { %v5213_v26 = vmax.f32 %v5201_v53, 0.0  ;;  %v5219_v27 = vmul.f32 %v5207_v24, %v10342_v32 }
 0x40a   :  { %9057 = vmatmul.mubr.msk.bf16.vlgmr.msra.gmra.mrb[12].mxu1 %vm138_vm1, %v10968_v63  ;;  %v5214_v58 = vmax.f32 %v5202_v20, 0.0  ;;  %v5220_v12 = vmul.f32 %v5208_v14, %v10348_v46 }
 0x40b   :  { %3016 = vmatpush1.bf16.msra.mxu1 %v3000_v48  ;;  %v5225_v44 = vmul.f32 %v5213_v26, %v10342_v32  ;;  %5282 = vrot.lane.b32.xlu0 %v12250_v41, %s9771_s21  ;;  %v9741_v48 = vld [vmem:[%s12200_s4 + $0x4] ss:$8 sps:$4 sm:$0xff]  }
 0x40c   :  { %v5226_v37 = vmul.f32 %v5214_v58, %v10348_v46  ;;  %3058 = vmatprep.subr.bf16.mxu1 %v3003_v7  ;;  %v5160_v9 = vpop.f32.mrb[28].mxu0  ;;  %5273 = vrot.lane.b32.xlu1 %v11016_v0, %s9772_s16 }
 0x40d   :  { %v11030_v63 = vpack.c.bf16 %v5225_v44, %v5219_v27  ;;  %v5197_v3 = vadd.f32 %v10960_v42, %v5160_v9  ;;  %3047 = vmatprep.mubr.bf16.mxu1 %v12250_v41  ;;  %v5162_v59 = vpop.f32.mrb[29].mxu0 }
 0x40e   :  { %v11034_v55 = vpack.c.bf16 %v5226_v37, %v5220_v12  ;;  %v5198_v4 = vadd.f32 %v10960_v42, %v5162_v59  ;;  %v5164_v16 = vpop.f32.mrb[30].mxu0  ;;  %v3002_v42 = vsel %vm1357_vm7, %v10981_v43, %v2993_v52  ;;  %v3164_v43 = vpop.permute.xlu0 %3163 }
 0x40f   :  { %v5209_v22 = vmax.f32 %v5197_v3, 0.0  ;;  %v5203_v23 = vadd.f32 %v10962_v2, %v5164_v16  ;;  %v5166_v34 = vpop.f32.mrb[31].mxu0  ;;  %5288 = vrot.lane.b32.xlu0 %v11030_v63, %s9771_s21 }
 0x410   :  { %v5210_v61 = vmax.f32 %v5198_v4, 0.0  ;;  %v5204_v40 = vadd.f32 %v10962_v2, %v5166_v34  ;;  %5290 = vrot.lane.b32.xlu1 %v11034_v55, %s9771_s21  ;;  %v3162_v2 = vpop.permute.xlu1 %3161 }
 0x411   :  { %v5215_v60 = vmax.f32 %v5203_v23, 0.0  ;;  %v5221_v33 = vmul.f32 %v5209_v22, %v10377_v18  ;;  %v3174_v52 = vsel %vm1531_vm8, %v3162_v2, %v3164_v43 }
 0x412   :  { %9058 = vmatmul.mubr.msk.bf16.vlgmr.msra.gmra.mrb[4].mxu1 %vm138_vm1, %v10989_v38  ;;  %v5216_v25 = vmax.f32 %v5204_v40, 0.0  ;;  %v5222_v49 = vmul.f32 %v5210_v61, %v10383_v5  ;;  %v3166_v21 = vpop.permute.xlu0 %3165 }
 0x413   :  { %3059 = vmatpush1.bf16.msra.mxu1 %v3002_v42  ;;  %v5227_v36 = vmul.f32 %v5215_v60, %v10377_v18  ;;  %3090 = vmatprep.mubr.bf16.mxu1 %v12250_v41  ;;  %v3175_v27 = vsel %vm1531_vm8, %v3164_v43, %v3166_v21 }
 0x414   :  { %v5228_v39 = vmul.f32 %v5216_v25, %v10383_v5  ;;  %3101 = vmatprep.subr.bf16.mxu1 %v3005_v57  ;;  %v3160_v53 = vpop.permute.xlu1 %3159 }
 0x415   :  { %v11053_v51 = vpack.c.bf16 %v5227_v36, %v5221_v33  ;;  %v3173_v20 = vsel %vm1531_vm8, %v3160_v53, %v3162_v2 }
 0x416   :  { %v11055_v24 = vpack.c.bf16 %v5228_v39, %v5222_v49  ;;  %v3170_v58 = vpop.permute.xlu0 %3169 }
 0x417   :  { %5292 = vrot.lane.b32.xlu0 %v11053_v51, %s9771_s21 }
 0x418   :  { %5294 = vrot.lane.b32.xlu1 %v11055_v24, %s9771_s21  ;;  %v3168_v14 = vpop.permute.xlu1 %3167 }
 0x419   :  { %v3176_v26 = vsel %vm1531_vm8, %v3166_v21, %v3168_v14  ;;  %v3177_v7 = vsel %vm1531_vm8, %v3168_v14, %v3170_v58 }
 0x41a   :  { %9059 = vmatmul.mubr.msk.bf16.vlgmr.msra.gmra.mrb[8].mxu1 %vm138_vm1, %v10989_v38 }
 0x41b   :  { %3102 = vmatpush1.bf16.msra.mxu1 %v3004_v8  ;;  %5442 = vrot.lane.b32.xlu0 %v11001_v50, %s9773_s17 }
 0x41c   :  { %3188 = vmatprep.subr.bf16.mxu1 %v3174_v52  ;;  %5444 = vrot.lane.b32.xlu1 %v11004_v45, %s9773_s17 }
 0x41d   :  { %3133 = vmatprep.mubr.bf16.mxu1 %v12250_v41 }
 0x41f   :  { %5440 = vrot.lane.b32.xlu0 %v12250_v41, %s9773_s17 }
 0x420   :  { %5446 = vrot.lane.b32.xlu1 %v11030_v63, %s9773_s17 }
 0x422   :  { %9060 = vmatmul.mubr.msk.bf16.vlgmr.msra.gmra.mrb[12].mxu1 %vm138_vm1, %v10989_v38  ;;  %v3172_v38 = vpop.permute.xlu1 %3171 }
 0x423   :  { %3189 = vmatpush1.bf16.msra.mxu1 %v3173_v20  ;;  %5448 = vrot.lane.b32.xlu0 %v11034_v55, %s9773_s17  ;;  %v3178_v44 = vsel %vm1531_vm8, %v3170_v58, %v3172_v38 }
 0x424   :  { %3231 = vmatprep.subr.bf16.mxu1 %v3176_v26  ;;  %5450 = vrot.lane.b32.xlu1 %v11053_v51, %s9773_s17 }
 0x425   :  { %3220 = vmatprep.mubr.bf16.mxu1 %v12250_v41 }
 0x427   :  { %5452 = vrot.lane.b32.xlu0 %v11055_v24, %s9773_s17 }
 0x428   :  { %5602 = vrot.lane.b32.xlu1 %v11001_v50, %s9774_s18 }
 0x42a   :  { %9062 = vmatmul.mubr.msk.bf16.vlgmr.msra.gmra.mrb[4].mxu1 %vm138_vm1, %v9741_v48 }
 0x42b   :  { %3232 = vmatpush1.bf16.msra.mxu1 %v3175_v27  ;;  %5604 = vrot.lane.b32.xlu0 %v11004_v45, %s9774_s18 }
 0x42c   :  { %3274 = vmatprep.subr.bf16.mxu1 %v3178_v44  ;;  %5600 = vrot.lane.b32.xlu1 %v12250_v41, %s9774_s18 }
 0x42d   :  { %3263 = vmatprep.mubr.bf16.mxu1 %v12250_v41 }
 0x42f   :  { %5598 = vrot.lane.b32.xlu0 %v11016_v0, %s9775_s19 }
 0x430   :  { %5606 = vrot.lane.b32.xlu1 %v11030_v63, %s9774_s18 }
 0x432   :  { %9063 = vmatmul.mubr.msk.bf16.vlgmr.msra.gmra.mrb[8].mxu1 %vm138_vm1, %v9741_v48 }
 0x433   :  { %3275 = vmatpush1.bf16.msra.mxu1 %v3177_v7  ;;  %5608 = vrot.lane.b32.xlu0 %v11034_v55, %s9774_s18 }
 0x434   :  { %5610 = vrot.lane.b32.xlu1 %v11053_v51, %s9774_s18  ;;  %3306 = vmatprep.mubr.bf16.mxu1 %v12250_v41 }
 0x437   :  { %5612 = vrot.lane.b32.xlu0 %v11055_v24, %s9774_s18 }
 0x438   :  { %5774 = vrot.lane.b32.xlu1 %v11001_v50, %s9776_s20 }
 0x43a   :  { %9064 = vmatmul.mubr.msk.bf16.vlgmr.msra.gmra.mrb[12].mxu1 %vm138_vm1, %v9741_v48 }
 0x43b   :  { %5776 = vrot.lane.b32.xlu0 %v11004_v45, %s9776_s20  ;;  %5343 = vmatprep.mubr.bf16.mxu1 %v12250_v41 }
 0x43c   :  { %5772 = vrot.lane.b32.xlu1 %v12250_v41, %s9776_s20 }
 0x43f   :  { %5770 = vrot.lane.b32.xlu0 %v11016_v0, %s9777_s22 }
 0x440   :  { %5778 = vrot.lane.b32.xlu1 %v11030_v63, %s9776_s20 }
 0x443   :  { %5780 = vrot.lane.b32.xlu0 %v11034_v55, %s9776_s20 }
 0x444   :  { %5782 = vrot.lane.b32.xlu1 %v11053_v51, %s9776_s20 }
 0x447   :  { %5784 = vrot.lane.b32.xlu0 %v11055_v24, %s9776_s20 }
 0x448   :  { %5942 = vrot.lane.b32.xlu1 %v11016_v0, %s9778_s27 }
 0x44b   :  { %6106 = vrot.lane.b32.xlu0 %v11004_v45, %s9779_s28 }
 0x44c   :  { %6108 = vrot.lane.b32.xlu1 %v11030_v63, %s9779_s28 }
 0x44f   :  { %6104 = vrot.lane.b32.xlu0 %v11001_v50, %s9779_s28 }
 0x450   :  { %6095 = vrot.lane.b32.xlu1 %v11016_v0, %s9780_s24 }
 0x453   :  { %6110 = vrot.lane.b32.xlu0 %v11034_v55, %s9779_s28 }
 0x454   :  { %6112 = vrot.lane.b32.xlu1 %v11053_v51, %s9779_s28 }
 0x457   :  { %6114 = vrot.lane.b32.xlu0 %v11055_v24, %s9779_s28 }
 0x458   :  { %6116 = vrot.lane.b32.xlu1 %v12250_v41, %s9779_s28 }
 0x45b   :  { %6278 = vrot.lane.b32.xlu0 %v11004_v45, %s9781_s25 }
 0x45c   :  { %6280 = vrot.lane.b32.xlu1 %v11030_v63, %s9781_s25 }
 0x45f   :  { %6276 = vrot.lane.b32.xlu0 %v11001_v50, %s9781_s25 }
 0x460   :  { %6274 = vrot.lane.b32.xlu1 %v11016_v0, %s9782_s26 }
 0x463   :  { %6282 = vrot.lane.b32.xlu0 %v11034_v55, %s9781_s25 }
 0x464   :  { %6284 = vrot.lane.b32.xlu1 %v11053_v51, %s9781_s25 }
 0x467   :  { %6286 = vrot.lane.b32.xlu0 %v11055_v24, %s9781_s25 }
 0x468   :  { %6288 = vrot.lane.b32.xlu1 %v12250_v41, %s9781_s25 }
 0x46b   :  { %6450 = vrot.lane.b32.xlu0 %v11004_v45, %s9783_s29 }
 0x46c   :  { %6452 = vrot.lane.b32.xlu1 %v11030_v63, %s9783_s29 }
 0x46f   :  { %6448 = vrot.lane.b32.xlu0 %v11001_v50, %s9783_s29 }
 0x470   :  { %6446 = vrot.lane.b32.xlu1 %v11016_v0, %s12248_s5 }
 0x473   :  { %6454 = vrot.lane.b32.xlu0 %v11034_v55, %s9783_s29 }
 0x474   :  { %6456 = vrot.lane.b32.xlu1 %v11053_v51, %s9783_s29 }
 0x477   :  { %6458 = vrot.lane.b32.xlu0 %v11055_v24, %s9783_s29 }
 0x478   :  { %6460 = vrot.lane.b32.xlu1 %v12250_v41, %s9783_s29 }
 0x479   :  { %v5285_v12 = vpop.permute.xlu0 %5284 }
 0x47a   :  { %v5287_v37 = vpop.permute.xlu1 %5286 }
 0x47b   :  { %6623 = vrot.lane.b32.xlu0 %v11004_v45, %s12249_s23  ;;  %v5297_v9 = vsel %vm125_vm0, %v5285_v12, %v5287_v37 }
 0x47c   :  { %6625 = vrot.lane.b32.xlu1 %v11030_v63, %s12249_s23  ;;  %5311 = vmatprep.subr.bf16.mxu1 %v5297_v9 }
 0x47d   :  { %v5283_v3 = vpop.permute.xlu0 %5282 }
 0x47e   :  { %v5296_v59 = vsel %vm125_vm0, %v5283_v3, %v5285_v12  ;;  %v5274_v6 = vpop.permute.xlu1 %5273 }
 0x47f   :  { %6621 = vrot.lane.b32.xlu0 %v11001_v50, %s12249_s23  ;;  %5312 = vmatpush1.bf16.msra.mxu1 %v5296_v59 }
 0x480   :  { %6627 = vrot.lane.b32.xlu1 %v11034_v55, %s12249_s23 }
 0x481   :  { %v5289_v4 = vpop.permute.xlu0 %5288 }
 0x482   :  { %9111 = vmatmul.mubr.msk.bf16.vlgmr.msra.gmra.mrb[16].mxu1 %vm138_vm1, %v5274_v6  ;;  %v5291_v16 = vpop.permute.xlu1 %5290  ;;  %v5298_v23 = vsel %vm125_vm0, %v5287_v37, %v5289_v4 }
 0x483   :  { %6629 = vrot.lane.b32.xlu0 %v11053_v51, %s12249_s23  ;;  %v5299_v22 = vsel %vm125_vm0, %v5289_v4, %v5291_v16  ;;  %5386 = vmatprep.mubr.bf16.mxu1 %v12250_v41 }
 0x484   :  { %6631 = vrot.lane.b32.xlu1 %v11055_v24, %s12249_s23  ;;  %5354 = vmatprep.subr.bf16.mxu1 %v5299_v22 }
 0x485   :  { %5355 = vmatpush1.bf16.msra.mxu1 %v5298_v23 }
 0x487   :  { %6633 = vrot.lane.b32.xlu0 %v12250_v41, %s12249_s23 }
 0x488   :  { %3333 = vperm.xlu1 %9585, %v10843_v11  }
 0x489   :  { %v5293_v34 = vpop.permute.xlu0 %5292 }
 0x48a   :  { %9112 = vmatmul.mubr.msk.bf16.vlgmr.msra.gmra.mrb[20].mxu1 %vm138_vm1, %v5274_v6  ;;  %v5295_v29 = vpop.permute.xlu1 %5294  ;;  %v5300_v40 = vsel %vm125_vm0, %v5291_v16, %v5293_v34 }
 0x48b   :  { %3338 = vperm.xlu0 %9586, %v10838_v15   ;;  %v5301_v61 = vsel %vm125_vm0, %v5293_v34, %v5295_v29  ;;  %5429 = vmatprep.mubr.bf16.mxu1 %v12250_v41 }
 0x48c   :  { %5397 = vmatprep.subr.bf16.mxu1 %v5301_v61 }
 0x48d   :  { %v5443_v60 = vpop.permute.xlu0 %5442  ;;  %5398 = vmatpush1.bf16.msra.mxu1 %v5300_v40 }
 0x48e   :  { %v5445_v42 = vpop.permute.xlu1 %5444 }
 0x48f   :  { %v5455_v25 = vsel %vm285_vm2, %v5443_v60, %v5445_v42 }
 0x490   :  { %5469 = vmatprep.subr.bf16.mxu1 %v5455_v25 }
 0x491   :  { %v5441_v11 = vpop.permute.xlu0 %5440 }
 0x492   :  { %v5454_v33 = vsel %vm285_vm2, %v5441_v11, %v5443_v60  ;;  %9113 = vmatmul.mubr.msk.bf16.vlgmr.msra.gmra.mrb[24].mxu1 %vm138_vm1, %v5274_v6  ;;  %v5447_v36 = vpop.permute.xlu1 %5446 }
 0x493   :  { %5470 = vmatpush1.bf16.msra.mxu1 %v5454_v33  ;;  %5501 = vmatprep.mubr.bf16.mxu1 %v12250_v41  ;;  %v5456_v39 = vsel %vm285_vm2, %v5445_v42, %v5447_v36 }
 0x495   :  { %v5449_v15 = vpop.permute.xlu0 %5448 }
 0x496   :  { %v5451_v57 = vpop.permute.xlu1 %5450  ;;  %v5457_v2 = vsel %vm285_vm2, %v5447_v36, %v5449_v15 }
 0x497   :  { %5512 = vmatprep.subr.bf16.mxu1 %v5457_v2  ;;  %v5458_v21 = vsel %vm285_vm2, %v5449_v15, %v5451_v57 }
 0x499   :  { %v5453_v49 = vpop.permute.xlu0 %5452 }
 0x49a   :  { %9114 = vmatmul.mubr.msk.bf16.vlgmr.msra.gmra.mrb[16].mxu1 %vm138_vm1, %v11016_v0  ;;  %v5603_v43 = vpop.permute.xlu1 %5602  ;;  %v5459_v53 = vsel %vm285_vm2, %v5451_v57, %v5453_v49 }
 0x49b   :  { %5513 = vmatpush1.bf16.msra.mxu1 %v5456_v39  ;;  %5544 = vmatprep.mubr.bf16.mxu1 %v12250_v41 }
 0x49c   :  { %5555 = vmatprep.subr.bf16.mxu1 %v5459_v53 }
 0x49d   :  { %v5605_v8 = vpop.permute.xlu0 %5604 }
 0x49e   :  { %v5601_v52 = vpop.permute.xlu1 %5600  ;;  %v5615_v26 = vsel %vm446_vm3, %v5603_v43, %v5605_v8 }
 0x49f   :  { %v5614_v27 = vsel %vm446_vm3, %v5601_v52, %v5603_v43  ;;  %v6791_v52 = vld [vmem:[%s12195_s9] sm:$0xff] }
 0x4a1   :  { %v5599_v14 = vpop.permute.xlu0 %5598 }
 0x4a2   :  { %9115 = vmatmul.mubr.msk.bf16.vlgmr.msra.gmra.mrb[20].mxu1 %vm138_vm1, %v11016_v0  ;;  %v5607_v20 = vpop.permute.xlu1 %5606 }
 0x4a3   :  { %5556 = vmatpush1.bf16.msra.mxu1 %v5458_v21  ;;  %5587 = vmatprep.mubr.bf16.mxu1 %v12250_v41  ;;  %v5616_v3 = vsel %vm446_vm3, %v5605_v8, %v5607_v20 }
 0x4a4   :  { %5629 = vmatprep.subr.bf16.mxu1 %v5615_v26  ;;  %v6792_v26 = vld [vmem:[%s12195_s9 + $0x8] sm:$0xff] }
 0x4a5   :  { %v5609_v48 = vpop.permute.xlu0 %5608 }
 0x4a6   :  { %v5611_v38 = vpop.permute.xlu1 %5610  ;;  %v5617_v7 = vsel %vm446_vm3, %v5607_v20, %v5609_v48 }
 0x4a7   :  { %v5618_v22 = vsel %vm446_vm3, %v5609_v48, %v5611_v38 }
 0x4a9   :  { %v5613_v58 = vpop.permute.xlu0 %5612 }
 0x4aa   :  { %9116 = vmatmul.mubr.msk.bf16.vlgmr.msra.gmra.mrb[24].mxu1 %vm138_vm1, %v11016_v0  ;;  %v5775_v44 = vpop.permute.xlu1 %5774  ;;  %v5619_v6 = vsel %vm446_vm3, %v5611_v38, %v5613_v58 }
 0x4ab   :  { %5630 = vmatpush1.bf16.msra.mxu1 %v5614_v27  ;;  %5661 = vmatprep.mubr.bf16.mxu1 %v12250_v41 }
 0x4ac   :  { %5672 = vmatprep.subr.bf16.mxu1 %v5617_v7 }
 0x4ad   :  { %v5777_v12 = vpop.permute.xlu0 %5776 }
 0x4ae   :  { %v5773_v37 = vpop.permute.xlu1 %5772  ;;  %v5787_v34 = vsel %vm619_vm4, %v5775_v44, %v5777_v12 }
 0x4af   :  { %v5786_v60 = vsel %vm619_vm4, %v5773_v37, %v5775_v44 }
 0x4b1   :  { %v5771_v9 = vpop.permute.xlu0 %5770 }
 0x4b2   :  { %9117 = vmatmul.mubr.msk.bf16.vlgmr.msra.gmra.mrb[16].mxu1 %vm138_vm1, %v5599_v14  ;;  %v5779_v59 = vpop.permute.xlu1 %5778 }
 0x4b3   :  { %5673 = vmatpush1.bf16.msra.mxu1 %v5616_v3  ;;  %5704 = vmatprep.mubr.bf16.mxu1 %v12250_v41  ;;  %v5788_v15 = vsel %vm619_vm4, %v5777_v12, %v5779_v59 }
 0x4b4   :  { %5715 = vmatprep.subr.bf16.mxu1 %v5619_v6 }
 0x4b5   :  { %v5781_v0 = vpop.permute.xlu0 %5780 }
 0x4b6   :  { %v5783_v4 = vpop.permute.xlu1 %5782  ;;  %v5789_v25 = vsel %vm619_vm4, %v5779_v59, %v5781_v0 }
 0x4b7   :  { %v5790_v53 = vsel %vm619_vm4, %v5781_v0, %v5783_v4 }
 0x4b9   :  { %v5785_v16 = vpop.permute.xlu0 %5784 }
 0x4ba   :  { %9118 = vmatmul.mubr.msk.bf16.vlgmr.msra.gmra.mrb[20].mxu1 %vm138_vm1, %v5599_v14  ;;  %v11231_v23 = vpop.permute.xlu1 %5942  ;;  %v5791_v2 = vsel %vm619_vm4, %v5783_v4, %v5785_v16 }
 0x4bb   :  { %5716 = vmatpush1.bf16.msra.mxu1 %v5618_v22  ;;  %5747 = vmatprep.mubr.bf16.mxu1 %v12250_v41 }
 0x4bc   :  { %5801 = vmatprep.subr.bf16.mxu1 %v5787_v34 }
 0x4bd   :  { %v6107_v29 = vpop.permute.xlu0 %6106 }
 0x4be   :  { %v11235_v61 = vpop.permute.xlu1 %6108 }
 0x4bf   :  { %v6119_v7 = vsel %vm1011_vm5, %v6107_v29, %v11235_v61 }
 0x4c1   :  { %v6105_v40 = vpop.permute.xlu0 %6104 }
 0x4c2   :  { %9119 = vmatmul.mubr.msk.bf16.vlgmr.msra.gmra.mrb[24].mxu1 %vm138_vm1, %v5599_v14  ;;  %v11239_v42 = vpop.permute.xlu1 %6095  ;;  %v9788_v14 = vmov 4   ;;  %v6118_v12 = vsel %vm1011_vm5, %v6105_v40, %v6107_v29  ;;  %v1779_v40 = vld [vmem:[%s12193_s0 + $0x4] sm:$0xff] }
 0x4c3   :  { %5802 = vmatpush1.bf16.msra.mxu1 %v5786_v60  ;;  %5833 = vmatprep.mubr.bf16.mxu1 %v12250_v41  ;;  %v1780_v60 = vld [vmem:[%s12193_s0 + $0xc] sm:$0xff] }
 0x4c4   :  { %5844 = vmatprep.subr.bf16.mxu1 %v5789_v25  ;;  %9587 = vset.pattern.permute.xlu1 %v9788_v14  ;;  %v1787_v14 = vunpack.c.l.bf16 %v1780_v60 }
 0x4c5   :  { %v6111_v11 = vpop.permute.xlu0 %6110  ;;  %6795 = vperm.xlu1 %9587, %v6791_v52   ;;  %v1786_v52 = vunpack.c.h.bf16 %v1779_v40 }
 0x4c6   :  { %v11243_v33 = vpop.permute.xlu1 %6112  ;;  %v6120_v59 = vsel %vm1011_vm5, %v11235_v61, %v6111_v11  ;;  %v11339_v61 = vld [vmem:[%s12193_s0 + $0x14] sm:$0xff] }
 0x4c7   :  { %v6121_v37 = vsel %vm1011_vm5, %v6111_v11, %v11243_v33 }
 0x4c9   :  { %v11245_v36 = vpop.permute.xlu0 %6114  ;;  %6800 = vperm.xlu1 %9587, %v6792_v26  }
 0x4ca   :  { %9120 = vmatmul.mubr.msk.bf16.vlgmr.msra.gmra.mrb[16].mxu1 %vm138_vm1, %v5771_v9  ;;  %v6117_v57 = vpop.permute.xlu1 %6116  ;;  %v6122_v29 = vsel %vm1011_vm5, %v11243_v33, %v11245_v36  ;;  %v1782_v33 = vld [vmem:[%s12193_s0 + $0x24] sm:$0xff] }
 0x4cb   :  { %5845 = vmatpush1.bf16.msra.mxu1 %v5788_v15  ;;  %5876 = vmatprep.mubr.bf16.mxu1 %v12250_v41  ;;  %v6123_v6 = vsel %vm1011_vm5, %v11245_v36, %v6117_v57  ;;  %v11359_v36 = vld [vmem:[%s12193_s0 + $0x34] sm:$0xff]  ;;  %v1783_v15 = vld [vmem:[%s12193_s0 + $0x2c] sm:$0xff] }
 0x4cc   :  { %5887 = vmatprep.subr.bf16.mxu1 %v5791_v2  ;;  %v1789_v2 = vunpack.c.l.bf16 %v11339_v61  ;;  %v1795_v56 = vunpack.c.l.bf16 %v11359_v36  ;;  %v1796_v30 = vunpack.c.h.bf16 %v11359_v36  ;;  %v1793_v31 = vunpack.c.l.bf16 %v1783_v15 }
 0x4cd   :  { %v11251_v49 = vpop.permute.xlu0 %6278  ;;  %v1794_v54 = vunpack.c.h.bf16 %v1783_v15 }
 0x4ce   :  { %v11253_v39 = vpop.permute.xlu1 %6280 }
 0x4cf   :  { %v6291_v11 = vsel %vm1184_vm6, %v11251_v49, %v11253_v39 }
 0x4d1   :  { %v11255_v43 = vpop.permute.xlu0 %6276 }
 0x4d2   :  { %9121 = vmatmul.mubr.msk.bf16.vlgmr.msra.gmra.mrb[20].mxu1 %vm138_vm1, %v5771_v9  ;;  %v11259_v8 = vpop.permute.xlu1 %6274 }
 0x4d3   :  { %5888 = vmatpush1.bf16.msra.mxu1 %v5790_v53  ;;  %5919 = vmatprep.mubr.bf16.mxu1 %v12250_v41  ;;  %v1785_v53 = vunpack.c.l.bf16 %v1779_v40 }
 0x4d4   :  { %5947 = vmatprep.subr.bf16.mxu1 %v11004_v45 }
 0x4d5   :  { %v11266_v21 = vpop.permute.xlu0 %6282 }
 0x4d6   :  { %v11268_v20 = vpop.permute.xlu1 %6284 }
 0x4d9   :  { %v11273_v48 = vpop.permute.xlu0 %6286 }
 0x4da   :  { %9122 = vmatmul.mubr.msk.bf16.vlgmr.msra.gmra.mrb[24].mxu1 %vm138_vm1, %v5771_v9  ;;  %v11276_v38 = vpop.permute.xlu1 %6288 }
 0x4db   :  { %5948 = vmatpush1.bf16.msra.mxu1 %v11001_v50  ;;  %5979 = vmatprep.mubr.bf16.mxu1 %v12250_v41  ;;  %v6295_v36 = vsel %vm1184_vm6, %v11273_v48, %v11276_v38 }
 0x4dc   :  { %5990 = vmatprep.subr.bf16.mxu1 %v11034_v55 }
 0x4dd   :  { %v11281_v45 = vpop.permute.xlu0 %6450 }
 0x4de   :  { %v11283_v58 = vpop.permute.xlu1 %6452 }
 0x4e1   :  { %v11285_v27 = vpop.permute.xlu0 %6448 }
 0x4e2   :  { %9123 = vmatmul.mubr.msk.bf16.vlgmr.msra.gmra.mrb[16].mxu1 %vm138_vm1, %v11231_v23  ;;  %v11292_v50 = vpop.permute.xlu1 %6446 }
 0x4e3   :  { %5991 = vmatpush1.bf16.msra.mxu1 %v11030_v63  ;;  %6022 = vmatprep.mubr.bf16.mxu1 %v12250_v41 }
 0x4e4   :  { %6033 = vmatprep.subr.bf16.mxu1 %v11055_v24 }
 0x4e5   :  { %v11294_v44 = vpop.permute.xlu0 %6454 }
 0x4e6   :  { %v11298_v55 = vpop.permute.xlu1 %6456 }
 0x4e9   :  { %v11304_v63 = vpop.permute.xlu0 %6458 }
 0x4ea   :  { %9124 = vmatmul.mubr.msk.bf16.vlgmr.msra.gmra.mrb[20].mxu1 %vm138_vm1, %v11231_v23  ;;  %v11306_v24 = vpop.permute.xlu1 %6460 }
 0x4eb   :  { %6034 = vmatpush1.bf16.msra.mxu1 %v11053_v51  ;;  %6065 = vmatprep.mubr.bf16.mxu1 %v12250_v41 }
 0x4ec   :  { %6133 = vmatprep.subr.bf16.mxu1 %v6119_v7 }
 0x4ed   :  { %v11314_v51 = vpop.permute.xlu0 %6623 }
 0x4ee   :  { %v11316_v9 = vpop.permute.xlu1 %6625 }
 0x4f1   :  { %v11318_v3 = vpop.permute.xlu0 %6621 }
 0x4f2   :  { %9125 = vmatmul.mubr.msk.bf16.vlgmr.msra.gmra.mrb[24].mxu1 %vm138_vm1, %v11231_v23  ;;  %v11327_v0 = vpop.permute.xlu1 %6627 }
 0x4f3   :  { %6134 = vmatpush1.bf16.msra.mxu1 %v6118_v12  ;;  %6165 = vmatprep.mubr.bf16.mxu1 %v12250_v41  ;;  %12251 = vst [vmem:[#allocation19_spill] sm:$0xff] %v11327_v0  ;;  %v1790_v12 = vunpack.c.h.bf16 %v11339_v61  ;;  %v6290_v61 = vsel %vm1184_vm6, %v11255_v43, %v11251_v49 }
 0x4f4   :  { %6176 = vmatprep.subr.bf16.mxu1 %v6121_v37  ;;  %v1791_v37 = vunpack.c.l.bf16 %v1782_v33 }
 0x4f5   :  { %v11329_v23 = vpop.permute.xlu0 %6629 }
 0x4f6   :  { %v11347_v25 = vpop.permute.xlu1 %6631 }
 0x4f7   :  { %12252 = vst [vmem:[#allocation20_spill] sm:$0xff] %v11347_v25 }
 0x4f9   :  { %v11365_v26 = vpop.permute.xlu0 %6633 }
 0x4fa   :  { %9126 = vmatmul.mubr.msk.bf16.vlgmr.msra.gmra.mrb[16].mxu1 %vm138_vm1, %v11239_v42  ;;  %12253 = vst [vmem:[#allocation21_spill] sm:$0xff] %v11365_v26 }
 0x4fb   :  { %6177 = vmatpush1.bf16.msra.mxu1 %v6120_v59  ;;  %6208 = vmatprep.mubr.bf16.mxu1 %v12250_v41  ;;  %v1792_v59 = vunpack.c.h.bf16 %v1782_v33  ;;  %v6292_v33 = vsel %vm1184_vm6, %v11253_v39, %v11266_v21 }
 0x4fc   :  { %6219 = vmatprep.subr.bf16.mxu1 %v6123_v6  ;;  %v1788_v6 = vunpack.c.h.bf16 %v1780_v60  ;;  %v6293_v60 = vsel %vm1184_vm6, %v11266_v21, %v11268_v20 }
 0x4fd   :  { %v3222_v4 = vpop.f32.mrb[4].mxu1 }
 0x4fe   :  { %v3224_v16 = vpop.f32.mrb[5].mxu1 }
 0x4ff   :  { %v3226_v22 = vpop.f32.mrb[6].mxu1 }
 0x500   :  { %v3228_v34 = vpop.f32.mrb[7].mxu1 }
 0x502   :  { %9127 = vmatmul.mubr.msk.bf16.vlgmr.msra.gmra.mrb[20].mxu1 %vm138_vm1, %v11239_v42 }
 0x503   :  { %6220 = vmatpush1.bf16.msra.mxu1 %v6122_v29  ;;  %6251 = vmatprep.mubr.bf16.mxu1 %v12250_v41 }
 0x504   :  { %6305 = vmatprep.subr.bf16.mxu1 %v6291_v11 }
 0x505   :  { %v3265_v57 = vpop.f32.mrb[8].mxu1 }
 0x506   :  { %v3267_v7 = vpop.f32.mrb[9].mxu1 }
 0x507   :  { %v3269_v29 = vpop.f32.mrb[10].mxu1  ;;  %v3334_v11 = vpop.permute.xlu1 %3333 }
 0x508   :  { %v3271_v47 = vpop.f32.mrb[11].mxu1  ;;  %v3341_v28 = vadd.f32 %v3334_v11, %v3222_v4  ;;  %v3342_v40 = vadd.f32 %v3334_v11, %v3224_v16  ;;  %v3343_v19 = vadd.f32 %v3334_v11, %v3265_v57  ;;  %v3344_v1 = vadd.f32 %v3334_v11, %v3267_v7 }
 0x50a   :  { %v3339_v4 = vpop.permute.xlu0 %3338  ;;  %9128 = vmatmul.mubr.msk.bf16.vlgmr.msra.gmra.mrb[24].mxu1 %vm138_vm1, %v11239_v42  ;;  %v3353_v16 = vadd.f32 %v3341_v28, %v1785_v53  ;;  %v3354_v15 = vadd.f32 %v3342_v40, %v1786_v52  ;;  %v3355_v57 = vadd.f32 %v3343_v19, %v1787_v14  ;;  %v3356_v49 = vadd.f32 %v3344_v1, %v1788_v6 }
 0x50b   :  { %v3347_v43 = vadd.f32 %v3339_v4, %v3226_v22  ;;  %v3348_v7 = vadd.f32 %v3339_v4, %v3228_v34  ;;  %v3349_v62 = vadd.f32 %v3339_v4, %v3269_v29  ;;  %v3350_v35 = vadd.f32 %v3339_v4, %v3271_v47  ;;  %6306 = vmatpush1.bf16.msra.mxu1 %v6290_v61 }
 0x50c   :  { %6348 = vmatprep.subr.bf16.mxu1 %v6293_v60  ;;  %6337 = vmatprep.mubr.bf16.mxu1 %v12250_v41  ;;  %v3365_v39 = vmax.f32 %v3353_v16, 0.0  ;;  %v3366_v21 = vmax.f32 %v3354_v15, 0.0  ;;  %v3367_v17 = vmax.f32 %v3355_v57, 0.0  ;;  %v3368_v38 = vmax.f32 %v3356_v49, 0.0 }
 0x50d   :  { %v3308_v25 = vpop.f32.mrb[12].mxu1  ;;  %v3359_v26 = vadd.f32 %v3347_v43, %v1791_v37  ;;  %v3360_v0 = vadd.f32 %v3348_v7, %v1792_v59  ;;  %v3361_v42 = vadd.f32 %v3349_v62, %v1793_v31  ;;  %v3362_v28 = vadd.f32 %v3350_v35, %v1794_v54 }
 0x50e   :  { %v3345_v53 = vadd.f32 %v3334_v11, %v3308_v25  ;;  %v3310_v19 = vpop.f32.mrb[13].mxu1  ;;  %v3377_v1 = vmul.f32 %v3365_v39, %v10320_v13  ;;  %v3378_v22 = vmul.f32 %v3366_v21, %v10324_v10  ;;  %v3379_v47 = vmul.f32 %v3367_v17, %v10342_v32 }
 0x50f   :  { %v3346_v34 = vadd.f32 %v3334_v11, %v3310_v19  ;;  %v3312_v52 = vpop.f32.mrb[14].mxu1  ;;  %v3371_v14 = vmax.f32 %v3359_v26, 0.0  ;;  %v3372_v6 = vmax.f32 %v3360_v0, 0.0  ;;  %v3373_v29 = vmax.f32 %v3361_v42, 0.0  ;;  %v12257_v19 = vld [vmem:[#allocation11_spill] sm:$0xff] }
 0x510   :  { %v3357_v40 = vadd.f32 %v3345_v53, %v1789_v2  ;;  %v3351_v61 = vadd.f32 %v3339_v4, %v3312_v52  ;;  %v3314_v60 = vpop.f32.mrb[15].mxu1  ;;  %v3374_v37 = vmax.f32 %v3362_v28, 0.0  ;;  %v3380_v31 = vmul.f32 %v3368_v38, %v10348_v46 }
 0x511   :  { %v3358_v54 = vadd.f32 %v3346_v34, %v1790_v12  ;;  %v3352_v35 = vadd.f32 %v3339_v4, %v3314_v60  ;;  %v3383_v62 = vmul.f32 %v3371_v14, %v10320_v13  ;;  %v3384_v25 = vmul.f32 %v3372_v6, %v10324_v10  ;;  %v12258_v34 = vld [vmem:[#allocation12_spill] sm:$0xff] }
 0x512   :  { %v3369_v59 = vmax.f32 %v3357_v40, 0.0  ;;  %v3363_v16 = vadd.f32 %v3351_v61, %v1795_v56  ;;  %9129 = vmatmul.mubr.msk.bf16.vlgmr.msra.gmra.mrb[16].mxu1 %vm138_vm1, %v11259_v8  ;;  %v3385_v17 = vmul.f32 %v3373_v29, %v10342_v32  ;;  %v3386_v0 = vmul.f32 %v3374_v37, %v10348_v46 }
 0x513   :  { %v3370_v2 = vmax.f32 %v3358_v54, 0.0  ;;  %v3364_v26 = vadd.f32 %v3352_v35, %v1796_v30  ;;  %6349 = vmatpush1.bf16.msra.mxu1 %v6292_v33  ;;  %6380 = vmatprep.mubr.bf16.mxu1 %v12250_v41  ;;  %v11396_v12 = vpack.c.bf16 %v3383_v62, %v3377_v1  ;;  %v11398_v11 = vpack.c.bf16 %v3384_v25, %v3378_v22  ;;  %v12259_v54 = vld [vmem:[#allocation15_spill] sm:$0xff] }
 0x514   :  { %v3375_v4 = vmax.f32 %v3363_v16, 0.0  ;;  %6391 = vmatprep.subr.bf16.mxu1 %v6295_v36  ;;  %v11400_v15 = vpack.c.bf16 %v3385_v17, %v3379_v47  ;;  %v11402_v56 = vpack.c.bf16 %v3386_v0, %v3380_v31  ;;  %v3381_v49 = vmul.f32 %v3369_v59, %v10377_v18 }
 0x515   :  { %v3376_v57 = vmax.f32 %v3364_v26, 0.0  ;;  %v3382_v30 = vmul.f32 %v3370_v2, %v10383_v5  ;;  %v6294_v36 = vsel %vm1184_vm6, %v11268_v20, %v11273_v48  ;;  %v6463_v21 = vsel %vm1357_vm7, %v11281_v45, %v11283_v58  ;;  %v12260_v26 = vld [vmem:[#allocation16_spill] sm:$0xff] }
 0x516   :  { %v3387_v43 = vmul.f32 %v3375_v4, %v10377_v18  ;;  %v6462_v38 = vsel %vm1357_vm7, %v11285_v27, %v11281_v45  ;;  %v6465_v20 = vsel %vm1357_vm7, %v11294_v44, %v11298_v55  ;;  %v6464_v48 = vsel %vm1357_vm7, %v11283_v58, %v11294_v44  ;;  %v12254_v44 = vld [vmem:[#allocation19_spill] sm:$0xff] }
 0x517   :  { %v3388_v33 = vmul.f32 %v3376_v57, %v10383_v5  ;;  %v6466_v45 = vsel %vm1357_vm7, %v11298_v55, %v11304_v63  ;;  %v6636_v58 = vsel %vm1531_vm8, %v11314_v51, %v11316_v9  ;;  %v6635_v27 = vsel %vm1531_vm8, %v11318_v3, %v11314_v51  ;;  %v12256_v51 = vld [vmem:[#allocation20_spill] sm:$0xff] }
 0x518   :  { %v11408_v7 = vpack.c.bf16 %v3387_v43, %v3381_v49  ;;  %v6638_v55 = vsel %vm1531_vm8, %v12254_v44, %v11329_v23  ;;  %v6639_v42 = vsel %vm1531_vm8, %v11329_v23, %v12256_v51  ;;  %v5247_v1 = vunpack.c.l.bf16 %v12257_v19 }
 0x519   :  { %v11410_v39 = vpack.c.bf16 %v3388_v33, %v3382_v30  ;;  %v5248_v52 = vunpack.c.l.bf16 %v12258_v34  ;;  %v5253_v29 = vunpack.c.h.bf16 %v12257_v19  ;;  %v5254_v37 = vunpack.c.h.bf16 %v12258_v34 }
 0x51a   :  { %9130 = vmatmul.mubr.msk.bf16.vlgmr.msra.gmra.mrb[20].mxu1 %vm138_vm1, %v11259_v8  ;;  %v5249_v35 = vunpack.c.l.bf16 %v12259_v54  ;;  %v6845_v25 = vunpack.c.l.bf16 %v11396_v12  ;;  %v5255_v16 = vunpack.c.h.bf16 %v12259_v54  ;;  %v6846_v0 = vunpack.c.l.bf16 %v11398_v11 }
 0x51b   :  { %6392 = vmatpush1.bf16.msra.mxu1 %v6294_v36  ;;  %6423 = vmatprep.mubr.bf16.mxu1 %v12250_v41  ;;  %v5250_v4 = vunpack.c.l.bf16 %v12260_v26  ;;  %v6851_v57 = vunpack.c.h.bf16 %v11396_v12  ;;  %v5256_v30 = vunpack.c.h.bf16 %v12260_v26 }
 0x51c   :  { %6477 = vmatprep.subr.bf16.mxu1 %v6463_v21  ;;  %v6852_v21 = vunpack.c.h.bf16 %v11398_v11 }
 0x522   :  { %9131 = vmatmul.mubr.msk.bf16.vlgmr.msra.gmra.mrb[24].mxu1 %vm138_vm1, %v11259_v8  ;;  %v6467_v8 = vsel %vm1357_vm7, %v11304_v63, %v11306_v24  ;;  %v9742_v63 = vld [vmem:[%s12201_s7 + $0x4] ss:$8 sps:$4 sm:$0xff]   ;;  %v6637_v24 = vsel %vm1531_vm8, %v11316_v9, %v12254_v44 }
 0x523   :  { %6478 = vmatpush1.bf16.msra.mxu1 %v6462_v38  ;;  %6509 = vmatprep.mubr.bf16.mxu1 %v12250_v41 }
 0x524   :  { %6520 = vmatprep.subr.bf16.mxu1 %v6465_v20  ;;  %v12261_v20 = vld [vmem:[#allocation17_spill] sm:$0xff] }
 0x525   :  { %v5257_v44 = vunpack.c.h.bf16 %v12261_v20 }
 0x52a   :  { %9132 = vmatmul.mubr.msk.bf16.vlgmr.msra.gmra.mrb[16].mxu1 %vm138_vm1, %v11292_v50 }
 0x52b   :  { %6521 = vmatpush1.bf16.msra.mxu1 %v6464_v48  ;;  %6552 = vmatprep.mubr.bf16.mxu1 %v12250_v41  ;;  %v5251_v48 = vunpack.c.l.bf16 %v12261_v20 }
 0x52c   :  { %6563 = vmatprep.subr.bf16.mxu1 %v6467_v8 }
 0x532   :  { %9133 = vmatmul.mubr.msk.bf16.vlgmr.msra.gmra.mrb[20].mxu1 %vm138_vm1, %v11292_v50 }
 0x533   :  { %6564 = vmatpush1.bf16.msra.mxu1 %v6466_v45  ;;  %6595 = vmatprep.mubr.bf16.mxu1 %v12250_v41 }
 0x534   :  { %6650 = vmatprep.subr.bf16.mxu1 %v6636_v58  ;;  %v12262_v58 = vld [vmem:[#allocation18_spill] sm:$0xff] }
 0x53a   :  { %9134 = vmatmul.mubr.msk.bf16.vlgmr.msra.gmra.mrb[24].mxu1 %vm138_vm1, %v11292_v50  ;;  %v12255_v50 = vld [vmem:[#allocation21_spill] sm:$0xff] }
 0x53b   :  { %6651 = vmatpush1.bf16.msra.mxu1 %v6635_v27  ;;  %6682 = vmatprep.mubr.bf16.mxu1 %v12250_v41  ;;  %v6640_v3 = vsel %vm1531_vm8, %v12256_v51, %v12255_v50  ;;  %v5252_v27 = vunpack.c.l.bf16 %v12262_v58  ;;  %v5258_v51 = vunpack.c.h.bf16 %v12262_v58 }
 0x53c   :  { %6693 = vmatprep.subr.bf16.mxu1 %v6638_v55 }
 0x542   :  { %9136 = vmatmul.mubr.msk.bf16.vlgmr.msra.gmra.mrb[16].mxu1 %vm138_vm1, %v9742_v63 }
 0x543   :  { %6694 = vmatpush1.bf16.msra.mxu1 %v6637_v24  ;;  %6725 = vmatprep.mubr.bf16.mxu1 %v12250_v41 }
 0x544   :  { %6736 = vmatprep.subr.bf16.mxu1 %v6640_v3  ;;  %v11475_v9 = vpop.permute.xlu1 %6795 }
 0x548   :  { %v11477_v53 = vpop.permute.xlu1 %6800 }
 0x54a   :  { %9137 = vmatmul.mubr.msk.bf16.vlgmr.msra.gmra.mrb[20].mxu1 %vm138_vm1, %v9742_v63 }
 0x54b   :  { %6737 = vmatpush1.bf16.msra.mxu1 %v6639_v42  ;;  %6768 = vmatprep.mubr.bf16.mxu1 %v12250_v41 }
 0x552   :  { %9138 = vmatmul.mubr.msk.bf16.vlgmr.msra.gmra.mrb[24].mxu1 %vm138_vm1, %v9742_v63  ;;  %v6847_v63 = vunpack.c.l.bf16 %v11400_v15 }
 0x553   :  { %8385 = vmatprep.mubr.bf16.mxu1 %v12250_v41 }
 0x615   :  { %v6684_v28 = vpop.f32.mrb[16].mxu1 }
 0x616   :  { %v6803_v22 = vadd.f32 %v11475_v9, %v6684_v28  ;;  %v6686_v47 = vpop.f32.mrb[17].mxu1 }
 0x617   :  { %v6804_v23 = vadd.f32 %v11475_v9, %v6686_v47  ;;  %v6688_v14 = vpop.f32.mrb[18].mxu1 }
 0x618   :  { %v6815_v6 = vadd.f32 %v6803_v22, %v5247_v1  ;;  %v6809_v40 = vadd.f32 %v11477_v53, %v6688_v14  ;;  %v6690_v61 = vpop.f32.mrb[19].mxu1  ;;  %v11517_v14 = vunpack.c.l.bf16 %v12250_v41 }
 0x619   :  { %v6816_v60 = vadd.f32 %v6804_v23, %v5248_v52  ;;  %v6810_v31 = vadd.f32 %v11477_v53, %v6690_v61 }
 0x61a   :  { %v6827_v62 = vmax.f32 %v6815_v6, 0.0  ;;  %v6821_v59 = vadd.f32 %v6809_v40, %v5253_v29  ;;  %v6848_v29 = vunpack.c.l.bf16 %v11402_v56 }
 0x61b   :  { %v6828_v17 = vmax.f32 %v6816_v60, 0.0  ;;  %v6822_v2 = vadd.f32 %v6810_v31, %v5254_v37  ;;  %v6853_v60 = vunpack.c.h.bf16 %v11400_v15 }
 0x61c   :  { %v6857_v49 = vadd.f32 %v6845_v25, %v6827_v62  ;;  %v6833_v43 = vmax.f32 %v6821_v59, 0.0 }
 0x61d   :  { %v6858_v33 = vadd.f32 %v6846_v0, %v6828_v17  ;;  %v6834_v36 = vmax.f32 %v6822_v2, 0.0  ;;  %v6727_v38 = vpop.f32.mrb[20].mxu1 }
 0x61e   :  { %v6805_v8 = vadd.f32 %v11475_v9, %v6727_v38  ;;  %v6729_v45 = vpop.f32.mrb[21].mxu1  ;;  %v6863_v55 = vadd.f32 %v6851_v57, %v6833_v43  ;;  %v11503_v11 = vmul.f32 %v6857_v49, %v10320_v13  ;;  %v6850_v38 = vunpack.c.l.bf16 %v11410_v39 }
 0x61f   :  { %v6864_v12 = vadd.f32 %v6852_v21, %v6834_v36  ;;  %v6806_v24 = vadd.f32 %v11475_v9, %v6729_v45  ;;  %v6731_v50 = vpop.f32.mrb[22].mxu1  ;;  %v11510_v1 = vmul.f32 %v6858_v33, %v10324_v10  ;;  %v6855_v45 = vunpack.c.h.bf16 %v11408_v7 }
 0x620   :  { %v6817_v3 = vadd.f32 %v6805_v8, %v5249_v35  ;;  %v6811_v42 = vadd.f32 %v11477_v53, %v6731_v50  ;;  %v6733_v28 = vpop.f32.mrb[23].mxu1  ;;  %v11507_v19 = vmul.f32 %v6863_v55, %v10320_v13  ;;  %v6849_v35 = vunpack.c.l.bf16 %v11408_v7 }
 0x621   :  { %v11513_v22 = vmul.f32 %v6864_v12, %v10324_v10  ;;  %v6818_v47 = vadd.f32 %v6806_v24, %v5250_v4  ;;  %v6812_v34 = vadd.f32 %v11477_v53, %v6733_v28  ;;  %v6854_v10 = vunpack.c.h.bf16 %v11402_v56 }
 0x622   :  { %v6829_v52 = vmax.f32 %v6817_v3, 0.0  ;;  %v6823_v23 = vadd.f32 %v6811_v42, %v5255_v16  ;;  %v9588_v16 = vpack.i.bf16 %v11503_v11, %v11517_v14 }
 0x623   :  { %v6830_v6 = vmax.f32 %v6818_v47, 0.0  ;;  %v6824_v40 = vadd.f32 %v6812_v34, %v5256_v30  ;;  %v9598_v12 = vpack.i.bf16 %v11513_v22, %v11507_v19 }
 0x624   :  { %v6859_v13 = vadd.f32 %v6847_v63, %v6829_v52  ;;  %v6835_v61 = vmax.f32 %v6823_v23, 0.0  ;;  %9589 = vrot.lane.b32.xlu0 %v9588_v16, %s9776_s20 }
 0x625   :  { %v6860_v37 = vadd.f32 %v6848_v29, %v6830_v6  ;;  %v6836_v31 = vmax.f32 %v6824_v40, 0.0  ;;  %v6770_v54 = vpop.f32.mrb[24].mxu1  ;;  %v8979_v6 = vld [vmem:[%s12199_s2 + $0x1] ss:$8 sm:$0xf] }
 0x626   :  { %v6865_v62 = vadd.f32 %v6853_v60, %v6835_v61  ;;  %v6807_v25 = vadd.f32 %v11475_v9, %v6770_v54  ;;  %v6772_v59 = vpop.f32.mrb[25].mxu1  ;;  %v11528_v15 = vmul.f32 %v6859_v13, %v10342_v32  ;;  %v8980_v29 = vld [vmem:[%s12199_s2 + $0x1] ss:$8 sm:$0x30] }
 0x627   :  { %v6866_v17 = vadd.f32 %v6854_v10, %v6836_v31  ;;  %v6808_v0 = vadd.f32 %v11475_v9, %v6772_v59  ;;  %v6774_v2 = vpop.f32.mrb[26].mxu1  ;;  %v11536_v49 = vmul.f32 %v6860_v37, %v10348_v46  ;;  %v52_v13 = vor.u32 %v8980_v29, %v8979_v6  ;;  %v8981_v61 = vld [vmem:[%s12199_s2 + $0x2] ss:$8 sm:$0xf] }
 0x628   :  { %v11531_v26 = vmul.f32 %v6865_v62, %v10342_v32  ;;  %v6819_v56 = vadd.f32 %v6807_v25, %v5251_v48  ;;  %v6813_v4 = vadd.f32 %v11477_v53, %v6774_v2  ;;  %v6776_v57 = vpop.f32.mrb[27].mxu1  ;;  %v9593_v32 = vpack.i.bf16 %v11510_v1, %v11503_v11  ;;  %v8982_v60 = vld [vmem:[%s12199_s2 + $0x2] ss:$8 sm:$0x30] }
 0x629   :  { %v11539_v43 = vmul.f32 %v6866_v17, %v10348_v46  ;;  %v6820_v9 = vadd.f32 %v6808_v0, %v5252_v27  ;;  %v6814_v30 = vadd.f32 %v11477_v53, %v6776_v57  ;;  %v6856_v27 = vunpack.c.h.bf16 %v11410_v39  ;;  %v12263_v37 = vld [vmem:[#allocation7_spill] sm:$0xff] }
 0x62a   :  { %v6831_v33 = vmax.f32 %v6819_v56, 0.0  ;;  %v6825_v36 = vadd.f32 %v6813_v4, %v5257_v44  ;;  %9594 = vrot.lane.b32.xlu0 %v9593_v32, %s9779_s28  ;;  %v11549_v53 = vunpack.c.h.bf16 %v12250_v41  ;;  %v9608_v55 = vpack.i.bf16 %v11528_v15, %v11510_v1 }
 0x62b   :  { %v6832_v21 = vmax.f32 %v6820_v9, 0.0  ;;  %v6826_v20 = vadd.f32 %v6814_v30, %v5258_v51  ;;  %v9613_v3 = vpack.i.bf16 %v11536_v49, %v11528_v15  ;;  %v6939_v31 = vrot.slane %v52_v13, %v12263_v37  ;;  %v12264_v9 = vld [vmem:[#allocation8_spill] sm:$0xff] }
 0x62c   :  { %v6861_v48 = vadd.f32 %v6849_v35, %v6831_v33  ;;  %v6837_v8 = vmax.f32 %v6825_v36, 0.0  ;;  %9609 = vrot.lane.b32.xlu1 %v9608_v55, %s9776_s20  ;;  %v9603_v51 = vpack.i.bf16 %v11507_v19, %v11549_v53  ;;  %v9648_v47 = vpack.i.bf16 %v11549_v53, %v11517_v14  ;;  %v12265_v33 = vld [vmem:[#allocation9_spill] sm:$0xff] }
 0x62d   :  { %v6862_v46 = vadd.f32 %v6850_v38, %v6832_v21  ;;  %v6838_v58 = vmax.f32 %v6826_v20, 0.0  ;;  %v56_v54 = vor.u32 %v8982_v60, %v8981_v61  ;;  %v6943_v32 = vrot.slane %v52_v13, %v12264_v9 }
 0x62e   :  { %v6867_v44 = vadd.f32 %v6855_v45, %v6837_v8  ;;  %v11556_v24 = vmul.f32 %v6861_v48, %v10377_v18  ;;  %9599 = vrot.lane.b32.xlu0 %v9598_v12, %s9779_s28  ;;  %v6947_v21 = vrot.slane %v52_v13, %v12265_v33  ;;  %v12266_v8 = vld [vmem:[#allocation10_spill] sm:$0xff]  ;;  %v12267_v12 = vld [vmem:[#allocation13_spill] sm:$0xff] }
 0x62f   :  { %v6868_v63 = vadd.f32 %v6856_v27, %v6838_v58  ;;  %v11564_v39 = vmul.f32 %v6862_v46, %v10383_v5  ;;  %v7061_v56 = vrot.slane %v56_v54, %v12263_v37  ;;  %v11617_v30 = vrot.slane %v56_v54, %v12264_v9 }
 0x630   :  { %v11559_v7 = vmul.f32 %v6867_v44, %v10377_v18  ;;  %9614 = vrot.lane.b32.xlu1 %v9613_v3, %s9779_s28  ;;  %v9618_v18 = vpack.i.bf16 %v11539_v43, %v11531_v26  ;;  %v9633_v28 = vpack.i.bf16 %v11556_v24, %v11536_v49  ;;  %v11620_v36 = vrot.slane %v56_v54, %v12265_v33 }
 0x631   :  { %v11567_v50 = vmul.f32 %v6868_v63, %v10383_v5  ;;  %v9628_v42 = vpack.i.bf16 %v11564_v39, %v11556_v24  ;;  %v9623_v5 = vpack.i.bf16 %v11531_v26, %v11513_v22  ;;  %v11628_v45 = vrot.slane %v52_v13, %v12266_v8 }
 0x632   :  { %9604 = vrot.lane.b32.xlu0 %v9603_v51, %s9776_s20  ;;  %v9643_v52 = vpack.i.bf16 %v11559_v7, %v11539_v43  ;;  %v11633_v63 = vrot.slane %v52_v13, %v12267_v12 }
 0x633   :  { %v9638_v34 = vpack.i.bf16 %v11567_v50, %v11559_v7  ;;  %v9653_v23 = vpack.i.bf16 %v11567_v50, %v11564_v39 }
 0x634   :  { %9619 = vrot.lane.b32.xlu1 %v9618_v18, %s9779_s28 }
 0x636   :  { %9629 = vrot.lane.b32.xlu0 %v9628_v42, %s9779_s28 }
 0x638   :  { %9624 = vrot.lane.b32.xlu1 %v9623_v5, %s9776_s20 }
 0x63a   :  { %9634 = vrot.lane.b32.xlu0 %v9633_v28, %s9776_s20  ;;  %v11636_v28 = vrot.slane %v56_v54, %v12266_v8 }
 0x63c   :  { %9639 = vrot.lane.b32.xlu1 %v9638_v34, %s9779_s28 }
 0x63e   :  { %9649 = vrot.lane.b32.xlu0 %v9648_v47, %s9779_s28  ;;  %v11639_v47 = vrot.slane %v56_v54, %v12267_v12 }
 0x640   :  { %9644 = vrot.lane.b32.xlu1 %v9643_v52, %s9776_s20 }
 0x644   :  { %9654 = vrot.lane.b32.xlu1 %v9653_v23, %s9776_s20 }
 0x696   :  { %v9590_v40 = vpop.permute.xlu0 %9589 }
 0x697   :  { %v9592_v25 = vunpack.i.h.bf16 %v9590_v40  ;;  %v9591_v59 = vunpack.i.l.bf16 %v9590_v40 }
 0x699   :  { %v7131_v38 = vsel %vm619_vm4, %v9591_v59, %v9592_v25 }
 0x69a   :  { %v7155_v5 = vmul.f32 %v7131_v38, %v7061_v56 }
 0x69c   :  { %v9595_v10 = vpop.permute.xlu0 %9594 }
 0x69d   :  { %v9597_v35 = vunpack.i.h.bf16 %v9595_v10  ;;  %v9596_v62 = vunpack.i.l.bf16 %v9595_v10 }
 0x69e   :  { %v11613_v0 = vpop.permute.xlu1 %9609 }
 0x69f   :  { %v7009_v16 = vsel %vm1011_vm5, %v9596_v62, %v9597_v35  ;;  %v9611_v20 = vunpack.i.l.bf16 %v11613_v0  ;;  %v9612_v58 = vunpack.i.h.bf16 %v11613_v0 }
 0x6a0   :  { %v7033_v17 = vmul.f32 %v7009_v16, %v6939_v31  ;;  %v9600_v2 = vpop.permute.xlu0 %9599 }
 0x6a1   :  { %v9602_v4 = vunpack.i.h.bf16 %v9600_v2  ;;  %v9601_v57 = vunpack.i.l.bf16 %v9600_v2  ;;  %v7132_v52 = vsel %vm619_vm4, %v9592_v25, %v9611_v20  ;;  %v7133_v59 = vsel %vm619_vm4, %v9611_v20, %v9612_v58 }
 0x6a2   :  { %v7045_v46 = vadd.f32 %v7033_v17, %v11503_v11  ;;  %v9615_v44 = vpop.permute.xlu1 %9614  ;;  %v12268_v11 = vld [vmem:[#allocation14_spill] sm:$0xff]  ;;  %v7156_v20 = vmul.f32 %v7132_v52, %v11617_v30 }
 0x6a3   :  { %v7015_v48 = vsel %vm1011_vm5, %v9601_v57, %v9602_v4  ;;  %v9617_v51 = vunpack.i.h.bf16 %v9615_v44  ;;  %v9616_v3 = vunpack.i.l.bf16 %v9615_v44  ;;  %v11642_v34 = vrot.slane %v52_v13, %v12268_v11 }
 0x6a4   :  { %v7039_v27 = vmul.f32 %v7015_v48, %v6939_v31  ;;  %v9605_v55 = vpop.permute.xlu0 %9604  ;;  %v11649_v62 = vadd.f32 %v7155_v5, %v7045_v46  ;;  %v11659_v38 = vrot.slane %v56_v54, %v12268_v11  ;;  %v7157_v48 = vmul.f32 %v7133_v59, %v11620_v36 }
 0x6a5   :  { %v9607_v18 = vunpack.i.h.bf16 %v9605_v55  ;;  %v9606_v42 = vunpack.i.l.bf16 %v9605_v55  ;;  %v7010_v23 = vsel %vm1011_vm5, %v9597_v35, %v9616_v3  ;;  %v7011_v6 = vsel %vm1011_vm5, %v9616_v3, %v9617_v51 }
 0x6a6   :  { %v7051_v40 = vadd.f32 %v7039_v27, %v11507_v19  ;;  %v7034_v61 = vmul.f32 %v7010_v23, %v6943_v32  ;;  %v7035_v60 = vmul.f32 %v7011_v6, %v6947_v21  ;;  %v9620_v10 = vpop.permute.xlu1 %9619 }
 0x6a7   :  { %v7137_v29 = vsel %vm619_vm4, %v9606_v42, %v9607_v18  ;;  %v9622_v13 = vunpack.i.h.bf16 %v9620_v10  ;;  %v9621_v16 = vunpack.i.l.bf16 %v9620_v10 }
 0x6a8   :  { %v7161_v31 = vmul.f32 %v7137_v29, %v7061_v56  ;;  %v9630_v17 = vpop.permute.xlu0 %9629  ;;  %v7046_v25 = vadd.f32 %v7034_v61, %v11510_v1  ;;  %v7047_v35 = vadd.f32 %v7035_v60, %v11528_v15 }
 0x6a9   :  { %v9632_v2 = vunpack.i.h.bf16 %v9630_v17  ;;  %v7016_v19 = vsel %vm1011_vm5, %v9602_v4, %v9621_v16  ;;  %v7017_v57 = vsel %vm1011_vm5, %v9621_v16, %v9622_v13  ;;  %v9631_v56 = vunpack.i.l.bf16 %v9630_v17 }
 0x6aa   :  { %v11654_v0 = vadd.f32 %v7161_v31, %v7051_v40  ;;  %v7040_v46 = vmul.f32 %v7016_v19, %v6943_v32  ;;  %v9625_v27 = vpop.permute.xlu1 %9624  ;;  %v7041_v1 = vmul.f32 %v7017_v57, %v6947_v21  ;;  %v11665_v4 = vadd.f32 %v7156_v20, %v7046_v25 }
 0x6ab   :  { %v7012_v15 = vsel %vm1011_vm5, %v9617_v51, %v9631_v56  ;;  %v7013_v44 = vsel %vm1011_vm5, %v9631_v56, %v9632_v2  ;;  %v9627_v55 = vunpack.i.h.bf16 %v9625_v27  ;;  %v11667_v42 = vadd.f32 %v7157_v48, %v7047_v35 }
 0x6ac   :  { %v9635_v3 = vpop.permute.xlu0 %9634  ;;  %v7052_v54 = vadd.f32 %v7040_v46, %v11513_v22  ;;  %v9626_v5 = vunpack.i.l.bf16 %v9625_v27  ;;  %v7036_v52 = vmul.f32 %v7012_v15, %v11628_v45  ;;  %v7037_v23 = vmul.f32 %v7013_v44, %v11633_v63 }
 0x6ad   :  { %v9637_v32 = vunpack.i.h.bf16 %v9635_v3  ;;  %v9636_v6 = vunpack.i.l.bf16 %v9635_v3  ;;  %v7053_v21 = vadd.f32 %v7041_v1, %v11531_v26  ;;  %v9658_v1 = vpack.i.bf16 %v11649_v62, %v11517_v14 }
 0x6ae   :  { %v7138_v51 = vsel %vm619_vm4, %v9607_v18, %v9626_v5  ;;  %v7139_v29 = vsel %vm619_vm4, %v9626_v5, %v9627_v55  ;;  %v9640_v40 = vpop.permute.xlu1 %9639 }
 0x6af   :  { %v7162_v61 = vmul.f32 %v7138_v51, %v11617_v30  ;;  %v7163_v60 = vmul.f32 %v7139_v29, %v11620_v36  ;;  %v7134_v22 = vsel %vm619_vm4, %v9612_v58, %v9636_v6  ;;  %v7135_v31 = vsel %vm619_vm4, %v9636_v6, %v9637_v32  ;;  %9659 = vrot.lane.b32.xlu1 %v9658_v1, %s9771_s21 }
 0x6b0   :  { %v9650_v10 = vpop.permute.xlu0 %9649  ;;  %v7158_v59 = vmul.f32 %v7134_v22, %v11636_v28  ;;  %v7159_v16 = vmul.f32 %v7135_v31, %v11639_v47  ;;  %v9642_v17 = vunpack.i.h.bf16 %v9640_v40  ;;  %v9641_v26 = vunpack.i.l.bf16 %v9640_v40 }
 0x6b1   :  { %v11681_v25 = vadd.f32 %v7162_v61, %v7052_v54  ;;  %v11683_v18 = vadd.f32 %v7163_v60, %v7053_v21  ;;  %v9652_v35 = vunpack.i.h.bf16 %v9650_v10  ;;  %v9651_v19 = vunpack.i.l.bf16 %v9650_v10 }
 0x6b2   :  { %v7048_v30 = vadd.f32 %v7036_v52, %v11536_v49  ;;  %v7049_v36 = vadd.f32 %v7037_v23, %v11556_v24  ;;  %v7018_v58 = vsel %vm1011_vm5, %v9622_v13, %v9641_v26  ;;  %v7019_v57 = vsel %vm1011_vm5, %v9641_v26, %v9642_v17  ;;  %v9645_v56 = vpop.permute.xlu1 %9644 }
 0x6b3   :  { %v7042_v20 = vmul.f32 %v7018_v58, %v11628_v45  ;;  %v7043_v48 = vmul.f32 %v7019_v57, %v11633_v63  ;;  %v7020_v46 = vsel %vm1011_vm5, %v9642_v17, %v9652_v35  ;;  %v7014_v27 = vsel %vm1011_vm5, %v9632_v2, %v9651_v19  ;;  %v8985_v19 = vld [vmem:[%s12199_s2 + $0x4] ss:$8 sm:$0xf] }
 0x6b4   :  { %v9647_v15 = vunpack.i.h.bf16 %v9645_v56  ;;  %v11695_v49 = vadd.f32 %v7158_v59, %v7048_v30  ;;  %v11697_v24 = vadd.f32 %v7159_v16, %v7049_v36  ;;  %v9646_v45 = vunpack.i.l.bf16 %v9645_v56  ;;  %v8986_v30 = vld [vmem:[%s12199_s2 + $0x4] ss:$8 sm:$0x30] }
 0x6b5   :  { %v7054_v13 = vadd.f32 %v7042_v20, %v11539_v43  ;;  %v7055_v44 = vadd.f32 %v7043_v48, %v11559_v7  ;;  %v7044_v3 = vmul.f32 %v7020_v46, %v11642_v34  ;;  %v7038_v2 = vmul.f32 %v7014_v27, %v11642_v34 }
 0x6b6   :  { %v9655_v63 = vpop.permute.xlu1 %9654  ;;  %v7140_v52 = vsel %vm619_vm4, %v9627_v55, %v9646_v45  ;;  %v7141_v23 = vsel %vm619_vm4, %v9646_v45, %v9647_v15  ;;  %v9663_v6 = vpack.i.bf16 %v11665_v4, %v11649_v62  ;;  %v9668_v43 = vpack.i.bf16 %v11654_v0, %v11667_v42 }
 0x6b7   :  { %v9657_v54 = vunpack.i.h.bf16 %v9655_v63  ;;  %v9656_v5 = vunpack.i.l.bf16 %v9655_v63  ;;  %v7164_v7 = vmul.f32 %v7140_v52, %v11636_v28  ;;  %v7165_v21 = vmul.f32 %v7141_v23, %v11639_v47 }
 0x6b8   :  { %9664 = vrot.lane.b32.xlu0 %v9663_v6, %s9783_s29  ;;  %9669 = vrot.lane.b32.xlu1 %v9668_v43, %s9783_s29  ;;  %v7056_v40 = vadd.f32 %v7044_v3, %v11567_v50  ;;  %v7050_v61 = vadd.f32 %v7038_v2, %v11564_v39  ;;  %v9673_v47 = vpack.i.bf16 %v11683_v18, %v11681_v25 }
 0x6b9   :  { %v7136_v51 = vsel %vm619_vm4, %v9637_v32, %v9656_v5  ;;  %v7142_v34 = vsel %vm619_vm4, %v9647_v15, %v9657_v54  ;;  %v11720_v60 = vadd.f32 %v7164_v7, %v7054_v13  ;;  %v11722_v28 = vadd.f32 %v7165_v21, %v7055_v44 }
 0x6ba   :  { %v7160_v29 = vmul.f32 %v7136_v51, %v11659_v38  ;;  %v7166_v55 = vmul.f32 %v7142_v34, %v11659_v38  ;;  %v9683_v32 = vpack.i.bf16 %v11681_v25, %v11654_v0  ;;  %v9678_v39 = vpack.i.bf16 %v11549_v53, %v11665_v4 }
 0x6bb   :  { %v9698_v50 = vpack.i.bf16 %v11722_v28, %v11720_v60  ;;  %v9688_v31 = vpack.i.bf16 %v11697_v24, %v11695_v49  ;;  %v9703_v10 = vpack.i.bf16 %v11720_v60, %v11683_v18  ;;  %v9693_v59 = vpack.i.bf16 %v11695_v49, %v11667_v42 }
 0x6bc   :  { %v11728_v22 = vadd.f32 %v7160_v29, %v7050_v61  ;;  %v11730_v38 = vadd.f32 %v7166_v55, %v7056_v40  ;;  %9674 = vrot.lane.b32.xlu0 %v9673_v47, %s9783_s29  ;;  %9684 = vrot.lane.b32.xlu1 %v9683_v32, %s9771_s21  ;;  %v11773_v57 = vor.u32 %v8986_v30, %v8985_v19 }
 0x6be   :  { %v9713_v16 = vpack.i.bf16 %v11549_v53, %v11730_v38  ;;  %v9708_v17 = vpack.i.bf16 %v11517_v14, %v11728_v22  ;;  %v9723_v26 = vpack.i.bf16 %v11730_v38, %v11722_v28  ;;  %v9718_v35 = vpack.i.bf16 %v11728_v22, %v11697_v24  ;;  %v8983_v53 = vld [vmem:[%s12199_s2 + $0x3] ss:$8 sm:$0xf] }
 0x6bf   :  { %v8984_v14 = vld [vmem:[%s12199_s2 + $0x3] ss:$8 sm:$0x30]  ;;  %v7359_v45 = vrot.slane %v11773_v57, %v12263_v37  ;;  %v7363_v2 = vrot.slane %v11773_v57, %v12264_v9  ;;  %v11792_v55 = vrot.slane %v11773_v57, %v12265_v33 }
 0x6c0   :  { %9679 = vrot.lane.b32.xlu0 %v9678_v39, %s9771_s21  ;;  %9699 = vrot.lane.b32.xlu1 %v9698_v50, %s9783_s29  ;;  %v60_v58 = vor.u32 %v8984_v14, %v8983_v53 }
 0x6c2   :  { %v7237_v56 = vrot.slane %v60_v58, %v12263_v37  ;;  %v7241_v44 = vrot.slane %v60_v58, %v12264_v9  ;;  %v7245_v6 = vrot.slane %v60_v58, %v12265_v33  ;;  %v7249_v43 = vrot.slane %v60_v58, %v12266_v8 }
 0x6c3   :  { %v11796_v9 = vrot.slane %v11773_v57, %v12266_v8  ;;  %v11802_v32 = vrot.slane %v60_v58, %v12267_v12  ;;  %v11806_v33 = vrot.slane %v60_v58, %v12268_v11 }
 0x6c4   :  { %9689 = vrot.lane.b32.xlu0 %v9688_v31, %s9783_s29  ;;  %9704 = vrot.lane.b32.xlu1 %v9703_v10, %s9771_s21 }
 0x6c8   :  { %9694 = vrot.lane.b32.xlu0 %v9693_v59, %s9771_s21  ;;  %9714 = vrot.lane.b32.xlu1 %v9713_v16, %s9783_s29 }
 0x6cc   :  { %9709 = vrot.lane.b32.xlu0 %v9708_v17, %s9783_s29  ;;  %9724 = vrot.lane.b32.xlu1 %v9723_v26, %s9771_s21 }
 0x6d0   :  { %9719 = vrot.lane.b32.xlu0 %v9718_v35, %s9771_s21 }
 0x721   :  { %v9660_v36 = vpop.permute.xlu1 %9659 }
 0x722   :  { %v9662_v15 = vunpack.i.h.bf16 %v9660_v36  ;;  %v9661_v13 = vunpack.i.l.bf16 %v9660_v36 }
 0x724   :  { %v7429_v34 = vsel %vm125_vm0, %v9661_v13, %v9662_v15 }
 0x725   :  { %v7453_v59 = vmul.f32 %v7429_v34, %v7359_v45  ;;  %v7379_v34 = vrot.slane %v11773_v57, %v12268_v11 }
 0x72a   :  { %v9665_v20 = vpop.permute.xlu0 %9664  ;;  %v11776_v48 = vpop.permute.xlu1 %9669 }
 0x72b   :  { %v9667_v46 = vunpack.i.h.bf16 %v9665_v20  ;;  %v9666_v27 = vunpack.i.l.bf16 %v9665_v20  ;;  %v9671_v1 = vunpack.i.l.bf16 %v11776_v48  ;;  %v9672_v5 = vunpack.i.h.bf16 %v11776_v48 }
 0x72d   :  { %v7307_v63 = vsel %vm1357_vm7, %v9666_v27, %v9667_v46  ;;  %v7308_v3 = vsel %vm1357_vm7, %v9667_v46, %v9671_v1 }
 0x72e   :  { %v7331_v54 = vmul.f32 %v7307_v63, %v7237_v56  ;;  %v9675_v52 = vpop.permute.xlu0 %9674  ;;  %v9685_v23 = vpop.permute.xlu1 %9684  ;;  %v7332_v29 = vmul.f32 %v7308_v3, %v7241_v44 }
 0x72f   :  { %v9677_v7 = vunpack.i.h.bf16 %v9675_v52  ;;  %v9676_v21 = vunpack.i.l.bf16 %v9675_v52  ;;  %v9687_v51 = vunpack.i.h.bf16 %v9685_v23  ;;  %v9686_v37 = vunpack.i.l.bf16 %v9685_v23 }
 0x730   :  { %v7343_v40 = vadd.f32 %v7331_v54, %v11649_v62  ;;  %v11810_v62 = vrot.slane %v11773_v57, %v12267_v12  ;;  %v7344_v26 = vadd.f32 %v7332_v29, %v11665_v4 }
 0x731   :  { %v7313_v61 = vsel %vm1357_vm7, %v9672_v5, %v9676_v21  ;;  %v7314_v47 = vsel %vm1357_vm7, %v9676_v21, %v9677_v7  ;;  %v7436_v31 = vsel %vm125_vm0, %v9686_v37, %v9687_v51 }
 0x732   :  { %v7337_v39 = vmul.f32 %v7313_v61, %v7237_v56  ;;  %v7338_v50 = vmul.f32 %v7314_v47, %v7241_v44  ;;  %v9680_v10 = vpop.permute.xlu0 %9679  ;;  %v9700_v17 = vpop.permute.xlu1 %9699  ;;  %v7465_v19 = vadd.f32 %v7453_v59, %v7343_v40  ;;  %v7460_v30 = vmul.f32 %v7436_v31, %v7363_v2 }
 0x733   :  { %v9682_v8 = vunpack.i.h.bf16 %v9680_v10  ;;  %v9681_v16 = vunpack.i.l.bf16 %v9680_v10  ;;  %v9702_v53 = vunpack.i.h.bf16 %v9700_v17  ;;  %v9701_v14 = vunpack.i.l.bf16 %v9700_v17 }
 0x734   :  { %v7350_v35 = vadd.f32 %v7338_v50, %v11681_v25  ;;  %v7349_v56 = vadd.f32 %v7337_v39, %v11654_v0 }
 0x735   :  { %v7430_v36 = vsel %vm125_vm0, %v9662_v15, %v9681_v16  ;;  %v7435_v58 = vsel %vm125_vm0, %v9682_v8, %v9686_v37  ;;  %v7315_v46 = vsel %vm1357_vm7, %v9677_v7, %v9701_v14  ;;  %v7316_v4 = vsel %vm1357_vm7, %v9701_v14, %v9702_v53 }
 0x736   :  { %v7454_v20 = vmul.f32 %v7430_v36, %v7363_v2  ;;  %v7459_v48 = vmul.f32 %v7435_v58, %v7359_v45  ;;  %v9690_v12 = vpop.permute.xlu0 %9689  ;;  %v7472_v27 = vadd.f32 %v7460_v30, %v7350_v35  ;;  %v9705_v44 = vpop.permute.xlu1 %9704  ;;  %v7339_v54 = vmul.f32 %v7315_v46, %v7245_v6  ;;  %v11824_v45 = vld [vmem:[%s12202_s8] sm:$0xff] }
 0x737   :  { %v9692_v13 = vunpack.i.h.bf16 %v9690_v12  ;;  %v9691_v25 = vunpack.i.l.bf16 %v9690_v12  ;;  %v9707_v5 = vunpack.i.h.bf16 %v9705_v44  ;;  %v7340_v15 = vmul.f32 %v7316_v4, %v7249_v43 }
 0x738   :  { %v7466_v63 = vadd.f32 %v7454_v20, %v7344_v26  ;;  %v7471_v3 = vadd.f32 %v7459_v48, %v7349_v56  ;;  %v9706_v2 = vunpack.i.l.bf16 %v9705_v44  ;;  %v11842_v11 = vcombine.low %v11824_v45, %v11824_v45 }
 0x739   :  { %v7309_v52 = vsel %vm1357_vm7, %v9671_v1, %v9691_v25  ;;  %v7310_v0 = vsel %vm1357_vm7, %v9691_v25, %v9692_v13  ;;  %v7351_v57 = vadd.f32 %v7339_v54, %v11683_v18 }
 0x73a   :  { %v11826_v23 = vpack.c.bf16 %v7471_v3, %v7465_v19  ;;  %v11828_v7 = vpack.c.bf16 %v7472_v27, %v7466_v63  ;;  %v7333_v21 = vmul.f32 %v7309_v52, %v7245_v6  ;;  %v9695_v37 = vpop.permute.xlu0 %9694  ;;  %v7334_v29 = vmul.f32 %v7310_v0, %v7249_v43  ;;  %v9715_v47 = vpop.permute.xlu1 %9714 }
 0x73b   :  { %v7437_v1 = vsel %vm125_vm0, %v9687_v51, %v9706_v2  ;;  %v7438_v40 = vsel %vm125_vm0, %v9706_v2, %v9707_v5  ;;  %v9697_v61 = vunpack.i.h.bf16 %v9695_v37  ;;  %v9696_v31 = vunpack.i.l.bf16 %v9695_v37 }
 0x73c   :  { %v7461_v39 = vmul.f32 %v7437_v1, %v11792_v55  ;;  %v7462_v50 = vmul.f32 %v7438_v40, %v11796_v9  ;;  %7513 = vrot.lane.b32.xlu1 %v11828_v7, %s9771_s21  ;;  %7511 = vrot.lane.b32.xlu0 %v11826_v23, %s9771_s21  ;;  %v7352_v6 = vadd.f32 %v7340_v15, %v11720_v60  ;;  %v9717_v43 = vunpack.i.h.bf16 %v9715_v47 }
 0x73d   :  { %v9716_v51 = vunpack.i.l.bf16 %v9715_v47  ;;  %v7345_v10 = vadd.f32 %v7333_v21, %v11667_v42  ;;  %v7346_v59 = vadd.f32 %v7334_v29, %v11695_v49  ;;  %v7431_v8 = vsel %vm125_vm0, %v9681_v16, %v9696_v31 }
 0x73e   :  { %v7432_v17 = vsel %vm125_vm0, %v9696_v31, %v9697_v61  ;;  %v9710_v26 = vpop.permute.xlu0 %9709  ;;  %v7455_v35 = vmul.f32 %v7431_v8, %v11792_v55  ;;  %v9725_v60 = vpop.permute.xlu1 %9724  ;;  %v7473_v30 = vadd.f32 %v7461_v39, %v7351_v57  ;;  %v7474_v36 = vadd.f32 %v7462_v50, %v7352_v6 }
 0x73f   :  { %v7456_v14 = vmul.f32 %v7432_v17, %v11796_v9  ;;  %v7317_v19 = vsel %vm1357_vm7, %v9702_v53, %v9716_v51  ;;  %v7318_v18 = vsel %vm1357_vm7, %v9716_v51, %v9717_v43  ;;  %v9712_v58 = vunpack.i.h.bf16 %v9710_v26 }
 0x740   :  { %v9711_v42 = vunpack.i.l.bf16 %v9710_v26  ;;  %7500 = vrot.lane.b32.xlu1 %v11842_v11, %s9772_s16  ;;  %7509 = vrot.lane.b32.xlu0 %v12250_v41, %s9771_s21  ;;  %v7467_v49 = vadd.f32 %v7455_v35, %v7345_v10  ;;  %v9727_v55 = vunpack.i.h.bf16 %v9725_v60  ;;  %v9726_v56 = vunpack.i.l.bf16 %v9725_v60 }
 0x741   :  { %v7468_v16 = vadd.f32 %v7456_v14, %v7346_v59  ;;  %v7341_v9 = vmul.f32 %v7317_v19, %v11802_v32  ;;  %v7342_v53 = vmul.f32 %v7318_v18, %v11806_v33 }
 0x742   :  { %v7311_v20 = vsel %vm1357_vm7, %v9692_v13, %v9711_v42  ;;  %v7312_v48 = vsel %vm1357_vm7, %v9711_v42, %v9712_v58  ;;  %v9720_v46 = vpop.permute.xlu0 %9719  ;;  %v11862_v12 = vpack.c.bf16 %v7473_v30, %v7467_v49  ;;  %v7439_v44 = vsel %vm125_vm0, %v9707_v5, %v9726_v56 }
 0x743   :  { %v11864_v27 = vpack.c.bf16 %v7474_v36, %v7468_v16  ;;  %v7335_v4 = vmul.f32 %v7311_v20, %v11802_v32  ;;  %v7336_v25 = vmul.f32 %v7312_v48, %v11806_v33  ;;  %v7440_v63 = vsel %vm125_vm0, %v9726_v56, %v9727_v55 }
 0x744   :  { %v9722_v3 = vunpack.i.h.bf16 %v9720_v46  ;;  %v9721_v54 = vunpack.i.l.bf16 %v9720_v46  ;;  %v7463_v15 = vmul.f32 %v7439_v44, %v11810_v62  ;;  %v7464_v13 = vmul.f32 %v7440_v63, %v7379_v34  ;;  %7515 = vrot.lane.b32.xlu0 %v11862_v12, %s9771_s21 }
 0x745   :  { %7517 = vrot.lane.b32.xlu1 %v11864_v27, %s9771_s21  ;;  %v7353_v52 = vadd.f32 %v7341_v9, %v11722_v28  ;;  %v7354_v0 = vadd.f32 %v7342_v53, %v11730_v38  ;;  %v7347_v5 = vadd.f32 %v7335_v4, %v11697_v24  ;;  %v7348_v2 = vadd.f32 %v7336_v25, %v11728_v22 }
 0x746   :  { %v7433_v32 = vsel %vm125_vm0, %v9697_v61, %v9721_v54  ;;  %v7434_v33 = vsel %vm125_vm0, %v9721_v54, %v9722_v3 }
 0x747   :  { %v7457_v21 = vmul.f32 %v7433_v32, %v11810_v62  ;;  %v7458_v37 = vmul.f32 %v7434_v33, %v7379_v34  ;;  %v7475_v29 = vadd.f32 %v7463_v15, %v7353_v52  ;;  %v7476_v1 = vadd.f32 %v7464_v13, %v7354_v0 }
 0x749   :  { %v7469_v40 = vadd.f32 %v7457_v21, %v7347_v5  ;;  %v7470_v28 = vadd.f32 %v7458_v37, %v7348_v2 }
 0x74b   :  { %v11882_v47 = vpack.c.bf16 %v7475_v29, %v7469_v40  ;;  %v11884_v38 = vpack.c.bf16 %v7476_v1, %v7470_v28 }
 0x74d   :  { %7521 = vrot.lane.b32.xlu1 %v11884_v38, %s9771_s21  ;;  %7519 = vrot.lane.b32.xlu0 %v11882_v47, %s9771_s21 }
 0x751   :  { %7665 = vrot.lane.b32.xlu1 %v11828_v7, %s9773_s17  ;;  %7663 = vrot.lane.b32.xlu0 %v11826_v23, %s9773_s17 }
 0x755   :  { %7667 = vrot.lane.b32.xlu1 %v11862_v12, %s9773_s17  ;;  %7661 = vrot.lane.b32.xlu0 %v12250_v41, %s9773_s17 }
 0x759   :  { %7671 = vrot.lane.b32.xlu1 %v11882_v47, %s9773_s17  ;;  %7669 = vrot.lane.b32.xlu0 %v11864_v27, %s9773_s17 }
 0x75d   :  { %7817 = vrot.lane.b32.xlu1 %v11826_v23, %s9774_s18  ;;  %7673 = vrot.lane.b32.xlu0 %v11884_v38, %s9773_s17 }
 0x761   :  { %7815 = vrot.lane.b32.xlu1 %v12250_v41, %s9774_s18  ;;  %7819 = vrot.lane.b32.xlu0 %v11828_v7, %s9774_s18 }
 0x765   :  { %7821 = vrot.lane.b32.xlu1 %v11862_v12, %s9774_s18  ;;  %7813 = vrot.lane.b32.xlu0 %v11842_v11, %s9775_s19 }
 0x769   :  { %7825 = vrot.lane.b32.xlu1 %v11882_v47, %s9774_s18  ;;  %7823 = vrot.lane.b32.xlu0 %v11864_v27, %s9774_s18 }
 0x76d   :  { %7977 = vrot.lane.b32.xlu1 %v11826_v23, %s9776_s20  ;;  %7827 = vrot.lane.b32.xlu0 %v11884_v38, %s9774_s18 }
 0x771   :  { %7975 = vrot.lane.b32.xlu1 %v12250_v41, %s9776_s20  ;;  %7979 = vrot.lane.b32.xlu0 %v11828_v7, %s9776_s20 }
 0x775   :  { %7981 = vrot.lane.b32.xlu1 %v11862_v12, %s9776_s20  ;;  %7973 = vrot.lane.b32.xlu0 %v11842_v11, %s9777_s22 }
 0x779   :  { %7985 = vrot.lane.b32.xlu1 %v11882_v47, %s9776_s20  ;;  %7983 = vrot.lane.b32.xlu0 %v11864_v27, %s9776_s20 }
 0x77d   :  { %8133 = vrot.lane.b32.xlu1 %v11842_v11, %s9778_s27  ;;  %7987 = vrot.lane.b32.xlu0 %v11884_v38, %s9776_s20 }
 0x781   :  { %8287 = vrot.lane.b32.xlu1 %v11862_v12, %s9779_s28  ;;  %8285 = vrot.lane.b32.xlu0 %v11828_v7, %s9779_s28 }
 0x785   :  { %8274 = vrot.lane.b32.xlu1 %v11842_v11, %s9780_s24  ;;  %8283 = vrot.lane.b32.xlu0 %v11826_v23, %s9779_s28 }
 0x789   :  { %8295 = vrot.lane.b32.xlu1 %v12250_v41, %s9779_s28  ;;  %8445 = vrot.lane.b32.xlu0 %v11828_v7, %s9781_s25 }
 0x78d   :  { %8447 = vrot.lane.b32.xlu1 %v11862_v12, %s9781_s25  ;;  %8443 = vrot.lane.b32.xlu0 %v11826_v23, %s9781_s25 }
 0x791   :  { %8291 = vrot.lane.b32.xlu1 %v11882_v47, %s9779_s28  ;;  %8289 = vrot.lane.b32.xlu0 %v11864_v27, %s9779_s28 }
 0x795   :  { %8441 = vrot.lane.b32.xlu1 %v11842_v11, %s9782_s26  ;;  %8605 = vrot.lane.b32.xlu0 %v11828_v7, %s9783_s29 }
 0x799   :  { %8455 = vrot.lane.b32.xlu1 %v12250_v41, %s9781_s25  ;;  %8603 = vrot.lane.b32.xlu0 %v11826_v23, %s9783_s29 }
 0x79d   :  { %8607 = vrot.lane.b32.xlu1 %v11862_v12, %s9783_s29  ;;  %8293 = vrot.lane.b32.xlu0 %v11884_v38, %s9779_s28 }
 0x7a1   :  { %8451 = vrot.lane.b32.xlu1 %v11882_v47, %s9781_s25  ;;  %8449 = vrot.lane.b32.xlu0 %v11864_v27, %s9781_s25 }
 0x7a5   :  { %8601 = vrot.lane.b32.xlu1 %v11842_v11, %s12248_s5  ;;  %8453 = vrot.lane.b32.xlu0 %v11884_v38, %s9781_s25 }
 0x7a9   :  { %8611 = vrot.lane.b32.xlu1 %v11882_v47, %s9783_s29  ;;  %8609 = vrot.lane.b32.xlu0 %v11864_v27, %s9783_s29 }
 0x7ad   :  { %8615 = vrot.lane.b32.xlu1 %v12250_v41, %s9783_s29  ;;  %8765 = vrot.lane.b32.xlu0 %v11828_v7, %s12249_s23 }
 0x7ae   :  { %v7514_v24 = vpop.permute.xlu1 %7513  ;;  %v7512_v22 = vpop.permute.xlu0 %7511 }
 0x7af   :  { %v7524_v62 = vsel %vm125_vm0, %v7512_v22, %v7514_v24 }
 0x7b0   :  { %7538 = vmatprep.subr.bf16.mxu0 %v7524_v62 }
 0x7b1   :  { %8767 = vrot.lane.b32.xlu1 %v11862_v12, %s12249_s23  ;;  %8763 = vrot.lane.b32.xlu0 %v11826_v23, %s12249_s23 }
 0x7b2   :  { %v7501_v34 = vpop.permute.xlu1 %7500  ;;  %v7510_v61 = vpop.permute.xlu0 %7509 }
 0x7b3   :  { %v7523_v39 = vsel %vm125_vm0, %v7510_v61, %v7512_v22 }
 0x7b4   :  { %7539 = vmatpush1.bf16.msra.mxu0 %v7523_v39 }
 0x7b5   :  { %8769 = vrot.lane.b32.xlu1 %v11864_v27, %s12249_s23  ;;  %8613 = vrot.lane.b32.xlu0 %v11884_v38, %s9783_s29 }
 0x7b6   :  { %v7516_v31 = vpop.permute.xlu0 %7515 }
 0x7b7   :  { %v7518_v50 = vpop.permute.xlu1 %7517  ;;  %9140 = vmatmul.mubr.msk.bf16.vlgmr.msra.gmra.mrb[32].mxu0 %vm138_vm1, %v7501_v34  ;;  %v7525_v11 = vsel %vm125_vm0, %v7514_v24, %v7516_v31 }
 0x7b8   :  { %7611 = vmatprep.mubr.bf16.mxu0 %v12250_v41  ;;  %v7526_v57 = vsel %vm125_vm0, %v7516_v31, %v7518_v50 }
 0x7b9   :  { %8773 = vrot.lane.b32.xlu1 %v11884_v38, %s12249_s23  ;;  %8771 = vrot.lane.b32.xlu0 %v11882_v47, %s12249_s23 }
 0x7ba   :  { %7579 = vmatprep.subr.bf16.mxu0 %v7526_v57 }
 0x7bb   :  { %7580 = vmatpush1.bf16.msra.mxu0 %v7525_v11 }
 0x7bd   :  { %8775 = vrot.lane.b32.xlu0 %v12250_v41, %s12249_s23 }
 0x7bf   :  { %v7522_v6 = vpop.permute.xlu1 %7521  ;;  %v7520_v43 = vpop.permute.xlu0 %7519  ;;  %9141 = vmatmul.mubr.msk.bf16.vlgmr.msra.gmra.mrb[36].mxu0 %vm138_vm1, %v7501_v34 }
 0x7c0   :  { %v7527_v51 = vsel %vm125_vm0, %v7518_v50, %v7520_v43  ;;  %v7528_v10 = vsel %vm125_vm0, %v7520_v43, %v7522_v6  ;;  %7652 = vmatprep.mubr.bf16.mxu0 %v12250_v41 }
 0x7c1   :  { %7620 = vmatprep.subr.bf16.mxu0 %v7528_v10 }
 0x7c2   :  { %7621 = vmatpush1.bf16.msra.mxu0 %v7527_v51 }
 0x7c3   :  { %v7666_v59 = vpop.permute.xlu1 %7665  ;;  %v7664_v8 = vpop.permute.xlu0 %7663 }
 0x7c4   :  { %v7676_v17 = vsel %vm285_vm2, %v7664_v8, %v7666_v59 }
 0x7c5   :  { %7690 = vmatprep.subr.bf16.mxu0 %v7676_v17 }
 0x7c7   :  { %v7668_v26 = vpop.permute.xlu1 %7667  ;;  %v7662_v35 = vpop.permute.xlu0 %7661  ;;  %9142 = vmatmul.mubr.msk.bf16.vlgmr.msra.gmra.mrb[40].mxu0 %vm138_vm1, %v7501_v34 }
 0x7c8   :  { %v7675_v14 = vsel %vm285_vm2, %v7662_v35, %v7664_v8  ;;  %7722 = vmatprep.mubr.bf16.mxu0 %v12250_v41  ;;  %v7677_v30 = vsel %vm285_vm2, %v7666_v59, %v7668_v26 }
 0x7c9   :  { %7691 = vmatpush1.bf16.msra.mxu0 %v7675_v14 }
 0x7cb   :  { %v7672_v19 = vpop.permute.xlu1 %7671  ;;  %v7670_v18 = vpop.permute.xlu0 %7669 }
 0x7cc   :  { %v7678_v60 = vsel %vm285_vm2, %v7668_v26, %v7670_v18  ;;  %v7679_v55 = vsel %vm285_vm2, %v7670_v18, %v7672_v19 }
 0x7cd   :  { %7731 = vmatprep.subr.bf16.mxu0 %v7678_v60 }
 0x7cf   :  { %v7818_v36 = vpop.permute.xlu1 %7817  ;;  %v7674_v58 = vpop.permute.xlu0 %7673  ;;  %9143 = vmatmul.mubr.msk.bf16.vlgmr.msra.gmra.mrb[44].mxu0 %vm138_vm1, %v11824_v45 }
 0x7d0   :  { %7732 = vmatpush1.bf16.msra.mxu0 %v7677_v30  ;;  %v7680_v42 = vsel %vm285_vm2, %v7672_v19, %v7674_v58  ;;  %7763 = vmatprep.mubr.bf16.mxu0 %v12250_v41 }
 0x7d1   :  { %7772 = vmatprep.subr.bf16.mxu0 %v7680_v42 }
 0x7d3   :  { %v7816_v49 = vpop.permute.xlu1 %7815  ;;  %v7820_v16 = vpop.permute.xlu0 %7819 }
 0x7d4   :  { %v7830_v53 = vsel %vm446_vm3, %v7818_v36, %v7820_v16  ;;  %v7829_v46 = vsel %vm446_vm3, %v7816_v49, %v7818_v36 }
 0x7d7   :  { %v7822_v56 = vpop.permute.xlu1 %7821  ;;  %v7814_v9 = vpop.permute.xlu0 %7813  ;;  %9144 = vmatmul.mubr.msk.bf16.vlgmr.msra.gmra.mrb[48].mxu0 %vm138_vm1, %v11824_v45 }
 0x7d8   :  { %7773 = vmatpush1.bf16.msra.mxu0 %v7679_v55  ;;  %7804 = vmatprep.mubr.bf16.mxu0 %v12250_v41  ;;  %v7831_v54 = vsel %vm446_vm3, %v7820_v16, %v7822_v56  ;;  %v9789_v16 = vmov 5  }
 0x7d9   :  { %7844 = vmatprep.subr.bf16.mxu0 %v7830_v53  ;;  %9728 = vset.pattern.permute.xlu1 %v9789_v16 }
 0x7da   :  { %9729 = vset.pattern.permute.xlu0 %v9789_v16 }
 0x7db   :  { %v7826_v20 = vpop.permute.xlu1 %7825  ;;  %v7824_v48 = vpop.permute.xlu0 %7823 }
 0x7dc   :  { %v7832_v44 = vsel %vm446_vm3, %v7822_v56, %v7824_v48  ;;  %v7833_v33 = vsel %vm446_vm3, %v7824_v48, %v7826_v20 }
 0x7df   :  { %v7978_v4 = vpop.permute.xlu1 %7977  ;;  %v7828_v25 = vpop.permute.xlu0 %7827  ;;  %9145 = vmatmul.mubr.msk.bf16.vlgmr.msra.gmra.mrb[52].mxu0 %vm138_vm1, %v11824_v45 }
 0x7e0   :  { %7845 = vmatpush1.bf16.msra.mxu0 %v7829_v46  ;;  %7876 = vmatprep.mubr.bf16.mxu0 %v12250_v41  ;;  %v7834_v52 = vsel %vm446_vm3, %v7826_v20, %v7828_v25  ;;  %v9164_v25 = vcombine.high %v11824_v45, %v11824_v45 }
 0x7e1   :  { %7885 = vmatprep.subr.bf16.mxu0 %v7832_v44 }
 0x7e3   :  { %v7976_v63 = vpop.permute.xlu1 %7975  ;;  %v7980_v3 = vpop.permute.xlu0 %7979 }
 0x7e4   :  { %v7990_v21 = vsel %vm619_vm4, %v7978_v4, %v7980_v3  ;;  %v7989_v1 = vsel %vm619_vm4, %v7976_v63, %v7978_v4 }
 0x7e7   :  { %v7982_v15 = vpop.permute.xlu1 %7981  ;;  %v7974_v13 = vpop.permute.xlu0 %7973  ;;  %9146 = vmatmul.mubr.msk.bf16.vlgmr.msra.gmra.mrb[56].mxu0 %vm138_vm1, %v7814_v9 }
 0x7e8   :  { %7886 = vmatpush1.bf16.msra.mxu0 %v7831_v54  ;;  %7917 = vmatprep.mubr.bf16.mxu0 %v12250_v41  ;;  %v7991_v34 = vsel %vm619_vm4, %v7980_v3, %v7982_v15 }
 0x7e9   :  { %7926 = vmatprep.subr.bf16.mxu0 %v7834_v52 }
 0x7eb   :  { %v7986_v0 = vpop.permute.xlu1 %7985  ;;  %v7984_v32 = vpop.permute.xlu0 %7983 }
 0x7ec   :  { %v7992_v24 = vsel %vm619_vm4, %v7982_v15, %v7984_v32  ;;  %v7993_v51 = vsel %vm619_vm4, %v7984_v32, %v7986_v0 }
 0x7ef   :  { %v12035_v5 = vpop.permute.xlu1 %8133  ;;  %v7988_v2 = vpop.permute.xlu0 %7987  ;;  %9147 = vmatmul.mubr.msk.bf16.vlgmr.msra.gmra.mrb[60].mxu0 %vm138_vm1, %v7814_v9 }
 0x7f0   :  { %7927 = vmatpush1.bf16.msra.mxu0 %v7833_v33  ;;  %7958 = vmatprep.mubr.bf16.mxu0 %v12250_v41  ;;  %v7994_v50 = vsel %vm619_vm4, %v7986_v0, %v7988_v2 }
 0x7f1   :  { %8004 = vmatprep.subr.bf16.mxu0 %v7990_v21 }
 0x7f3   :  { %v12040_v37 = vpop.permute.xlu1 %8287  ;;  %v12042_v29 = vpop.permute.xlu0 %8285 }
 0x7f4   :  { %v8298_v55 = vsel %vm1011_vm5, %v12042_v29, %v12040_v37 }
 0x7f7   :  { %v12045_v40 = vpop.permute.xlu1 %8274  ;;  %v12047_v28 = vpop.permute.xlu0 %8283  ;;  %9148 = vmatmul.mubr.msk.bf16.vlgmr.msra.gmra.mrb[64].mxu0 %vm138_vm1, %v7814_v9 }
 0x7f8   :  { %8005 = vmatpush1.bf16.msra.mxu0 %v7989_v1  ;;  %8036 = vmatprep.mubr.bf16.mxu0 %v12250_v41 }
 0x7f9   :  { %8045 = vmatprep.subr.bf16.mxu0 %v7992_v24 }
 0x7fb   :  { %v12052_v22 = vpop.permute.xlu1 %8295  ;;  %v8446_v62 = vpop.permute.xlu0 %8445 }
 0x7ff   :  { %v12055_v61 = vpop.permute.xlu1 %8447  ;;  %v8444_v39 = vpop.permute.xlu0 %8443  ;;  %9149 = vmatmul.mubr.msk.bf16.vlgmr.msra.gmra.mrb[68].mxu0 %vm138_vm1, %v7974_v13 }
 0x800   :  { %8046 = vmatpush1.bf16.msra.mxu0 %v7991_v34  ;;  %8077 = vmatprep.mubr.bf16.mxu0 %v12250_v41  ;;  %v8458_v43 = vsel %vm1184_vm6, %v8446_v62, %v12055_v61  ;;  %v8457_v8 = vsel %vm1184_vm6, %v8444_v39, %v8446_v62 }
 0x801   :  { %8086 = vmatprep.subr.bf16.mxu0 %v7994_v50 }
 0x803   :  { %v12060_v31 = vpop.permute.xlu1 %8291  ;;  %v8290_v11 = vpop.permute.xlu0 %8289 }
 0x804   :  { %v8299_v57 = vsel %vm1011_vm5, %v12040_v37, %v8290_v11  ;;  %v8300_v6 = vsel %vm1011_vm5, %v8290_v11, %v12060_v31 }
 0x805   :  { %8353 = vmatprep.subr.bf16.mxu1 %v8300_v6 }
 0x806   :  { %8354 = vmatpush1.bf16.msra.mxu1 %v8299_v57 }
 0x807   :  { %v12069_v10 = vpop.permute.xlu1 %8441  ;;  %8472 = vmatprep.subr.bf16.mxu1 %v8458_v43  ;;  %v12071_v59 = vpop.permute.xlu0 %8605  ;;  %9150 = vmatmul.mubr.msk.bf16.vlgmr.msra.gmra.mrb[72].mxu0 %vm138_vm1, %v7974_v13 }
 0x808   :  { %8087 = vmatpush1.bf16.msra.mxu0 %v7993_v51  ;;  %8118 = vmatprep.mubr.bf16.mxu0 %v12250_v41 }
 0x809   :  { %8138 = vmatprep.subr.bf16.mxu0 %v11828_v7  ;;  %9156 = vmatmul.mubr.msk.bf16.vlgmr.msra.gmra.mrb[28].mxu1 %vm138_vm1, %v12045_v40 }
 0x80a   :  { %8473 = vmatpush1.bf16.msra.mxu1 %v8457_v8  ;;  %8504 = vmatprep.mubr.bf16.mxu1 %v12250_v41 }
 0x80b   :  { %v8456_v17 = vpop.permute.xlu1 %8455  ;;  %v12080_v26 = vpop.permute.xlu0 %8603 }
 0x80c   :  { %v8617_v32 = vsel %vm1357_vm7, %v12080_v26, %v12071_v59 }
 0x80f   :  { %v12082_v35 = vpop.permute.xlu1 %8607  ;;  %v8294_v14 = vpop.permute.xlu0 %8293  ;;  %9151 = vmatmul.mubr.msk.bf16.vlgmr.msra.gmra.mrb[76].mxu0 %vm138_vm1, %v7974_v13 }
 0x810   :  { %8139 = vmatpush1.bf16.msra.mxu0 %v11826_v23  ;;  %8170 = vmatprep.mubr.bf16.mxu0 %v12250_v41  ;;  %v8302_v4 = vsel %vm1011_vm5, %v8294_v14, %v12052_v22  ;;  %v8301_v3 = vsel %vm1011_vm5, %v12060_v31, %v8294_v14  ;;  %v8618_v0 = vsel %vm1357_vm7, %v12071_v59, %v12082_v35 }
 0x811   :  { %8179 = vmatprep.subr.bf16.mxu0 %v11864_v27  ;;  %9158 = vmatmul.mubr.msk.bf16.vlgmr.msra.gmra.mrb[32].mxu1 %vm138_vm1, %v12069_v10 }
 0x812   :  { %8586 = vmatprep.mubr.bf16.mxu1 %v12250_v41 }
 0x813   :  { %v8452_v7 = vpop.permute.xlu1 %8451  ;;  %v12091_v19 = vpop.permute.xlu0 %8449 }
 0x814   :  { %v8460_v15 = vsel %vm1184_vm6, %v12091_v19, %v8452_v7  ;;  %v8459_v52 = vsel %vm1184_vm6, %v12055_v61, %v12091_v19 }
 0x817   :  { %v12093_v18 = vpop.permute.xlu1 %8601  ;;  %v8454_v60 = vpop.permute.xlu0 %8453  ;;  %9152 = vmatmul.mubr.msk.bf16.vlgmr.msra.gmra.mrb[80].mxu0 %vm138_vm1, %v12035_v5 }
 0x818   :  { %v8461_v23 = vsel %vm1184_vm6, %v8452_v7, %v8454_v60  ;;  %8180 = vmatpush1.bf16.msra.mxu0 %v11862_v12  ;;  %v8462_v27 = vsel %vm1184_vm6, %v8454_v60, %v8456_v17  ;;  %8211 = vmatprep.mubr.bf16.mxu0 %v12250_v41  ;;  %v8921_v12 = vld [vmem:[%s12195_s9] sm:$0xff] }
 0x819   :  { %8220 = vmatprep.subr.bf16.mxu0 %v11884_v38  ;;  %8554 = vmatprep.subr.bf16.mxu1 %v8462_v27 }
 0x81a   :  { %8555 = vmatpush1.bf16.msra.mxu1 %v8461_v23  ;;  %8924 = vperm.xlu1 %9728, %v8921_v12  }
 0x81b   :  { %v12102_v30 = vpop.permute.xlu1 %8611  ;;  %v8610_v36 = vpop.permute.xlu0 %8609 }
 0x81c   :  { %v8619_v58 = vsel %vm1357_vm7, %v12082_v35, %v8610_v36  ;;  %v8620_v42 = vsel %vm1357_vm7, %v8610_v36, %v12102_v30 }
 0x81d   :  { %8673 = vmatprep.subr.bf16.mxu1 %v8620_v42  ;;  %9160 = vmatmul.mubr.msk.bf16.vlgmr.msra.gmra.mrb[36].mxu1 %vm138_vm1, %v12069_v10 }
 0x81e   :  { %8674 = vmatpush1.bf16.msra.mxu1 %v8619_v58  ;;  %8705 = vmatprep.mubr.bf16.mxu1 %v12250_v41 }
 0x81f   :  { %v8616_v38 = vpop.permute.xlu1 %8615  ;;  %v8766_v49 = vpop.permute.xlu0 %8765  ;;  %9153 = vmatmul.mubr.msk.bf16.vlgmr.msra.gmra.mrb[84].mxu0 %vm138_vm1, %v12035_v5 }
 0x820   :  { %8221 = vmatpush1.bf16.msra.mxu0 %v11882_v47  ;;  %8252 = vmatprep.mubr.bf16.mxu0 %v12250_v41  ;;  %v8297_v47 = vsel %vm1011_vm5, %v12047_v28, %v12042_v29 }
 0x821   :  { %8312 = vmatprep.subr.bf16.mxu0 %v8298_v55 }
 0x823   :  { %v8768_v56 = vpop.permute.xlu1 %8767  ;;  %v8764_v9 = vpop.permute.xlu0 %8763 }
 0x824   :  { %v8777_v53 = vsel %vm1531_vm8, %v8764_v9, %v8766_v49  ;;  %v8778_v20 = vsel %vm1531_vm8, %v8766_v49, %v8768_v56 }
 0x825   :  { %8792 = vmatprep.subr.bf16.mxu1 %v8778_v20  ;;  %9162 = vmatmul.mubr.msk.bf16.vlgmr.msra.gmra.mrb[40].mxu1 %vm138_vm1, %v12093_v18 }
 0x826   :  { %8793 = vmatpush1.bf16.msra.mxu1 %v8777_v53  ;;  %8824 = vmatprep.mubr.bf16.mxu1 %v12250_v41 }
 0x827   :  { %v8614_v48 = vpop.permute.xlu0 %8613  ;;  %9154 = vmatmul.mubr.msk.bf16.vlgmr.msra.gmra.mrb[88].mxu0 %vm138_vm1, %v12035_v5  ;;  %v8770_v46 = vpop.permute.xlu1 %8769 }
 0x828   :  { %8313 = vmatpush1.bf16.msra.mxu0 %v8297_v47  ;;  %8344 = vmatprep.mubr.bf16.mxu0 %v12250_v41  ;;  %v8622_v33 = vsel %vm1357_vm7, %v8614_v48, %v8616_v38  ;;  %v8621_v5 = vsel %vm1357_vm7, %v12102_v30, %v8614_v48  ;;  %v8779_v21 = vsel %vm1531_vm8, %v8768_v56, %v8770_v46 }
 0x829   :  { %8394 = vmatprep.subr.bf16.mxu0 %v8302_v4 }
 0x82b   :  { %v8772_v44 = vpop.permute.xlu0 %8771  ;;  %v8774_v63 = vpop.permute.xlu1 %8773 }
 0x82c   :  { %v8781_v45 = vsel %vm1531_vm8, %v8772_v44, %v8774_v63  ;;  %v8780_v2 = vsel %vm1531_vm8, %v8770_v46, %v8772_v44 }
 0x82d   :  { %9165 = vmatmul.mubr.msk.bf16.vlgmr.msra.gmra.mrb[44].mxu1 %vm138_vm1, %v9164_v25 }
 0x82e   :  { %8906 = vmatprep.mubr.bf16.mxu1 %v12250_v41 }
 0x82f   :  { %v8776_v54 = vpop.permute.xlu0 %8775  ;;  %9155 = vmatmul.mubr.msk.bf16.vlgmr.msra.gmra.mrb[92].mxu0 %vm138_vm1, %v12045_v40 }
 0x830   :  { %8395 = vmatpush1.bf16.msra.mxu0 %v8301_v3  ;;  %v8782_v13 = vsel %vm1531_vm8, %v8774_v63, %v8776_v54  ;;  %8426 = vmatprep.mubr.bf16.mxu0 %v12250_v41 }
 0x831   :  { %8513 = vmatprep.subr.bf16.mxu0 %v8460_v15  ;;  %8874 = vmatprep.subr.bf16.mxu1 %v8782_v13 }
 0x832   :  { %8875 = vmatpush1.bf16.msra.mxu1 %v8781_v45 }
 0x835   :  { %9167 = vmatmul.mubr.msk.bf16.vlgmr.msra.gmra.mrb[48].mxu1 %vm138_vm1, %v9164_v25 }
 0x837   :  { %9157 = vmatmul.mubr.msk.bf16.vlgmr.msra.gmra.mrb[96].mxu0 %vm138_vm1, %v12045_v40 }
 0x838   :  { %8514 = vmatpush1.bf16.msra.mxu0 %v8459_v52  ;;  %8545 = vmatprep.mubr.bf16.mxu0 %v12250_v41 }
 0x839   :  { %8632 = vmatprep.subr.bf16.mxu0 %v8618_v0 }
 0x83f   :  { %9159 = vmatmul.mubr.msk.bf16.vlgmr.msra.gmra.mrb[100].mxu0 %vm138_vm1, %v12069_v10 }
 0x840   :  { %8633 = vmatpush1.bf16.msra.mxu0 %v8617_v32  ;;  %8664 = vmatprep.mubr.bf16.mxu0 %v12250_v41 }
 0x841   :  { %8714 = vmatprep.subr.bf16.mxu0 %v8622_v33 }
 0x847   :  { %9161 = vmatmul.mubr.msk.bf16.vlgmr.msra.gmra.mrb[104].mxu0 %vm138_vm1, %v12093_v18 }
 0x848   :  { %8715 = vmatpush1.bf16.msra.mxu0 %v8621_v5  ;;  %8746 = vmatprep.mubr.bf16.mxu0 %v12250_v41 }
 0x849   :  { %8833 = vmatprep.subr.bf16.mxu0 %v8780_v2 }
 0x84f   :  { %9163 = vmatmul.mubr.msk.bf16.vlgmr.msra.gmra.mrb[108].mxu0 %vm138_vm1, %v12093_v18 }
 0x850   :  { %8834 = vmatpush1.bf16.msra.mxu0 %v8779_v21  ;;  %8865 = vmatprep.mubr.bf16.mxu0 %v12250_v41 }
 0x857   :  { %9166 = vmatmul.mubr.msk.bf16.vlgmr.msra.gmra.mrb[112].mxu0 %vm138_vm1, %v9164_v25 }
 0x88a   :  { %v7572_v37 = vpop.f32.mrb[32].mxu0 }
 0x88b   :  { %v7574_v29 = vpop.f32.mrb[33].mxu0 }
 0x88c   :  { %v7576_v1 = vpop.f32.mrb[34].mxu0 }
 0x88d   :  { %v7577_v40 = vpop.f32.mrb[35].mxu0 }
 0x892   :  { %v7613_v28 = vpop.f32.mrb[36].mxu0 }
 0x893   :  { %v7615_v24 = vpop.f32.mrb[37].mxu0 }
 0x894   :  { %v7617_v22 = vpop.f32.mrb[38].mxu0 }
 0x895   :  { %v7618_v62 = vpop.f32.mrb[39].mxu0 }
 0x89a   :  { %v7654_v34 = vpop.f32.mrb[40].mxu0 }
 0x89b   :  { %v7656_v61 = vpop.f32.mrb[41].mxu0 }
 0x89c   :  { %v7658_v39 = vpop.f32.mrb[42].mxu0 }
 0x89d   :  { %v7659_v50 = vpop.f32.mrb[43].mxu0 }
 0x8a2   :  { %v7724_v31 = vpop.f32.mrb[44].mxu0 }
 0x8a3   :  { %v7725_v11 = vadd.f32 %v7724_v31, %v7572_v37  ;;  %v7726_v57 = vpop.f32.mrb[45].mxu0 }
 0x8a4   :  { %v7727_v6 = vadd.f32 %v7726_v57, %v7574_v29  ;;  %v7728_v43 = vpop.f32.mrb[46].mxu0 }
 0x8a5   :  { %v7729_v41 = vpop.f32.mrb[47].mxu0 }
 0x8aa   :  { %v7765_v51 = vpop.f32.mrb[48].mxu0 }
 0x8ab   :  { %v7766_v10 = vadd.f32 %v7765_v51, %v7613_v28  ;;  %v7767_v59 = vpop.f32.mrb[49].mxu0 }
 0x8ac   :  { %v7768_v8 = vadd.f32 %v7767_v59, %v7615_v24  ;;  %v7769_v17 = vpop.f32.mrb[50].mxu0 }
 0x8ad   :  { %v7770_v26 = vpop.f32.mrb[51].mxu0 }
 0x8b2   :  { %v7806_v35 = vpop.f32.mrb[52].mxu0 }
 0x8b3   :  { %v7807_v14 = vadd.f32 %v7806_v35, %v7654_v34  ;;  %v7808_v7 = vpop.f32.mrb[53].mxu0 }
 0x8b4   :  { %v7809_v19 = vadd.f32 %v7808_v7, %v7656_v61  ;;  %v7810_v18 = vpop.f32.mrb[54].mxu0 }
 0x8b5   :  { %v7811_v60 = vpop.f32.mrb[55].mxu0 }
 0x8ba   :  { %v7878_v23 = vpop.f32.mrb[56].mxu0 }
 0x8bb   :  { %v7967_v27 = vadd.f32 %v7878_v23, %v7725_v11  ;;  %v7880_v30 = vpop.f32.mrb[57].mxu0 }
 0x8bc   :  { %v7968_v36 = vadd.f32 %v7880_v30, %v7727_v6  ;;  %v7882_v58 = vpop.f32.mrb[58].mxu0 }
 0x8bd   :  { %v7883_v42 = vpop.f32.mrb[59].mxu0 }
 0x8c2   :  { %v7919_v12 = vpop.f32.mrb[60].mxu0 }
 0x8c3   :  { %v7969_v38 = vadd.f32 %v7919_v12, %v7766_v10  ;;  %v7921_v49 = vpop.f32.mrb[61].mxu0 }
 0x8c4   :  { %v7970_v16 = vadd.f32 %v7921_v49, %v7768_v8  ;;  %v7923_v55 = vpop.f32.mrb[62].mxu0 }
 0x8c5   :  { %v7924_v56 = vpop.f32.mrb[63].mxu0 }
 0x8ca   :  { %v7960_v9 = vpop.f32.mrb[64].mxu0 }
 0x8cb   :  { %v7971_v53 = vadd.f32 %v7960_v9, %v7807_v14  ;;  %v7962_v20 = vpop.f32.mrb[65].mxu0 }
 0x8cc   :  { %v7972_v47 = vadd.f32 %v7962_v20, %v7809_v19  ;;  %v7964_v48 = vpop.f32.mrb[66].mxu0 }
 0x8cd   :  { %v7965_v46 = vpop.f32.mrb[67].mxu0 }
 0x8d2   :  { %v8038_v4 = vpop.f32.mrb[68].mxu0 }
 0x8d3   :  { %v8127_v25 = vadd.f32 %v8038_v4, %v7967_v27  ;;  %v8040_v44 = vpop.f32.mrb[69].mxu0 }
 0x8d4   :  { %v8128_v63 = vadd.f32 %v8040_v44, %v7968_v36  ;;  %v8042_v3 = vpop.f32.mrb[70].mxu0 }
 0x8d5   :  { %v8043_v54 = vpop.f32.mrb[71].mxu0 }
 0x8da   :  { %v8079_v15 = vpop.f32.mrb[72].mxu0 }
 0x8db   :  { %v8129_v13 = vadd.f32 %v8079_v15, %v7969_v38  ;;  %v8081_v45 = vpop.f32.mrb[73].mxu0 }
 0x8dc   :  { %v8130_v52 = vadd.f32 %v8081_v45, %v7970_v16  ;;  %v8083_v0 = vpop.f32.mrb[74].mxu0  ;;  %v8387_v32 = vpop.f32.mrb[28].mxu1 }
 0x8dd   :  { %v8084_v33 = vpop.f32.mrb[75].mxu0  ;;  %v8389_v5 = vpop.f32.mrb[29].mxu1 }
 0x8de   :  { %v8391_v2 = vpop.f32.mrb[30].mxu1 }
 0x8df   :  { %v8392_v21 = vpop.f32.mrb[31].mxu1 }
 0x8e2   :  { %v8120_v37 = vpop.f32.mrb[76].mxu0 }
 0x8e3   :  { %v8131_v29 = vadd.f32 %v8120_v37, %v7971_v53  ;;  %v8122_v1 = vpop.f32.mrb[77].mxu0 }
 0x8e4   :  { %v8132_v40 = vadd.f32 %v8122_v1, %v7972_v47  ;;  %v8124_v28 = vpop.f32.mrb[78].mxu0  ;;  %v8506_v24 = vpop.f32.mrb[32].mxu1 }
 0x8e5   :  { %v8125_v22 = vpop.f32.mrb[79].mxu0  ;;  %v8508_v62 = vpop.f32.mrb[33].mxu1 }
 0x8e6   :  { %v8510_v34 = vpop.f32.mrb[34].mxu1 }
 0x8e7   :  { %v8511_v61 = vpop.f32.mrb[35].mxu1 }
 0x8ea   :  { %v8172_v39 = vpop.f32.mrb[80].mxu0 }
 0x8eb   :  { %v8261_v50 = vadd.f32 %v8172_v39, %v8127_v25  ;;  %v8174_v31 = vpop.f32.mrb[81].mxu0 }
 0x8ec   :  { %v8262_v11 = vadd.f32 %v8174_v31, %v8128_v63  ;;  %v8176_v57 = vpop.f32.mrb[82].mxu0 }
 0x8ed   :  { %v8177_v6 = vpop.f32.mrb[83].mxu0 }
 0x8f0   :  { %v8588_v43 = vpop.f32.mrb[36].mxu1 }
 0x8f1   :  { %v8590_v41 = vpop.f32.mrb[37].mxu1 }
 0x8f2   :  { %v8213_v51 = vpop.f32.mrb[84].mxu0  ;;  %v8592_v10 = vpop.f32.mrb[38].mxu1 }
 0x8f3   :  { %v8263_v59 = vadd.f32 %v8213_v51, %v8129_v13  ;;  %v8215_v8 = vpop.f32.mrb[85].mxu0  ;;  %v8593_v17 = vpop.f32.mrb[39].mxu1 }
 0x8f4   :  { %v8264_v26 = vadd.f32 %v8215_v8, %v8130_v52  ;;  %v8217_v35 = vpop.f32.mrb[86].mxu0 }
 0x8f5   :  { %v8218_v14 = vpop.f32.mrb[87].mxu0  ;;  %v8437_v7 = vadd.f32 %v8387_v32, %v8263_v59 }
 0x8f6   :  { %v8438_v19 = vadd.f32 %v8389_v5, %v8264_v26 }
 0x8f8   :  { %v8707_v18 = vpop.f32.mrb[40].mxu1 }
 0x8f9   :  { %v8709_v60 = vpop.f32.mrb[41].mxu1 }
 0x8fa   :  { %v8254_v23 = vpop.f32.mrb[88].mxu0  ;;  %v8711_v27 = vpop.f32.mrb[42].mxu1 }
 0x8fb   :  { %v8265_v30 = vadd.f32 %v8254_v23, %v8131_v29  ;;  %v8256_v36 = vpop.f32.mrb[89].mxu0  ;;  %v8712_v58 = vpop.f32.mrb[43].mxu1 }
 0x8fc   :  { %v8266_v42 = vadd.f32 %v8256_v36, %v8132_v40  ;;  %v8258_v12 = vpop.f32.mrb[90].mxu0 }
 0x8fd   :  { %v8259_v38 = vpop.f32.mrb[91].mxu0 }
 0x900   :  { %v8826_v49 = vpop.f32.mrb[44].mxu1 }
 0x901   :  { %v8828_v16 = vpop.f32.mrb[45].mxu1 }
 0x902   :  { %v8346_v55 = vpop.f32.mrb[92].mxu0  ;;  %v8830_v56 = vpop.f32.mrb[46].mxu1 }
 0x903   :  { %v8435_v9 = vadd.f32 %v8346_v55, %v8261_v50  ;;  %v8348_v53 = vpop.f32.mrb[93].mxu0  ;;  %v8831_v20 = vpop.f32.mrb[47].mxu1 }
 0x904   :  { %v8436_v47 = vadd.f32 %v8348_v53, %v8262_v11  ;;  %v8350_v48 = vpop.f32.mrb[94].mxu0  ;;  %v8925_v50 = vpop.permute.xlu1 %8924 }
 0x905   :  { %v8351_v46 = vpop.f32.mrb[95].mxu0  ;;  %v8595_v4 = vadd.f32 %v8506_v24, %v8435_v9 }
 0x906   :  { %v8596_v25 = vadd.f32 %v8508_v62, %v8436_v47 }
 0x908   :  { %v8908_v44 = vpop.f32.mrb[48].mxu1 }
 0x909   :  { %v8910_v63 = vpop.f32.mrb[49].mxu1 }
 0x90a   :  { %v8428_v3 = vpop.f32.mrb[96].mxu0  ;;  %v8912_v54 = vpop.f32.mrb[50].mxu1 }
 0x90b   :  { %v8439_v15 = vadd.f32 %v8428_v3, %v8265_v30  ;;  %v8430_v13 = vpop.f32.mrb[97].mxu0  ;;  %v8913_v45 = vpop.f32.mrb[51].mxu1 }
 0x90c   :  { %v8440_v52 = vadd.f32 %v8430_v13, %v8266_v42  ;;  %v8432_v0 = vpop.f32.mrb[98].mxu0 }
 0x90d   :  { %v8433_v32 = vpop.f32.mrb[99].mxu0  ;;  %v8599_v33 = vadd.f32 %v8588_v43, %v8439_v15 }
 0x90e   :  { %v8600_v5 = vadd.f32 %v8590_v41, %v8440_v52 }
 0x912   :  { %v8547_v2 = vpop.f32.mrb[100].mxu0 }
 0x913   :  { %v8597_v21 = vadd.f32 %v8547_v2, %v8437_v7  ;;  %v8549_v37 = vpop.f32.mrb[101].mxu0 }
 0x914   :  { %v8598_v29 = vadd.f32 %v8549_v37, %v8438_v19  ;;  %v8551_v1 = vpop.f32.mrb[102].mxu0 }
 0x915   :  { %v8552_v40 = vpop.f32.mrb[103].mxu0  ;;  %v8757_v28 = vadd.f32 %v8707_v18, %v8597_v21 }
 0x916   :  { %v8758_v24 = vadd.f32 %v8709_v60, %v8598_v29 }
 0x91a   :  { %v8666_v22 = vpop.f32.mrb[104].mxu0 }
 0x91b   :  { %v8755_v62 = vadd.f32 %v8666_v22, %v8595_v4  ;;  %v8668_v34 = vpop.f32.mrb[105].mxu0 }
 0x91c   :  { %v8756_v61 = vadd.f32 %v8668_v34, %v8596_v25  ;;  %v8670_v39 = vpop.f32.mrb[106].mxu0 }
 0x91d   :  { %v8915_v31 = vadd.f32 %v8826_v49, %v8755_v62  ;;  %v8671_v11 = vpop.f32.mrb[107].mxu0 }
 0x91e   :  { %v8916_v57 = vadd.f32 %v8828_v16, %v8756_v61 }
 0x91f   :  { %v8927_v6 = vadd.f32 %v8925_v50, %v8915_v31 }
 0x920   :  { %v8928_v43 = vadd.f32 %v8925_v50, %v8916_v57 }
 0x921   :  { %v9168_v41 = vmul.f32 -1.442695, %v8927_v6 }
 0x922   :  { %v9169_v51 = vmul.f32 -1.442695, %v8928_v43  ;;  %v8748_v10 = vpop.f32.mrb[108].mxu0 }
 0x923   :  { %9745 = vpow2.f32 %v9168_v41  ;;  %v8759_v59 = vadd.f32 %v8748_v10, %v8599_v33  ;;  %v8750_v8 = vpop.f32.mrb[109].mxu0 }
 0x924   :  { %9747 = vpow2.f32 %v9169_v51  ;;  %v8760_v17 = vadd.f32 %v8750_v8, %v8600_v5  ;;  %v8752_v26 = vpop.f32.mrb[110].mxu0 }
 0x925   :  { %v8919_v35 = vadd.f32 %v8908_v44, %v8759_v59  ;;  %v8753_v14 = vpop.f32.mrb[111].mxu0 }
 0x926   :  { %v8920_v7 = vadd.f32 %v8910_v63, %v8760_v17 }
 0x927   :  { %v8931_v19 = vadd.f32 %v8925_v50, %v8919_v35 }
 0x928   :  { %v8932_v18 = vadd.f32 %v8925_v50, %v8920_v7 }
 0x929   :  { %v9172_v60 = vmul.f32 -1.442695, %v8931_v19 }
 0x92a   :  { %v9173_v23 = vmul.f32 -1.442695, %v8932_v18  ;;  %v8867_v27 = vpop.f32.mrb[112].mxu0 }
 0x92b   :  { %9749 = vpow2.f32 %v9172_v60  ;;  %v8917_v30 = vadd.f32 %v8867_v27, %v8757_v28  ;;  %v8869_v36 = vpop.f32.mrb[113].mxu0 }
 0x92c   :  { %9751 = vpow2.f32 %v9173_v23  ;;  %v8918_v58 = vadd.f32 %v8869_v36, %v8758_v24  ;;  %v8871_v42 = vpop.f32.mrb[114].mxu0 }
 0x92d   :  { %v9746_v12 = vpop.eup %9745  ;;  %v8929_v38 = vadd.f32 %v8925_v50, %v8917_v30  ;;  %v8872_v49 = vpop.f32.mrb[115].mxu0 }
 0x92e   :  { %v9748_v16 = vpop.eup %9747  ;;  %v8951_v55 = vadd.f32 1.0, %v9746_v12  ;;  %v8930_v56 = vadd.f32 %v8925_v50, %v8918_v58 }
 0x92f   :  { %v8952_v9 = vadd.f32 1.0, %v9748_v16  ;;  %v9170_v53 = vmul.f32 -1.442695, %v8929_v38 }
 0x930   :  { %9753 = vrcp.f32 %v8951_v55  ;;  %v9171_v20 = vmul.f32 -1.442695, %v8930_v56 }
 0x931   :  { %9755 = vrcp.f32 %v8952_v9 }
 0x932   :  { %9757 = vpow2.f32 %v9170_v53 }
 0x933   :  { %9759 = vpow2.f32 %v9171_v20 }
 0x935   :  { %v9750_v47 = vpop.eup %9749 }
 0x936   :  { %v9752_v48 = vpop.eup %9751  ;;  %v8955_v46 = vadd.f32 1.0, %v9750_v47 }
 0x937   :  { %v8956_v4 = vadd.f32 1.0, %v9752_v48 }
 0x938   :  { %9761 = vrcp.f32 %v8955_v46 }
 0x939   :  { %9763 = vrcp.f32 %v8956_v4 }
 0x93a   :  { %v9754_v25 = vpop.eup %9753 }
 0x93b   :  { %v9756_v44 = vpop.eup %9755  ;;  %8969 = vst [vmem:[%s12203_s10] sm:$0xff] %v9754_v25 }
 0x93c   :  { %v9758_v63 = vpop.eup %9757  ;;  %8970 = vst [vmem:[%s12203_s10 + $0x8] sm:$0xff] %v9756_v44 }
 0x93d   :  { %v9760_v3 = vpop.eup %9759  ;;  %v8953_v54 = vadd.f32 1.0, %v9758_v63 }
 0x93e   :  { %v8954_v15 = vadd.f32 1.0, %v9760_v3 }
 0x93f   :  { %9765 = vrcp.f32 %v8953_v54 }
 0x940   :  { %9767 = vrcp.f32 %v8954_v15 }
 0x942   :  { %v9762_v13 = vpop.eup %9761 }
 0x943   :  { %v9764_v45 = vpop.eup %9763  ;;  %8973 = vst [vmem:[%s12203_s10 + $0x20] sm:$0xff] %v9762_v13 }
 0x944   :  { %8974 = vst [vmem:[%s12203_s10 + $0x28] sm:$0xff] %v9764_v45 }
 0x949   :  { %v9766_v52 = vpop.eup %9765 }
 0x94a   :  { %v9768_v0 = vpop.eup %9767  ;;  %8971 = vst [vmem:[%s12203_s10 + $0x10] sm:$0xff] %v9766_v52 }
 0x94b   :  { %8972 = vst [vmem:[%s12203_s10 + $0x18] sm:$0xff] %v9768_v0 }

</bundles_post_ra>
